<compile_context>
chip_gen: v6e
topology: v6e:2x2x1
jax: 0.10.0
libtpu: 0.0.40
codegen_flags: <defaults>
</compile_context>

<pallas_src>
import jax
import jax.numpy as jnp
import numpy as np
from jax import lax
from jax.experimental import pallas as pl
from jax.experimental.pallas import tpu as pltpu

# ----------------------------------------------------------------------------
# Static network dims (LeNet on 3x32x32, batch fixed at 2 for this script)
# ----------------------------------------------------------------------------
N_BATCH = 2
CIN1, COUT1, K = 3, 6, 5
H0 = W0 = 32
WO1 = H0 - K + 1            # 28  (conv1 output width/height)
HP1 = WP1 = WO1 // 2        # 14  (pool1 output)
CIN2, COUT2 = COUT1, 16
WO2 = HP1 - K + 1           # 10  (conv2 output)
HP2 = WP2 = WO2 // 2        # 5   (pool2 output)
FC1_OUT, FC2_OUT, FC3_OUT = 120, 84, 10
CPAD = 8                    # channel padding -> aligned sublane groups
ROWS1 = HP1 * CPAD          # 112  conv1 pooled slab rows: hp*8  + co
ROWS2 = HP2 * COUT2         # 80   conv2 pooled slab rows: hp*16 + co


# ----------------------------------------------------------------------------
# Fused kernel: one grid step == one image, everything stays in vregs.
# ----------------------------------------------------------------------------
def _lenet_kernel(x_ref, w1_ref, b1_ref, se1_ref, so1_ref,
                  w2_ref, b2_ref, se2_ref, so2_ref,
                  f1w_ref, f1b_ref, f2w_ref, f2b_ref, f3w_ref, f3b_ref,
                  o_ref):
    f32 = jnp.float32
    xn = x_ref[0]                                            # (H0*CPAD, W0) = (256, 32)

    # ---- conv1 + bias + ReLU + 2x2 max-pool: 5 shifted whole-image GEMMs ----
    acc1 = jnp.dot(w1_ref[0], xn[:, :WO1], preferred_element_type=f32)
    for kw in range(1, K):                                   # static unroll (4)
        acc1 = acc1 + jnp.dot(w1_ref[kw], xn[:, kw:kw + WO1],
                              preferred_element_type=f32)    # (224, 28)
    # rows 0..111 = even output rows, 112..223 = odd output rows (same order).
    rmax1 = jnp.maximum(acc1[:ROWS1], acc1[ROWS1:]) + b1_ref[...]
    p1 = jnp.maximum(
        jnp.maximum(jnp.dot(rmax1, se1_ref[...], preferred_element_type=f32),
                    jnp.dot(rmax1, so1_ref[...], preferred_element_type=f32)),
        0.0)                                                 # (112, 14): rows hp*8+co

    # ---- conv2 + bias + ReLU + 2x2 max-pool on the pooled slab ----
    acc2 = jnp.dot(w2_ref[0], p1[:, :WO2], preferred_element_type=f32)
    for kw in range(1, K):
        acc2 = acc2 + jnp.dot(w2_ref[kw], p1[:, kw:kw + WO2],
                              preferred_element_type=f32)    # (160, 10)
    rmax2 = jnp.maximum(acc2[:ROWS2], acc2[ROWS2:]) + b2_ref[...]
    p2 = jnp.maximum(
        jnp.maximum(jnp.dot(rmax2, se2_ref[...], preferred_element_type=f32),
                    jnp.dot(rmax2, so2_ref[...], preferred_element_type=f32)),
        0.0)                                                 # (80, 5): rows hp*16+co

    # ---- fc tail (feature-major column vectors) ----
    # fc1: 5 accumulated (120,80)@(80,1) GEMMs with lane-dense per-w weights.
    y1 = f1b_ref[...]
    for w in range(WP2):                                     # static unroll (5)
        y1 = y1 + jnp.dot(f1w_ref[w], p2[:, w:w + 1],
                          preferred_element_type=f32)
    y1 = jnp.maximum(y1, 0.0)                                # (120, 1)
    y2 = jnp.maximum(jnp.dot(f2w_ref[...], y1, preferred_element_type=f32)
                     + f2b_ref[...], 0.0)                    # (84, 1)
    o_ref[0] = jnp.dot(f3w_ref[...], y2, preferred_element_type=f32) + f3b_ref[...]


# ----------------------------------------------------------------------------
# One-time parameter repacking (hoisted out of the forward path)
# ----------------------------------------------------------------------------
def _row_sel(n_pool_rows, n_in_rows):
    """sel[parity, hp, kh, h] = 1 iff h == 2*hp + parity + kh."""
    p = np.arange(2)[:, None, None, None]
    hp = np.arange(n_pool_rows)[None, :, None, None]
    kh = np.arange(K)[None, None, :, None]
    h = np.arange(n_in_rows)[None, None, None, :]
    return (h == 2 * hp + p + kh).astype(np.float32)


def _pack_conv1(w):
    """(6,3,5,5) OIHW -> (K, 2*HP1*CPAD, H0*CPAD): per-kw whole-image weights."""
    sel = jnp.asarray(_row_sel(HP1, H0))                          # (2,14,5,32)
    pk = jnp.einsum("cikw,pqkH->wpqcHi", w, sel)                  # (5,2,14,6,32,3)
    pk = jnp.pad(pk, ((0, 0), (0, 0), (0, 0),
                      (0, CPAD - COUT1), (0, 0), (0, CPAD - CIN1)))
    return pk.reshape(K, 2 * HP1 * CPAD, H0 * CPAD)               # (5, 224, 256)


def _pack_conv2(w):
    """(16,6,5,5) OIHW -> (K, 2*HP2*COUT2, HP1*CPAD)."""
    sel = jnp.asarray(_row_sel(HP2, HP1))                         # (2,5,5,14)
    pk = jnp.einsum("cikw,pqkH->wpqcHi", w, sel)                  # (5,2,5,16,14,6)
    pk = jnp.pad(pk, ((0, 0), (0, 0), (0, 0), (0, 0), (0, 0), (0, CPAD - CIN2)))
    return pk.reshape(K, 2 * HP2 * COUT2, HP1 * CPAD)             # (5, 160, 112)


def _pool_sel(wo):
    """Even / odd column one-hot selectors (wo, wo//2)."""
    col = jnp.arange(wo)[:, None]
    sel = jnp.arange(wo // 2)[None, :]
    return ((col == 2 * sel).astype(jnp.float32),
            (col == 2 * sel + 1).astype(jnp.float32))


def prepare_params(p):
    se1, so1 = _pool_sel(WO1)
    se2, so2 = _pool_sel(WO2)
    b1 = jnp.pad(jnp.tile(p["conv1_b"][None, :], (HP1, 1)),
                 ((0, 0), (0, CPAD - COUT1))).reshape(ROWS1, 1)
    b2 = jnp.tile(p["conv2_b"][None, :], (HP2, 1)).reshape(ROWS2, 1)
    # fc1 weight as per-w blocks, lane-dense trailing dim of 80:
    # f1w[w, j, hp*16+co] = fc1_w[j, co*25 + hp*5 + w]
    f1w = p["fc1_w"].reshape(FC1_OUT, COUT2, HP2, WP2)
    f1w = jnp.transpose(f1w, (3, 0, 2, 1)).reshape(WP2, FC1_OUT, ROWS2)
    return dict(
        w1=_pack_conv1(p["conv1_w"]), b1=b1, se1=se1, so1=so1,
        w2=_pack_conv2(p["conv2_w"]), b2=b2, se2=se2, so2=so2,
        f1w=f1w, f1b=p["fc1_b"].reshape(FC1_OUT, 1),
        f2w=p["fc2_w"], f2b=p["fc2_b"].reshape(FC2_OUT, 1),
        f3w=p["fc3_w"], f3b=p["fc3_b"].reshape(FC3_OUT, 1),
    )


def _const_spec(shape):
    zeros = (0,) * len(shape)
    return pl.BlockSpec(shape, lambda n: zeros)


def net_forward(x, pp):
    assert x.shape == (N_BATCH, CIN1, H0, W0), x.shape
    # Input slab per image: rows = h*8 + ci (channels zero-padded to 8), lanes = w.
    xp = jnp.transpose(x, (0, 2, 1, 3)).astype(jnp.float32)      # (N, H, C, W)
    xp = jnp.pad(xp, ((0, 0), (0, 0), (0, CPAD - CIN1), (0, 0)))
    xp = xp.reshape(N_BATCH, H0 * CPAD, W0)

    weights = (pp["w1"], pp["b1"], pp["se1"], pp["so1"],
               pp["w2"], pp["b2"], pp["se2"], pp["so2"],
               pp["f1w"], pp["f1b"], pp["f2w"], pp["f2b"],
               pp["f3w"], pp["f3b"])
    in_specs = [pl.BlockSpec((1, H0 * CPAD, W0), lambda n: (n, 0, 0))]
    in_specs += [_const_spec(w.shape) for w in weights]

    out = pl.pallas_call(
        _lenet_kernel,
        out_shape=jax.ShapeDtypeStruct((N_BATCH, FC3_OUT, 1), jnp.float32),
        grid=(N_BATCH,),
        in_specs=in_specs,
        out_specs=pl.BlockSpec((1, FC3_OUT, 1), lambda n: (n, 0, 0)),
        compiler_params=pltpu.CompilerParams(
            dimension_semantics=("parallel",)),       # one image per TC on v7x
    )(xp, *weights)
    return out.reshape(N_BATCH, FC3_OUT)


# ----------------------------------------------------------------------------
# Pure-JAX reference (correctness check of the fused Pallas path)
# ----------------------------------------------------------------------------
def net_forward_ref(x, params):
    def conv(x, w, b):
        y = lax.conv_general_dilated(
            x, w, (1, 1), "VALID", dimension_numbers=("NCHW", "OIHW", "NCHW"))
        return jax.nn.relu(y + b[None, :, None, None])

    def pool(x):
        return lax.reduce_window(
            x, -jnp.inf, lax.max, (1, 1, 2, 2), (1, 1, 2, 2), "VALID")

    x = pool(conv(x, params["conv1_w"], params["conv1_b"]))
    x = pool(conv(x, params["conv2_w"], params["conv2_b"]))
    x = x.reshape(x.shape[0], 16 * 5 * 5)
    x = jax.nn.relu(x @ params["fc1_w"].T + params["fc1_b"])
    x = jax.nn.relu(x @ params["fc2_w"].T + params["fc2_b"])
    return x @ params["fc3_w"].T + params["fc3_b"]


def init_params(key):
    ks = jax.random.split(key, 10)

    def u(k, shape, fan_in):
        bound = 1.0 / jnp.sqrt(fan_in)
        return jax.random.uniform(k, shape, jnp.float32, -bound, bound)

    return {
        "conv1_w": u(ks[0], (6, 3, 5, 5), 3 * 5 * 5),
        "conv1_b": u(ks[1], (6,), 3 * 5 * 5),
        "conv2_w": u(ks[2], (16, 6, 5, 5), 6 * 5 * 5),
        "conv2_b": u(ks[3], (16,), 6 * 5 * 5),
        "fc1_w": u(ks[4], (120, 400), 400),
        "fc1_b": u(ks[5], (120,), 400),
        "fc2_w": u(ks[6], (84, 120), 120),
        "fc2_b": u(ks[7], (84,), 120),
        "fc3_w": u(ks[8], (10, 84), 84),
        "fc3_b": u(ks[9], (10,), 84),
    }


if __name__ == "__main__":
    key = jax.random.PRNGKey(0)
    pkey, xkey = jax.random.split(key)
    params = init_params(pkey)
    x = jax.random.normal(xkey, (N_BATCH, CIN1, H0, W0), jnp.float32)

    prepped = prepare_params(params)            # one-time weight repacking
    out = jax.block_until_ready(jax.jit(net_forward)(x, prepped))
    ref = jax.block_until_ready(jax.jit(net_forward_ref)(x, params))

    assert out.shape == (N_BATCH, FC3_OUT), out.shape
    err = float(jnp.max(jnp.abs(out - ref)))
    assert jnp.allclose(out, ref, atol=1e-3, rtol=1e-3), err
    print("KERNEL_OK")
</pallas_src>

<mosaic_0001>
module attributes {stable_mosaic.version = 11 : i64} {
  func.func @_lenet_kernel(%arg0: i32, %arg1: memref<1x256x32xf32, #tpu.memory_space<vmem>>, %arg2: memref<5x224x256xf32, #tpu.memory_space<vmem>>, %arg3: memref<112x1xf32, #tpu.memory_space<vmem>>, %arg4: memref<28x14xf32, #tpu.memory_space<vmem>>, %arg5: memref<28x14xf32, #tpu.memory_space<vmem>>, %arg6: memref<5x160x112xf32, #tpu.memory_space<vmem>>, %arg7: memref<80x1xf32, #tpu.memory_space<vmem>>, %arg8: memref<10x5xf32, #tpu.memory_space<vmem>>, %arg9: memref<10x5xf32, #tpu.memory_space<vmem>>, %arg10: memref<5x120x80xf32, #tpu.memory_space<vmem>>, %arg11: memref<120x1xf32, #tpu.memory_space<vmem>>, %arg12: memref<84x120xf32, #tpu.memory_space<vmem>>, %arg13: memref<84x1xf32, #tpu.memory_space<vmem>>, %arg14: memref<10x84xf32, #tpu.memory_space<vmem>>, %arg15: memref<10x1xf32, #tpu.memory_space<vmem>>, %arg16: memref<1x10x1xf32, #tpu.memory_space<vmem>>) attributes {dimension_semantics = [#tpu.dimension_semantics<parallel>], iteration_bounds = array<i64: 2>, scalar_prefetch = 0 : i64, scratch_operands = 0 : i64, tpu.core_type = #tpu.core_type<tc>, window_params = [{transform_indices = @transform_0, window_bounds = array<i64: 1, 256, 32>}, {pipeline_mode = #tpu.pipeline_mode<synchronous>, transform_indices = @transform_1, window_bounds = array<i64: 5, 224, 256>}, {pipeline_mode = #tpu.pipeline_mode<synchronous>, transform_indices = @transform_2, window_bounds = array<i64: 112, 1>}, {pipeline_mode = #tpu.pipeline_mode<synchronous>, transform_indices = @transform_3, window_bounds = array<i64: 28, 14>}, {pipeline_mode = #tpu.pipeline_mode<synchronous>, transform_indices = @transform_4, window_bounds = array<i64: 28, 14>}, {pipeline_mode = #tpu.pipeline_mode<synchronous>, transform_indices = @transform_5, window_bounds = array<i64: 5, 160, 112>}, {pipeline_mode = #tpu.pipeline_mode<synchronous>, transform_indices = @transform_6, window_bounds = array<i64: 80, 1>}, {pipeline_mode = #tpu.pipeline_mode<synchronous>, transform_indices = @transform_7, window_bounds = array<i64: 10, 5>}, {pipeline_mode = #tpu.pipeline_mode<synchronous>, transform_indices = @transform_8, window_bounds = array<i64: 10, 5>}, {pipeline_mode = #tpu.pipeline_mode<synchronous>, transform_indices = @transform_9, window_bounds = array<i64: 5, 120, 80>}, {pipeline_mode = #tpu.pipeline_mode<synchronous>, transform_indices = @transform_10, window_bounds = array<i64: 120, 1>}, {pipeline_mode = #tpu.pipeline_mode<synchronous>, transform_indices = @transform_11, window_bounds = array<i64: 84, 120>}, {pipeline_mode = #tpu.pipeline_mode<synchronous>, transform_indices = @transform_12, window_bounds = array<i64: 84, 1>}, {pipeline_mode = #tpu.pipeline_mode<synchronous>, transform_indices = @transform_13, window_bounds = array<i64: 10, 84>}, {pipeline_mode = #tpu.pipeline_mode<synchronous>, transform_indices = @transform_14, window_bounds = array<i64: 10, 1>}, {transform_indices = @transform_15, window_bounds = array<i64: 1, 10, 1>}]} {
    %c0 = arith.constant 0 : index
    %c0_0 = arith.constant 0 : index
    %c0_1 = arith.constant 0 : index
    %0 = vector.load %arg1[%c0, %c0_0, %c0_1] : memref<1x256x32xf32, #tpu.memory_space<vmem>>, vector<1x256x32xf32>
    %1 = vector.shape_cast %0 : vector<1x256x32xf32> to vector<256x32xf32>
    %c0_2 = arith.constant 0 : index
    %c0_3 = arith.constant 0 : index
    %c0_4 = arith.constant 0 : index
    %2 = vector.load %arg2[%c0_2, %c0_3, %c0_4] : memref<5x224x256xf32, #tpu.memory_space<vmem>>, vector<1x224x256xf32>
    %3 = vector.shape_cast %2 : vector<1x224x256xf32> to vector<224x256xf32>
    %4 = vector.extract_strided_slice %1 {offsets = [0, 0], sizes = [256, 28], strides = [1, 1]} : vector<256x32xf32> to vector<256x28xf32>
    %cst = arith.constant dense<0.000000e+00> : vector<224x28xf32>
    %5 = tpu.matmul %3, %4, %cst {dimension_numbers = #tpu.dot_dimension_numbers<[1], [0], [0], [1], [0, 0, 1, 1], [], []>} : vector<224x256xf32>, vector<256x28xf32>, vector<224x28xf32> -> vector<224x28xf32>
    %c1 = arith.constant 1 : index
    %c0_5 = arith.constant 0 : index
    %c0_6 = arith.constant 0 : index
    %6 = vector.load %arg2[%c1, %c0_5, %c0_6] : memref<5x224x256xf32, #tpu.memory_space<vmem>>, vector<1x224x256xf32>
    %7 = vector.shape_cast %6 : vector<1x224x256xf32> to vector<224x256xf32>
    %8 = vector.extract_strided_slice %1 {offsets = [0, 1], sizes = [256, 28], strides = [1, 1]} : vector<256x32xf32> to vector<256x28xf32>
    %cst_7 = arith.constant dense<0.000000e+00> : vector<224x28xf32>
    %9 = tpu.matmul %7, %8, %cst_7 {dimension_numbers = #tpu.dot_dimension_numbers<[1], [0], [0], [1], [0, 0, 1, 1], [], []>} : vector<224x256xf32>, vector<256x28xf32>, vector<224x28xf32> -> vector<224x28xf32>
    %10 = arith.addf %5, %9 : vector<224x28xf32>
    %c2 = arith.constant 2 : index
    %c0_8 = arith.constant 0 : index
    %c0_9 = arith.constant 0 : index
    %11 = vector.load %arg2[%c2, %c0_8, %c0_9] : memref<5x224x256xf32, #tpu.memory_space<vmem>>, vector<1x224x256xf32>
    %12 = vector.shape_cast %11 : vector<1x224x256xf32> to vector<224x256xf32>
    %13 = vector.extract_strided_slice %1 {offsets = [0, 2], sizes = [256, 28], strides = [1, 1]} : vector<256x32xf32> to vector<256x28xf32>
    %cst_10 = arith.constant dense<0.000000e+00> : vector<224x28xf32>
    %14 = tpu.matmul %12, %13, %cst_10 {dimension_numbers = #tpu.dot_dimension_numbers<[1], [0], [0], [1], [0, 0, 1, 1], [], []>} : vector<224x256xf32>, vector<256x28xf32>, vector<224x28xf32> -> vector<224x28xf32>
    %15 = arith.addf %10, %14 : vector<224x28xf32>
    %c3 = arith.constant 3 : index
    %c0_11 = arith.constant 0 : index
    %c0_12 = arith.constant 0 : index
    %16 = vector.load %arg2[%c3, %c0_11, %c0_12] : memref<5x224x256xf32, #tpu.memory_space<vmem>>, vector<1x224x256xf32>
    %17 = vector.shape_cast %16 : vector<1x224x256xf32> to vector<224x256xf32>
    %18 = vector.extract_strided_slice %1 {offsets = [0, 3], sizes = [256, 28], strides = [1, 1]} : vector<256x32xf32> to vector<256x28xf32>
    %cst_13 = arith.constant dense<0.000000e+00> : vector<224x28xf32>
    %19 = tpu.matmul %17, %18, %cst_13 {dimension_numbers = #tpu.dot_dimension_numbers<[1], [0], [0], [1], [0, 0, 1, 1], [], []>} : vector<224x256xf32>, vector<256x28xf32>, vector<224x28xf32> -> vector<224x28xf32>
    %20 = arith.addf %15, %19 : vector<224x28xf32>
    %c4 = arith.constant 4 : index
    %c0_14 = arith.constant 0 : index
    %c0_15 = arith.constant 0 : index
    %21 = vector.load %arg2[%c4, %c0_14, %c0_15] : memref<5x224x256xf32, #tpu.memory_space<vmem>>, vector<1x224x256xf32>
    %22 = vector.shape_cast %21 : vector<1x224x256xf32> to vector<224x256xf32>
    %23 = vector.extract_strided_slice %1 {offsets = [0, 4], sizes = [256, 28], strides = [1, 1]} : vector<256x32xf32> to vector<256x28xf32>
    %cst_16 = arith.constant dense<0.000000e+00> : vector<224x28xf32>
    %24 = tpu.matmul %22, %23, %cst_16 {dimension_numbers = #tpu.dot_dimension_numbers<[1], [0], [0], [1], [0, 0, 1, 1], [], []>} : vector<224x256xf32>, vector<256x28xf32>, vector<224x28xf32> -> vector<224x28xf32>
    %25 = arith.addf %20, %24 : vector<224x28xf32>
    %26 = vector.extract_strided_slice %25 {offsets = [0, 0], sizes = [112, 28], strides = [1, 1]} : vector<224x28xf32> to vector<112x28xf32>
    %27 = vector.extract_strided_slice %25 {offsets = [112, 0], sizes = [112, 28], strides = [1, 1]} : vector<224x28xf32> to vector<112x28xf32>
    %28 = arith.maximumf %26, %27 : vector<112x28xf32>
    %c0_17 = arith.constant 0 : index
    %c0_18 = arith.constant 0 : index
    %29 = vector.load %arg3[%c0_17, %c0_18] : memref<112x1xf32, #tpu.memory_space<vmem>>, vector<112x1xf32>
    %30 = vector.broadcast %29 : vector<112x1xf32> to vector<112x28xf32>
    %31 = arith.addf %28, %30 : vector<112x28xf32>
    %c0_19 = arith.constant 0 : index
    %c0_20 = arith.constant 0 : index
    %32 = vector.load %arg4[%c0_19, %c0_20] : memref<28x14xf32, #tpu.memory_space<vmem>>, vector<28x14xf32>
    %cst_21 = arith.constant dense<0.000000e+00> : vector<112x14xf32>
    %33 = tpu.matmul %31, %32, %cst_21 {dimension_numbers = #tpu.dot_dimension_numbers<[1], [0], [0], [1], [0, 0, 1, 1], [], []>} : vector<112x28xf32>, vector<28x14xf32>, vector<112x14xf32> -> vector<112x14xf32>
    %c0_22 = arith.constant 0 : index
    %c0_23 = arith.constant 0 : index
    %34 = vector.load %arg5[%c0_22, %c0_23] : memref<28x14xf32, #tpu.memory_space<vmem>>, vector<28x14xf32>
    %cst_24 = arith.constant dense<0.000000e+00> : vector<112x14xf32>
    %35 = tpu.matmul %31, %34, %cst_24 {dimension_numbers = #tpu.dot_dimension_numbers<[1], [0], [0], [1], [0, 0, 1, 1], [], []>} : vector<112x28xf32>, vector<28x14xf32>, vector<112x14xf32> -> vector<112x14xf32>
    %36 = arith.maximumf %33, %35 : vector<112x14xf32>
    %cst_25 = arith.constant 0.000000e+00 : f32
    %37 = vector.broadcast %cst_25 : f32 to vector<112x14xf32>
    %38 = arith.maximumf %36, %37 : vector<112x14xf32>
    %c0_26 = arith.constant 0 : index
    %c0_27 = arith.constant 0 : index
    %c0_28 = arith.constant 0 : index
    %39 = vector.load %arg6[%c0_26, %c0_27, %c0_28] : memref<5x160x112xf32, #tpu.memory_space<vmem>>, vector<1x160x112xf32>
    %40 = vector.shape_cast %39 : vector<1x160x112xf32> to vector<160x112xf32>
    %41 = vector.extract_strided_slice %38 {offsets = [0, 0], sizes = [112, 10], strides = [1, 1]} : vector<112x14xf32> to vector<112x10xf32>
    %cst_29 = arith.constant dense<0.000000e+00> : vector<160x10xf32>
    %42 = tpu.matmul %40, %41, %cst_29 {dimension_numbers = #tpu.dot_dimension_numbers<[1], [0], [0], [1], [0, 0, 1, 1], [], []>} : vector<160x112xf32>, vector<112x10xf32>, vector<160x10xf32> -> vector<160x10xf32>
    %c1_30 = arith.constant 1 : index
    %c0_31 = arith.constant 0 : index
    %c0_32 = arith.constant 0 : index
    %43 = vector.load %arg6[%c1_30, %c0_31, %c0_32] : memref<5x160x112xf32, #tpu.memory_space<vmem>>, vector<1x160x112xf32>
    %44 = vector.shape_cast %43 : vector<1x160x112xf32> to vector<160x112xf32>
    %45 = vector.extract_strided_slice %38 {offsets = [0, 1], sizes = [112, 10], strides = [1, 1]} : vector<112x14xf32> to vector<112x10xf32>
    %cst_33 = arith.constant dense<0.000000e+00> : vector<160x10xf32>
    %46 = tpu.matmul %44, %45, %cst_33 {dimension_numbers = #tpu.dot_dimension_numbers<[1], [0], [0], [1], [0, 0, 1, 1], [], []>} : vector<160x112xf32>, vector<112x10xf32>, vector<160x10xf32> -> vector<160x10xf32>
    %47 = arith.addf %42, %46 : vector<160x10xf32>
    %c2_34 = arith.constant 2 : index
    %c0_35 = arith.constant 0 : index
    %c0_36 = arith.constant 0 : index
    %48 = vector.load %arg6[%c2_34, %c0_35, %c0_36] : memref<5x160x112xf32, #tpu.memory_space<vmem>>, vector<1x160x112xf32>
    %49 = vector.shape_cast %48 : vector<1x160x112xf32> to vector<160x112xf32>
    %50 = vector.extract_strided_slice %38 {offsets = [0, 2], sizes = [112, 10], strides = [1, 1]} : vector<112x14xf32> to vector<112x10xf32>
    %cst_37 = arith.constant dense<0.000000e+00> : vector<160x10xf32>
    %51 = tpu.matmul %49, %50, %cst_37 {dimension_numbers = #tpu.dot_dimension_numbers<[1], [0], [0], [1], [0, 0, 1, 1], [], []>} : vector<160x112xf32>, vector<112x10xf32>, vector<160x10xf32> -> vector<160x10xf32>
    %52 = arith.addf %47, %51 : vector<160x10xf32>
    %c3_38 = arith.constant 3 : index
    %c0_39 = arith.constant 0 : index
    %c0_40 = arith.constant 0 : index
    %53 = vector.load %arg6[%c3_38, %c0_39, %c0_40] : memref<5x160x112xf32, #tpu.memory_space<vmem>>, vector<1x160x112xf32>
    %54 = vector.shape_cast %53 : vector<1x160x112xf32> to vector<160x112xf32>
    %55 = vector.extract_strided_slice %38 {offsets = [0, 3], sizes = [112, 10], strides = [1, 1]} : vector<112x14xf32> to vector<112x10xf32>
    %cst_41 = arith.constant dense<0.000000e+00> : vector<160x10xf32>
    %56 = tpu.matmul %54, %55, %cst_41 {dimension_numbers = #tpu.dot_dimension_numbers<[1], [0], [0], [1], [0, 0, 1, 1], [], []>} : vector<160x112xf32>, vector<112x10xf32>, vector<160x10xf32> -> vector<160x10xf32>
    %57 = arith.addf %52, %56 : vector<160x10xf32>
    %c4_42 = arith.constant 4 : index
    %c0_43 = arith.constant 0 : index
    %c0_44 = arith.constant 0 : index
    %58 = vector.load %arg6[%c4_42, %c0_43, %c0_44] : memref<5x160x112xf32, #tpu.memory_space<vmem>>, vector<1x160x112xf32>
    %59 = vector.shape_cast %58 : vector<1x160x112xf32> to vector<160x112xf32>
    %60 = vector.extract_strided_slice %38 {offsets = [0, 4], sizes = [112, 10], strides = [1, 1]} : vector<112x14xf32> to vector<112x10xf32>
    %cst_45 = arith.constant dense<0.000000e+00> : vector<160x10xf32>
    %61 = tpu.matmul %59, %60, %cst_45 {dimension_numbers = #tpu.dot_dimension_numbers<[1], [0], [0], [1], [0, 0, 1, 1], [], []>} : vector<160x112xf32>, vector<112x10xf32>, vector<160x10xf32> -> vector<160x10xf32>
    %62 = arith.addf %57, %61 : vector<160x10xf32>
    %63 = vector.extract_strided_slice %62 {offsets = [0, 0], sizes = [80, 10], strides = [1, 1]} : vector<160x10xf32> to vector<80x10xf32>
    %64 = vector.extract_strided_slice %62 {offsets = [80, 0], sizes = [80, 10], strides = [1, 1]} : vector<160x10xf32> to vector<80x10xf32>
    %65 = arith.maximumf %63, %64 : vector<80x10xf32>
    %c0_46 = arith.constant 0 : index
    %c0_47 = arith.constant 0 : index
    %66 = vector.load %arg7[%c0_46, %c0_47] : memref<80x1xf32, #tpu.memory_space<vmem>>, vector<80x1xf32>
    %67 = vector.broadcast %66 : vector<80x1xf32> to vector<80x10xf32>
    %68 = arith.addf %65, %67 : vector<80x10xf32>
    %c0_48 = arith.constant 0 : index
    %c0_49 = arith.constant 0 : index
    %69 = vector.load %arg8[%c0_48, %c0_49] : memref<10x5xf32, #tpu.memory_space<vmem>>, vector<10x5xf32>
    %cst_50 = arith.constant dense<0.000000e+00> : vector<80x5xf32>
    %70 = tpu.matmul %68, %69, %cst_50 {dimension_numbers = #tpu.dot_dimension_numbers<[1], [0], [0], [1], [0, 0, 1, 1], [], []>} : vector<80x10xf32>, vector<10x5xf32>, vector<80x5xf32> -> vector<80x5xf32>
    %c0_51 = arith.constant 0 : index
    %c0_52 = arith.constant 0 : index
    %71 = vector.load %arg9[%c0_51, %c0_52] : memref<10x5xf32, #tpu.memory_space<vmem>>, vector<10x5xf32>
    %cst_53 = arith.constant dense<0.000000e+00> : vector<80x5xf32>
    %72 = tpu.matmul %68, %71, %cst_53 {dimension_numbers = #tpu.dot_dimension_numbers<[1], [0], [0], [1], [0, 0, 1, 1], [], []>} : vector<80x10xf32>, vector<10x5xf32>, vector<80x5xf32> -> vector<80x5xf32>
    %73 = arith.maximumf %70, %72 : vector<80x5xf32>
    %cst_54 = arith.constant 0.000000e+00 : f32
    %74 = vector.broadcast %cst_54 : f32 to vector<80x5xf32>
    %75 = arith.maximumf %73, %74 : vector<80x5xf32>
    %c0_55 = arith.constant 0 : index
    %c0_56 = arith.constant 0 : index
    %76 = vector.load %arg11[%c0_55, %c0_56] : memref<120x1xf32, #tpu.memory_space<vmem>>, vector<120x1xf32>
    %c0_57 = arith.constant 0 : index
    %c0_58 = arith.constant 0 : index
    %c0_59 = arith.constant 0 : index
    %77 = vector.load %arg10[%c0_57, %c0_58, %c0_59] : memref<5x120x80xf32, #tpu.memory_space<vmem>>, vector<1x120x80xf32>
    %78 = vector.shape_cast %77 : vector<1x120x80xf32> to vector<120x80xf32>
    %79 = vector.extract_strided_slice %75 {offsets = [0, 0], sizes = [80, 1], strides = [1, 1]} : vector<80x5xf32> to vector<80x1xf32>
    %cst_60 = arith.constant dense<0.000000e+00> : vector<120x1xf32>
    %80 = tpu.matmul %78, %79, %cst_60 {dimension_numbers = #tpu.dot_dimension_numbers<[1], [0], [0], [1], [0, 0, 1, 1], [], []>} : vector<120x80xf32>, vector<80x1xf32>, vector<120x1xf32> -> vector<120x1xf32>
    %81 = arith.addf %76, %80 : vector<120x1xf32>
    %c1_61 = arith.constant 1 : index
    %c0_62 = arith.constant 0 : index
    %c0_63 = arith.constant 0 : index
    %82 = vector.load %arg10[%c1_61, %c0_62, %c0_63] : memref<5x120x80xf32, #tpu.memory_space<vmem>>, vector<1x120x80xf32>
    %83 = vector.shape_cast %82 : vector<1x120x80xf32> to vector<120x80xf32>
    %84 = vector.extract_strided_slice %75 {offsets = [0, 1], sizes = [80, 1], strides = [1, 1]} : vector<80x5xf32> to vector<80x1xf32>
    %cst_64 = arith.constant dense<0.000000e+00> : vector<120x1xf32>
    %85 = tpu.matmul %83, %84, %cst_64 {dimension_numbers = #tpu.dot_dimension_numbers<[1], [0], [0], [1], [0, 0, 1, 1], [], []>} : vector<120x80xf32>, vector<80x1xf32>, vector<120x1xf32> -> vector<120x1xf32>
    %86 = arith.addf %81, %85 : vector<120x1xf32>
    %c2_65 = arith.constant 2 : index
    %c0_66 = arith.constant 0 : index
    %c0_67 = arith.constant 0 : index
    %87 = vector.load %arg10[%c2_65, %c0_66, %c0_67] : memref<5x120x80xf32, #tpu.memory_space<vmem>>, vector<1x120x80xf32>
    %88 = vector.shape_cast %87 : vector<1x120x80xf32> to vector<120x80xf32>
    %89 = vector.extract_strided_slice %75 {offsets = [0, 2], sizes = [80, 1], strides = [1, 1]} : vector<80x5xf32> to vector<80x1xf32>
    %cst_68 = arith.constant dense<0.000000e+00> : vector<120x1xf32>
    %90 = tpu.matmul %88, %89, %cst_68 {dimension_numbers = #tpu.dot_dimension_numbers<[1], [0], [0], [1], [0, 0, 1, 1], [], []>} : vector<120x80xf32>, vector<80x1xf32>, vector<120x1xf32> -> vector<120x1xf32>
    %91 = arith.addf %86, %90 : vector<120x1xf32>
    %c3_69 = arith.constant 3 : index
    %c0_70 = arith.constant 0 : index
    %c0_71 = arith.constant 0 : index
    %92 = vector.load %arg10[%c3_69, %c0_70, %c0_71] : memref<5x120x80xf32, #tpu.memory_space<vmem>>, vector<1x120x80xf32>
    %93 = vector.shape_cast %92 : vector<1x120x80xf32> to vector<120x80xf32>
    %94 = vector.extract_strided_slice %75 {offsets = [0, 3], sizes = [80, 1], strides = [1, 1]} : vector<80x5xf32> to vector<80x1xf32>
    %cst_72 = arith.constant dense<0.000000e+00> : vector<120x1xf32>
    %95 = tpu.matmul %93, %94, %cst_72 {dimension_numbers = #tpu.dot_dimension_numbers<[1], [0], [0], [1], [0, 0, 1, 1], [], []>} : vector<120x80xf32>, vector<80x1xf32>, vector<120x1xf32> -> vector<120x1xf32>
    %96 = arith.addf %91, %95 : vector<120x1xf32>
    %c4_73 = arith.constant 4 : index
    %c0_74 = arith.constant 0 : index
    %c0_75 = arith.constant 0 : index
    %97 = vector.load %arg10[%c4_73, %c0_74, %c0_75] : memref<5x120x80xf32, #tpu.memory_space<vmem>>, vector<1x120x80xf32>
    %98 = vector.shape_cast %97 : vector<1x120x80xf32> to vector<120x80xf32>
    %99 = vector.extract_strided_slice %75 {offsets = [0, 4], sizes = [80, 1], strides = [1, 1]} : vector<80x5xf32> to vector<80x1xf32>
    %cst_76 = arith.constant dense<0.000000e+00> : vector<120x1xf32>
    %100 = tpu.matmul %98, %99, %cst_76 {dimension_numbers = #tpu.dot_dimension_numbers<[1], [0], [0], [1], [0, 0, 1, 1], [], []>} : vector<120x80xf32>, vector<80x1xf32>, vector<120x1xf32> -> vector<120x1xf32>
    %101 = arith.addf %96, %100 : vector<120x1xf32>
    %cst_77 = arith.constant 0.000000e+00 : f32
    %102 = vector.broadcast %cst_77 : f32 to vector<120x1xf32>
    %103 = arith.maximumf %101, %102 : vector<120x1xf32>
    %c0_78 = arith.constant 0 : index
    %c0_79 = arith.constant 0 : index
    %104 = vector.load %arg12[%c0_78, %c0_79] : memref<84x120xf32, #tpu.memory_space<vmem>>, vector<84x120xf32>
    %cst_80 = arith.constant dense<0.000000e+00> : vector<84x1xf32>
    %105 = tpu.matmul %104, %103, %cst_80 {dimension_numbers = #tpu.dot_dimension_numbers<[1], [0], [0], [1], [0, 0, 1, 1], [], []>} : vector<84x120xf32>, vector<120x1xf32>, vector<84x1xf32> -> vector<84x1xf32>
    %c0_81 = arith.constant 0 : index
    %c0_82 = arith.constant 0 : index
    %106 = vector.load %arg13[%c0_81, %c0_82] : memref<84x1xf32, #tpu.memory_space<vmem>>, vector<84x1xf32>
    %107 = arith.addf %105, %106 : vector<84x1xf32>
    %cst_83 = arith.constant 0.000000e+00 : f32
    %108 = vector.broadcast %cst_83 : f32 to vector<84x1xf32>
    %109 = arith.maximumf %107, %108 : vector<84x1xf32>
    %c0_84 = arith.constant 0 : index
    %c0_85 = arith.constant 0 : index
    %110 = vector.load %arg14[%c0_84, %c0_85] : memref<10x84xf32, #tpu.memory_space<vmem>>, vector<10x84xf32>
    %cst_86 = arith.constant dense<0.000000e+00> : vector<10x1xf32>
    %111 = tpu.matmul %110, %109, %cst_86 {dimension_numbers = #tpu.dot_dimension_numbers<[1], [0], [0], [1], [0, 0, 1, 1], [], []>} : vector<10x84xf32>, vector<84x1xf32>, vector<10x1xf32> -> vector<10x1xf32>
    %c0_87 = arith.constant 0 : index
    %c0_88 = arith.constant 0 : index
    %112 = vector.load %arg15[%c0_87, %c0_88] : memref<10x1xf32, #tpu.memory_space<vmem>>, vector<10x1xf32>
    %113 = arith.addf %111, %112 : vector<10x1xf32>
    %c0_89 = arith.constant 0 : index
    %c0_90 = arith.constant 0 : index
    %c0_91 = arith.constant 0 : index
    %114 = vector.load %arg16[%c0_89, %c0_90, %c0_91] : memref<1x10x1xf32, #tpu.memory_space<vmem>>, vector<1x10x1xf32>
    %115 = vector.shape_cast %114 : vector<1x10x1xf32> to vector<10x1xf32>
    %116 = vector.shape_cast %113 : vector<10x1xf32> to vector<1x10x1xf32>
    tpu.vector_store %arg16[%c0_89, %c0_90, %c0_91], %116 {strides = array<i32>} : memref<1x10x1xf32, #tpu.memory_space<vmem>>, vector<1x10x1xf32>,
    return
  }
  func.func @transform_0(%arg0: i32) -> (i32, i32, i32) {
    %c0_i32 = arith.constant 0 : i32
    %c0_i32_0 = arith.constant 0 : i32
    %c0_i32_1 = arith.constant 0 : i32
    return %arg0, %c0_i32, %c0_i32_0 : i32, i32, i32
  }
  func.func @transform_1(%arg0: i32) -> (i32, i32, i32) {
    %c0_i32 = arith.constant 0 : i32
    %c0_i32_0 = arith.constant 0 : i32
    %c0_i32_1 = arith.constant 0 : i32
    %c0_i32_2 = arith.constant 0 : i32
    return %c0_i32, %c0_i32_0, %c0_i32_1 : i32, i32, i32
  }
  func.func @transform_2(%arg0: i32) -> (i32, i32) {
    %c0_i32 = arith.constant 0 : i32
    %c0_i32_0 = arith.constant 0 : i32
    %c0_i32_1 = arith.constant 0 : i32
    return %c0_i32, %c0_i32_0 : i32, i32
  }
  func.func @transform_3(%arg0: i32) -> (i32, i32) {
    %c0_i32 = arith.constant 0 : i32
    %c0_i32_0 = arith.constant 0 : i32
    %c0_i32_1 = arith.constant 0 : i32
    return %c0_i32, %c0_i32_0 : i32, i32
  }
  func.func @transform_4(%arg0: i32) -> (i32, i32) {
    %c0_i32 = arith.constant 0 : i32
    %c0_i32_0 = arith.constant 0 : i32
    %c0_i32_1 = arith.constant 0 : i32
    return %c0_i32, %c0_i32_0 : i32, i32
  }
  func.func @transform_5(%arg0: i32) -> (i32, i32, i32) {
    %c0_i32 = arith.constant 0 : i32
    %c0_i32_0 = arith.constant 0 : i32
    %c0_i32_1 = arith.constant 0 : i32
    %c0_i32_2 = arith.constant 0 : i32
    return %c0_i32, %c0_i32_0, %c0_i32_1 : i32, i32, i32
  }
  func.func @transform_6(%arg0: i32) -> (i32, i32) {
    %c0_i32 = arith.constant 0 : i32
    %c0_i32_0 = arith.constant 0 : i32
    %c0_i32_1 = arith.constant 0 : i32
    return %c0_i32, %c0_i32_0 : i32, i32
  }
  func.func @transform_7(%arg0: i32) -> (i32, i32) {
    %c0_i32 = arith.constant 0 : i32
    %c0_i32_0 = arith.constant 0 : i32
    %c0_i32_1 = arith.constant 0 : i32
    return %c0_i32, %c0_i32_0 : i32, i32
  }
  func.func @transform_8(%arg0: i32) -> (i32, i32) {
    %c0_i32 = arith.constant 0 : i32
    %c0_i32_0 = arith.constant 0 : i32
    %c0_i32_1 = arith.constant 0 : i32
    return %c0_i32, %c0_i32_0 : i32, i32
  }
  func.func @transform_9(%arg0: i32) -> (i32, i32, i32) {
    %c0_i32 = arith.constant 0 : i32
    %c0_i32_0 = arith.constant 0 : i32
    %c0_i32_1 = arith.constant 0 : i32
    %c0_i32_2 = arith.constant 0 : i32
    return %c0_i32, %c0_i32_0, %c0_i32_1 : i32, i32, i32
  }
  func.func @transform_10(%arg0: i32) -> (i32, i32) {
    %c0_i32 = arith.constant 0 : i32
    %c0_i32_0 = arith.constant 0 : i32
    %c0_i32_1 = arith.constant 0 : i32
    return %c0_i32, %c0_i32_0 : i32, i32
  }
  func.func @transform_11(%arg0: i32) -> (i32, i32) {
    %c0_i32 = arith.constant 0 : i32
    %c0_i32_0 = arith.constant 0 : i32
    %c0_i32_1 = arith.constant 0 : i32
    return %c0_i32, %c0_i32_0 : i32, i32
  }
  func.func @transform_12(%arg0: i32) -> (i32, i32) {
    %c0_i32 = arith.constant 0 : i32
    %c0_i32_0 = arith.constant 0 : i32
    %c0_i32_1 = arith.constant 0 : i32
    return %c0_i32, %c0_i32_0 : i32, i32
  }
  func.func @transform_13(%arg0: i32) -> (i32, i32) {
    %c0_i32 = arith.constant 0 : i32
    %c0_i32_0 = arith.constant 0 : i32
    %c0_i32_1 = arith.constant 0 : i32
    return %c0_i32, %c0_i32_0 : i32, i32
  }
  func.func @transform_14(%arg0: i32) -> (i32, i32) {
    %c0_i32 = arith.constant 0 : i32
    %c0_i32_0 = arith.constant 0 : i32
    %c0_i32_1 = arith.constant 0 : i32
    return %c0_i32, %c0_i32_0 : i32, i32
  }
  func.func @transform_15(%arg0: i32) -> (i32, i32, i32) {
    %c0_i32 = arith.constant 0 : i32
    %c0_i32_0 = arith.constant 0 : i32
    %c0_i32_1 = arith.constant 0 : i32
    return %arg0, %c0_i32, %c0_i32_0 : i32, i32, i32
  }
}

</mosaic_0001>

<bundles_post_ra>
// kernel: net_forward.1
= control target key start
LH: loop header
LB: loop body
LE: loop exit
PB: predicated region body
PF: predicated region fallthrough
CT: control target
= control target key end

     0   :  { %20 = vsyncpa [#allocation3], 0  ;;  %s8144_s18 = smov 0   ;;  %s11627_s0 = inlined_call_operand.vmem [shape: f32[2,256,32], index: 0, kind: input, shape index: {}]   ;;  %s11628_s1 = inlined_call_operand.vmem [shape: f32[5,224,256], index: 1, kind: input, shape index: {}]   ;;  %s11629_s2 = inlined_call_operand.vmem [shape: f32[112,1], index: 2, kind: input, shape index: {}]   ;;  %s11630_s3 = inlined_call_operand.vmem [shape: f32[28,14], index: 3, kind: input, shape index: {}]   ;;  %s11631_s4 = inlined_call_operand.vmem [shape: f32[28,14], index: 4, kind: input, shape index: {}]   ;;  %s11632_s5 = inlined_call_operand.hbm [shape: f32[5,160,112], index: 5, kind: input, shape index: {}]   ;;  %s11633_s6 = inlined_call_operand.vmem [shape: f32[80,1], index: 6, kind: input, shape index: {}]   ;;  %s11634_s7 = inlined_call_operand.vmem [shape: f32[10,5], index: 7, kind: input, shape index: {}]   ;;  %s11635_s8 = inlined_call_operand.vmem [shape: f32[10,5], index: 8, kind: input, shape index: {}]   ;;  %s11636_s9 = inlined_call_operand.vmem [shape: f32[5,120,80], index: 9, kind: input, shape index: {}]   ;;  %s11637_s10 = inlined_call_operand.vmem [shape: f32[120,1], index: 10, kind: input, shape index: {}]   ;;  %s11638_s11 = inlined_call_operand.vmem [shape: f32[84,120], index: 11, kind: input, shape index: {}]   ;;  %s11639_s12 = inlined_call_operand.vmem [shape: f32[84,1], index: 12, kind: input, shape index: {}]   ;;  %s11640_s13 = inlined_call_operand.vmem [shape: f32[10,84], index: 13, kind: input, shape index: {}]   ;;  %s11641_s14 = inlined_call_operand.vmem [shape: f32[10,1], index: 14, kind: input, shape index: {}]   ;;  %s11642_s15 = inlined_call_operand.vmem [shape: f32[2,10,1], index: 15, kind: output, shape index: {}]  }
   0x1 LB: > { %s8150_s19 = sadd.s32 4294967295, %s8052_s18   ;;  %p6252_p0 = scmp.ge.s32.totalorder %s8052_s18, 1  ;;  %s8052_s18 = sphi %s8144_s18, %s26_s18  }
   0x2   : > { %p377_p1 = scmp.lt.s32.totalorder %s8052_s18, 3  ;;  %s8054_s20 = smov [#allocation2]  }
   0x3   : > { %s401_s21 = sshll.u32 %s8054_s20, 4  ;;  %p7991_p3 = scmp.eq.s32.totalorder %s8150_s19, 0  ;;  %s402_s21 = int_to_ptr.vmem [resolvable:$true] %s401_s21 }
   0x4   : > { %p8154_p2 = pnand %p6252_p0, %p377_p1  ;;  %s8027_s23 = scalar_lea.vmem %s402_s21, 12800 }
   0x5   : > { %p8028_p7 = scmp.ne.s32.totalorder %s402_s21, %s8027_s23  ;;  %p8035_p10 = scmp.lt.s32.totalorder %s402_s21, %s402_s21 }
   0x6   : > { %p7987_p4 = pneg %p8154_p2  ;;  %p8036_p11 = scmp.lt.s32.totalorder %s8027_s23, %s8027_s23 }
   0x8   : > { %p7988_p5 = pnand %p7991_p3, %p7987_p4  ;;  %p8037_p12 = por %p8036_p11, %p8035_p10 }
   0xa   : > { %p8018_p6 = pneg %p7988_p5 }
   0xc   : > { %p8030_p8 = pnand %p8028_p7, %p8018_p6 }
   0xe   : > { %p8031_p9 = pneg %p8030_p8 }
  0x10   : > { %p8038_p13 = pnand %p8037_p12, %p8031_p9 }
  0x12   : > { %8041 = shalt.err (!%p8038_p13)
}
  0x13   : > { %s8055_s24 = smov 128   ;;  %s8056_s25 = smov 8  }
  0x14   : > { %7990 = dma.hbm_to_vmem [thread:$0]  (!%p7988_p5), %s11632_s5, 12800, %s402_s21, [#allocation3], %s8055_s24, %s8055_s24, %s8056_s25  }
  0x15   : > { %452 = sbr.rel (%p8154_p2) target bundleno = 2595 (0xa23), region = 80 }
  0x1a   : > { %8047 = dma.done.wait (%p7991_p3), [#allocation3], 12800  }
  0x1b   : > { %8049 = vsyncadd (%p7991_p3), [#allocation3], 4294954496  ;;  %p500_p0 = scmp.lt.s32.totalorder %s8150_s19, 1  ;;  %v11647_v0 = vmov 0.0   ;;  %s8058_s17 = smov 127   ;;  %v6262_v29 = vld [vmem:[%s11628_s1 + $0x1c8] sm:$0xff] }
  0x1c   : > { %783 = vmatprep.subr.mxu0 %v11647_v0  ;;  %988 = vmatprep.subr.mxu1 %v11647_v0  ;;  %v543_v30 = vld [vmem:[%s11628_s1 + $0x8] sm:$0xff]  ;;  %s8059_s24 = smov 126   ;;  %v542_v35 = vld [vmem:[%s11628_s1] sm:$0xff]  ;;  %v545_v36 = vld [vmem:[%s11628_s1 + $0x18] sm:$0xff]  ;;  %s11645_s20 = smov 125   ;;  %vm2510_vm0 = vcmask 1043456  }
  0x1d   : > { %s11716_s19 = smov (!%p500_p0, %s8150_s19), 1  ;;  %847 = vmatprep.mubr.f32.mxu0 %v6262_v29  ;;  %1052 = vmatprep.mubr.f32.mxu1 %v543_v30  ;;  %v544_v37 = vld [vmem:[%s11628_s1 + $0x10] sm:$0xff]  ;;  %v547_v38 = vld [vmem:[%s11628_s1 + $0x28] sm:$0xff]  ;;  %v546_v39 = vld [vmem:[%s11628_s1 + $0x20] sm:$0xff]  ;;  %vm2467_vm1 = vcmask 228352   ;;  %vm2916_vm2 = vcmask 916480  }
  0x1e   : > { %s6788_s28 = sshll.u32 %s11716_s19, 8  ;;  %v549_v40 = vld [vmem:[%s11628_s1 + $0x38] sm:$0xff]  ;;  %v548_v41 = vld [vmem:[%s11628_s1 + $0x30] sm:$0xff]  ;;  %v551_v42 = vld [vmem:[%s11628_s1 + $0x48] sm:$0xff]  ;;  %s11663_s26 = smov 125   ;;  %vm4404_vm3 = vcmask 1041408  }
  0x1f   : > { %s8182_s16 = scalar_lea.vmem %s11627_s0, %s6788_s28  ;;  %v550_v43 = vld [vmem:[%s11628_s1 + $0x40] sm:$0xff]  ;;  %v553_v44 = vld [vmem:[%s11628_s1 + $0x58] sm:$0xff]  ;;  %v552_v45 = vld [vmem:[%s11628_s1 + $0x50] sm:$0xff]  ;;  %s11643_s28 = smov 124   ;;  %vm4373_vm4 = vcmask 80896   ;;  %vm8063_vm5 = vmmov 0  }
  0x20   : > { %v8185_v1 = vld [vmem:[%s8182_s16 + $0x78] sm:$0xff]  ;;  %v8188_v2 = vld [vmem:[%s8182_s16 + $0x68] sm:$0xff]  ;;  %v8195_v3 = vld [vmem:[%s8182_s16 + $0x70] sm:$0xff]  ;;  %vm4693_vm6 = vcmask 654336   ;;  %vm5925_vm7 = vcmask 982016   ;;  %vm6094_vm8 = vcmask 687104  }
  0x21   : > { %717 = vrot.lane.b32.xlu0 %v8185_v1, %s8058_s17  ;;  %713 = vrot.lane.b32.xlu1 %v8188_v2, %s8058_s17  ;;  %v8198_v4 = vld [vmem:[%s8182_s16 + $0x60] sm:$0xff]  ;;  %v8208_v5 = vld [vmem:[%s8182_s16 + $0x50] sm:$0xff]  ;;  %vm6181_vm9 = vcmask 1024   ;;  %vm6179_vm10 = vcmask 7168  }
  0x22   : > { %989 = vmatpush1.msra.mxu1 %v8185_v1  ;;  %v8211_v6 = vld [vmem:[%s8182_s16 + $0x58] sm:$0xff]  ;;  %v8221_v7 = vld [vmem:[%s8182_s16 + $0x40] sm:$0xff]  ;;  %v8224_v8 = vld [vmem:[%s8182_s16 + $0x48] sm:$0xff] }
  0x23   : > { %990 = vmatprep.subr.mxu1 %v11647_v0  ;;  %v8234_v9 = vld [vmem:[%s8182_s16 + $0x30] sm:$0xff]  ;;  %v8237_v10 = vld [vmem:[%s8182_s16 + $0x38] sm:$0xff]  ;;  %v8247_v11 = vld [vmem:[%s8182_s16 + $0x20] sm:$0xff] }
  0x24   : > { %991 = vmatpush1.msra.mxu1 %v8195_v3  ;;  %v8250_v12 = vld [vmem:[%s8182_s16 + $0x28] sm:$0xff]  ;;  %v8260_v13 = vld [vmem:[%s8182_s16 + $0x10] sm:$0xff]  ;;  %v8263_v14 = vld [vmem:[%s8182_s16 + $0x18] sm:$0xff] }
  0x25   : > { %715 = vrot.lane.b32.xlu0 %v8195_v3, %s8058_s17  ;;  %711 = vrot.lane.b32.xlu1 %v8198_v4, %s8058_s17  ;;  %v8273_v15 = vld [vmem:[%s8182_s16] sm:$0xff]  ;;  %v8276_v16 = vld [vmem:[%s8182_s16 + $0x8] sm:$0xff] }
  0x26   : > { %992 = vmatprep.subr.mxu1 %v11647_v0  ;;  %v8286_v17 = vld [vmem:[%s8182_s16 + $0xf0] sm:$0xff]  ;;  %v8289_v18 = vld [vmem:[%s8182_s16 + $0xf8] sm:$0xff]  ;;  %v8299_v19 = vld [vmem:[%s8182_s16 + $0xe0] sm:$0xff] }
  0x27   : > { %993 = vmatpush1.msra.mxu1 %v8188_v2  ;;  %v8302_v20 = vld [vmem:[%s8182_s16 + $0xe8] sm:$0xff]  ;;  %v8312_v21 = vld [vmem:[%s8182_s16 + $0xd0] sm:$0xff]  ;;  %v8315_v22 = vld [vmem:[%s8182_s16 + $0xd8] sm:$0xff] }
  0x28   : > { %994 = vmatprep.subr.mxu1 %v11647_v0  ;;  %v8325_v23 = vld [vmem:[%s8182_s16 + $0xc0] sm:$0xff]  ;;  %v8328_v24 = vld [vmem:[%s8182_s16 + $0xc8] sm:$0xff]  ;;  %v8338_v25 = vld [vmem:[%s8182_s16 + $0xb0] sm:$0xff] }
  0x29   : > { %707 = vrot.lane.b32.xlu1 %v8208_v5, %s8058_s17  ;;  %709 = vrot.lane.b32.xlu0 %v8211_v6, %s8058_s17  ;;  %v8341_v26 = vld [vmem:[%s8182_s16 + $0xb8] sm:$0xff]  ;;  %v8351_v27 = vld [vmem:[%s8182_s16 + $0xa0] sm:$0xff] }
  0x2a   : > { %995 = vmatpush1.msra.mxu1 %v8198_v4  ;;  %v8354_v28 = vld [vmem:[%s8182_s16 + $0xa8] sm:$0xff]  ;;  %v8370_v31 = vld [vmem:[%s8182_s16 + $0x90] sm:$0xff]  ;;  %v8373_v32 = vld [vmem:[%s8182_s16 + $0x98] sm:$0xff] }
  0x2b   : > { %996 = vmatprep.subr.mxu1 %v11647_v0  ;;  %v8383_v33 = vld [vmem:[%s8182_s16 + $0x80] sm:$0xff]  ;;  %v8386_v34 = vld [vmem:[%s8182_s16 + $0x88] sm:$0xff]  ;;  %v557_v48 = vld [vmem:[%s11628_s1 + $0x78] sm:$0xff] }
  0x2c   : > { %997 = vmatpush1.msra.mxu1 %v8211_v6  ;;  %v555_v46 = vld [vmem:[%s11628_s1 + $0x68] sm:$0xff]  ;;  %v554_v47 = vld [vmem:[%s11628_s1 + $0x60] sm:$0xff]  ;;  %v556_v49 = vld [vmem:[%s11628_s1 + $0x70] sm:$0xff] }
  0x2d   : > { %703 = vrot.lane.b32.xlu1 %v8221_v7, %s8058_s17  ;;  %705 = vrot.lane.b32.xlu0 %v8224_v8, %s8058_s17  ;;  %v559_v50 = vld [vmem:[%s11628_s1 + $0x88] sm:$0xff]  ;;  %v558_v53 = vld [vmem:[%s11628_s1 + $0x80] sm:$0xff] }
  0x2e   : > { %998 = vmatprep.subr.mxu1 %v11647_v0  ;;  %v561_v54 = vld [vmem:[%s11628_s1 + $0x98] sm:$0xff]  ;;  %v560_v57 = vld [vmem:[%s11628_s1 + $0x90] sm:$0xff]  ;;  %v563_v58 = vld [vmem:[%s11628_s1 + $0xa8] sm:$0xff] }
  0x2f   : > { %999 = vmatpush1.msra.mxu1 %v8208_v5  ;;  %v562_v61 = vld [vmem:[%s11628_s1 + $0xa0] sm:$0xff]  ;;  %v565_v62 = vld [vmem:[%s11628_s1 + $0xb8] sm:$0xff]  ;;  %v564_v30 = vld [vmem:[%s11628_s1 + $0xb0] sm:$0xff] }
  0x30   : > { %1000 = vmatprep.subr.mxu1 %v11647_v0 }
  0x31   : > { %699 = vrot.lane.b32.xlu1 %v8234_v9, %s8058_s17  ;;  %701 = vrot.lane.b32.xlu0 %v8237_v10, %s8058_s17 }
  0x32   : > { %1001 = vmatpush1.msra.mxu1 %v8224_v8 }
  0x33   : > { %1002 = vmatprep.subr.mxu1 %v11647_v0 }
  0x34   : > { %1003 = vmatpush1.msra.mxu1 %v8221_v7 }
  0x35   : > { %695 = vrot.lane.b32.xlu1 %v8247_v11, %s8058_s17  ;;  %697 = vrot.lane.b32.xlu0 %v8250_v12, %s8058_s17 }
  0x36   : > { %1004 = vmatprep.subr.mxu1 %v11647_v0 }
  0x37   : > { %1005 = vmatpush1.msra.mxu1 %v8237_v10 }
  0x38   : > { %1006 = vmatprep.subr.mxu1 %v11647_v0 }
  0x39   : > { %691 = vrot.lane.b32.xlu1 %v8260_v13, %s8058_s17  ;;  %693 = vrot.lane.b32.xlu0 %v8263_v14, %s8058_s17 }
  0x3a   : > { %1007 = vmatpush1.msra.mxu1 %v8234_v9 }
  0x3b   : > { %1008 = vmatprep.subr.mxu1 %v11647_v0 }
  0x3c   : > { %1009 = vmatpush1.msra.mxu1 %v8250_v12 }
  0x3d   : > { %687 = vrot.lane.b32.xlu1 %v8273_v15, %s8058_s17  ;;  %689 = vrot.lane.b32.xlu0 %v8276_v16, %s8058_s17 }
  0x3e   : > { %1010 = vmatprep.subr.mxu1 %v11647_v0 }
  0x3f   : > { %1011 = vmatpush1.msra.mxu1 %v8247_v11 }
  0x40   : > { %1012 = vmatprep.subr.mxu1 %v11647_v0 }
  0x41   : > { %747 = vrot.lane.b32.xlu1 %v8286_v17, %s8058_s17  ;;  %749 = vrot.lane.b32.xlu0 %v8289_v18, %s8058_s17 }
  0x42   : > { %1013 = vmatpush1.msra.mxu1 %v8263_v14 }
  0x43   : > { %1014 = vmatprep.subr.mxu1 %v11647_v0 }
  0x44   : > { %1015 = vmatpush1.msra.mxu1 %v8260_v13 }
  0x45   : > { %743 = vrot.lane.b32.xlu1 %v8299_v19, %s8058_s17  ;;  %745 = vrot.lane.b32.xlu0 %v8302_v20, %s8058_s17 }
  0x46   : > { %1016 = vmatprep.subr.mxu1 %v11647_v0 }
  0x47   : > { %1017 = vmatpush1.msra.mxu1 %v8276_v16 }
  0x48   : > { %1018 = vmatprep.subr.mxu1 %v11647_v0 }
  0x49   : > { %739 = vrot.lane.b32.xlu1 %v8312_v21, %s8058_s17  ;;  %741 = vrot.lane.b32.xlu0 %v8315_v22, %s8058_s17 }
  0x4a   : > { %1019 = vmatpush1.msra.mxu1 %v8273_v15 }
  0x4b   : > { %1020 = vmatprep.subr.mxu1 %v11647_v0 }
  0x4c   : > { %1021 = vmatpush2.msra.mxu1 %v8289_v18 }
  0x4d   : > { %735 = vrot.lane.b32.xlu1 %v8325_v23, %s8058_s17  ;;  %737 = vrot.lane.b32.xlu0 %v8328_v24, %s8058_s17 }
  0x4e   : > { %1022 = vmatprep.subr.mxu1 %v11647_v0 }
  0x4f   : > { %1023 = vmatpush2.msra.mxu1 %v8286_v17 }
  0x50   : > { %1024 = vmatprep.subr.mxu1 %v11647_v0 }
  0x51   : > { %731 = vrot.lane.b32.xlu1 %v8338_v25, %s8058_s17  ;;  %733 = vrot.lane.b32.xlu0 %v8341_v26, %s8058_s17 }
  0x52   : > { %1025 = vmatpush2.msra.mxu1 %v8302_v20 }
  0x53   : > { %1026 = vmatprep.subr.mxu1 %v11647_v0 }
  0x54   : > { %1027 = vmatpush2.msra.mxu1 %v8299_v19 }
  0x55   : > { %727 = vrot.lane.b32.xlu1 %v8351_v27, %s8058_s17  ;;  %729 = vrot.lane.b32.xlu0 %v8354_v28, %s8058_s17 }
  0x56   : > { %1028 = vmatprep.subr.mxu1 %v11647_v0 }
  0x57   : > { %1029 = vmatpush2.msra.mxu1 %v8315_v22 }
  0x58   : > { %1030 = vmatprep.subr.mxu1 %v11647_v0 }
  0x59   : > { %723 = vrot.lane.b32.xlu1 %v8370_v31, %s8058_s17  ;;  %725 = vrot.lane.b32.xlu0 %v8373_v32, %s8058_s17 }
  0x5a   : > { %1031 = vmatpush2.msra.mxu1 %v8312_v21 }
  0x5b   : > { %1032 = vmatprep.subr.mxu1 %v11647_v0 }
  0x5c   : > { %1033 = vmatpush2.msra.mxu1 %v8328_v24 }
  0x5d   : > { %719 = vrot.lane.b32.xlu1 %v8383_v33, %s8058_s17  ;;  %721 = vrot.lane.b32.xlu0 %v8386_v34, %s8058_s17 }
  0x5e   : > { %1034 = vmatprep.subr.mxu1 %v11647_v0 }
  0x5f   : > { %1035 = vmatpush2.msra.mxu1 %v8325_v23 }
  0x60   : > { %1036 = vmatprep.subr.mxu1 %v11647_v0 }
  0x61   : > { %1278 = vrot.lane.b32.xlu1 %v8195_v3, %s8059_s24  ;;  %1280 = vrot.lane.b32.xlu0 %v8185_v1, %s8059_s24 }
  0x62   : > { %1037 = vmatpush2.msra.mxu1 %v8341_v26 }
  0x63   : > { %1038 = vmatprep.subr.mxu1 %v11647_v0 }
  0x64   : > { %1039 = vmatpush2.msra.mxu1 %v8338_v25 }
  0x65   : > { %1274 = vrot.lane.b32.xlu1 %v8198_v4, %s8059_s24  ;;  %1276 = vrot.lane.b32.xlu0 %v8188_v2, %s8059_s24 }
  0x66   : > { %1040 = vmatprep.subr.mxu1 %v11647_v0 }
  0x67   : > { %1041 = vmatpush2.msra.mxu1 %v8354_v28 }
  0x68   : > { %1042 = vmatprep.subr.mxu1 %v11647_v0 }
  0x69   : > { %1270 = vrot.lane.b32.xlu1 %v8208_v5, %s8059_s24  ;;  %1272 = vrot.lane.b32.xlu0 %v8211_v6, %s8059_s24 }
  0x6a   : > { %1043 = vmatpush2.msra.mxu1 %v8351_v27 }
  0x6b   : > { %1044 = vmatprep.subr.mxu1 %v11647_v0 }
  0x6c   : > { %1045 = vmatpush2.msra.mxu1 %v8373_v32 }
  0x6d   : > { %1266 = vrot.lane.b32.xlu1 %v8221_v7, %s8059_s24  ;;  %1268 = vrot.lane.b32.xlu0 %v8224_v8, %s8059_s24 }
  0x6e   : > { %1046 = vmatprep.subr.mxu1 %v11647_v0 }
  0x6f   : > { %1047 = vmatpush2.msra.mxu1 %v8370_v31 }
  0x70   : > { %1048 = vmatprep.subr.mxu1 %v11647_v0 }
  0x71   : > { %1262 = vrot.lane.b32.xlu1 %v8234_v9, %s8059_s24  ;;  %1264 = vrot.lane.b32.xlu0 %v8237_v10, %s8059_s24 }
  0x72   : > { %1049 = vmatpush2.msra.mxu1 %v8386_v34 }
  0x73   : > { %1050 = vmatprep.subr.mxu1 %v11647_v0 }
  0x74   : > { %1051 = vmatpush2.msra.mxu1 %v8383_v33 }
  0x75   : > { %1258 = vrot.lane.b32.xlu1 %v8247_v11, %s8059_s24  ;;  %1260 = vrot.lane.b32.xlu0 %v8250_v12, %s8059_s24 }
  0x76   : > { %1053 = vmatmul.mubr.f32.vlgmr.msra.gmra.mxu1 %v542_v35  ;;  %1732 = vmatprep.subr.mxu1 %v11647_v0  ;;  %v567_v35 = vld [vmem:[%s11628_s1 + $0xc8] sm:$0xff] }
  0x77   : > { %1057 = vmatprep.mubr.f32.mxu1 %v545_v36 }
  0x79   : > { %1254 = vrot.lane.b32.xlu1 %v8260_v13, %s8059_s24  ;;  %1256 = vrot.lane.b32.xlu0 %v8263_v14, %s8059_s24 }
  0x7a   : > { %1058 = vmatmul.mubr.f32.gmra.mxu1 %v544_v37 }
  0x7b   : > { %1062 = vmatprep.mubr.f32.mxu1 %v547_v38  ;;  %v566_v38 = vld [vmem:[%s11628_s1 + $0xc0] sm:$0xff] }
  0x7d   : > { %1250 = vrot.lane.b32.xlu1 %v8273_v15, %s8059_s24  ;;  %1252 = vrot.lane.b32.xlu0 %v8276_v16, %s8059_s24 }
  0x7e   : > { %1063 = vmatmul.mubr.f32.gmra.mxu1 %v546_v39  ;;  %v569_v39 = vld [vmem:[%s11628_s1 + $0xd8] sm:$0xff] }
  0x7f   : > { %1067 = vmatprep.mubr.f32.mxu1 %v549_v40 }
  0x81   : > { %1310 = vrot.lane.b32.xlu1 %v8286_v17, %s8059_s24  ;;  %1312 = vrot.lane.b32.xlu0 %v8289_v18, %s8059_s24 }
  0x82   : > { %1068 = vmatmul.mubr.f32.gmra.mxu1 %v548_v41 }
  0x83   : > { %1072 = vmatprep.mubr.f32.mxu1 %v551_v42  ;;  %v568_v42 = vld [vmem:[%s11628_s1 + $0xd0] sm:$0xff] }
  0x85   : > { %1306 = vrot.lane.b32.xlu1 %v8299_v19, %s8059_s24  ;;  %1308 = vrot.lane.b32.xlu0 %v8302_v20, %s8059_s24 }
  0x86   : > { %1073 = vmatmul.mubr.f32.gmra.mxu1 %v550_v43 }
  0x87   : > { %1077 = vmatprep.mubr.f32.mxu1 %v553_v44 }
  0x89   : > { %1302 = vrot.lane.b32.xlu1 %v8312_v21, %s8059_s24  ;;  %1304 = vrot.lane.b32.xlu0 %v8315_v22, %s8059_s24 }
  0x8a   : > { %1078 = vmatmul.mubr.f32.gmra.mxu1 %v552_v45  ;;  %v570_v45 = vld [vmem:[%s11628_s1 + $0xe0] sm:$0xff] }
  0x8b   : > { %1082 = vmatprep.mubr.f32.mxu1 %v555_v46 }
  0x8d   : > { %1298 = vrot.lane.b32.xlu1 %v8325_v23, %s8059_s24  ;;  %1300 = vrot.lane.b32.xlu0 %v8328_v24, %s8059_s24 }
  0x8e   : > { %1083 = vmatmul.mubr.f32.gmra.mxu1 %v554_v47 }
  0x8f   : > { %1087 = vmatprep.mubr.f32.mxu1 %v557_v48  ;;  %v572_v48 = vld [vmem:[%s11628_s1 + $0xf0] sm:$0xff] }
  0x91   : > { %1294 = vrot.lane.b32.xlu1 %v8338_v25, %s8059_s24  ;;  %1296 = vrot.lane.b32.xlu0 %v8341_v26, %s8059_s24 }
  0x92   : > { %1088 = vmatmul.mubr.f32.gmra.mxu1 %v556_v49 }
  0x93   : > { %v718_v51 = vpop.permute.xlu0 %717  ;;  %v714_v52 = vpop.permute.xlu1 %713  ;;  %1092 = vmatprep.mubr.f32.mxu1 %v559_v50 }
  0x94   : > { %784 = vmatpush1.msra.mxu0 %v718_v51  ;;  %v574_v51 = vld [vmem:[%s11628_s1 + $0x100] sm:$0xff] }
  0x95   : > { %1290 = vrot.lane.b32.xlu1 %v8351_v27, %s8059_s24  ;;  %785 = vmatprep.subr.mxu0 %v11647_v0 }
  0x96   : > { %1292 = vrot.lane.b32.xlu0 %v8354_v28, %s8059_s24  ;;  %1093 = vmatmul.mubr.f32.gmra.mxu1 %v558_v53 }
  0x97   : > { %v716_v55 = vpop.permute.xlu0 %715  ;;  %v712_v56 = vpop.permute.xlu1 %711  ;;  %1097 = vmatprep.mubr.f32.mxu1 %v561_v54  ;;  %v576_v54 = vld [vmem:[%s11628_s1 + $0x110] sm:$0xff] }
  0x98   : > { %786 = vmatpush1.msra.mxu0 %v716_v55 }
  0x99   : > { %787 = vmatprep.subr.mxu0 %v11647_v0  ;;  %1286 = vrot.lane.b32.xlu1 %v8370_v31, %s8059_s24 }
  0x9a   : > { %788 = vmatpush1.msra.mxu0 %v714_v52  ;;  %1288 = vrot.lane.b32.xlu0 %v8373_v32, %s8059_s24 }
  0x9b   : > { %789 = vmatprep.subr.mxu0 %v11647_v0  ;;  %v708_v59 = vpop.permute.xlu1 %707  ;;  %v710_v60 = vpop.permute.xlu0 %709  ;;  %1098 = vmatmul.mubr.f32.gmra.mxu1 %v560_v57  ;;  %v578_v57 = vld [vmem:[%s11628_s1 + $0x120] sm:$0xff] }
  0x9c   : > { %790 = vmatpush1.msra.mxu0 %v712_v56  ;;  %1102 = vmatprep.mubr.f32.mxu1 %v563_v58 }
  0x9d   : > { %791 = vmatprep.subr.mxu0 %v11647_v0  ;;  %1282 = vrot.lane.b32.xlu1 %v8383_v33, %s8059_s24 }
  0x9e   : > { %792 = vmatpush1.msra.mxu0 %v710_v60  ;;  %1284 = vrot.lane.b32.xlu0 %v8386_v34, %s8059_s24  ;;  %v580_v60 = vld [vmem:[%s11628_s1 + $0x130] sm:$0xff] }
  0x9f   : > { %793 = vmatprep.subr.mxu0 %v11647_v0  ;;  %v704_v63 = vpop.permute.xlu1 %703  ;;  %v706_v29 = vpop.permute.xlu0 %705  ;;  %1103 = vmatmul.mubr.f32.gmra.mxu1 %v562_v61 }
  0xa0   : > { %794 = vmatpush1.msra.mxu0 %v708_v59  ;;  %1107 = vmatprep.mubr.f32.mxu1 %v565_v62 }
  0xa1   : > { %795 = vmatprep.subr.mxu0 %v11647_v0  ;;  %1664 = vrot.lane.b32.xlu1 %v8195_v3, %s11645_s20 }
  0xa2   : > { %796 = vmatpush1.msra.mxu0 %v706_v29  ;;  %1666 = vrot.lane.b32.xlu0 %v8185_v1, %s11645_s20 }
  0xa3   : > { %797 = vmatprep.subr.mxu0 %v11647_v0  ;;  %v700_v36 = vpop.permute.xlu1 %699  ;;  %v702_v37 = vpop.permute.xlu0 %701  ;;  %1108 = vmatmul.mubr.f32.gmra.mxu1 %v564_v30 }
  0xa4   : > { %798 = vmatpush1.msra.mxu0 %v704_v63  ;;  %1112 = vmatprep.mubr.f32.mxu1 %v567_v35  ;;  %v582_v63 = vld [vmem:[%s11628_s1 + $0x140] sm:$0xff]  ;;  %v584_v35 = vld [vmem:[%s11628_s1 + $0x150] sm:$0xff] }
  0xa5   : > { %799 = vmatprep.subr.mxu0 %v11647_v0  ;;  %1662 = vrot.lane.b32.xlu1 %v8188_v2, %s11645_s20 }
  0xa6   : > { %800 = vmatpush1.msra.mxu0 %v702_v37  ;;  %2052 = vrot.lane.b32.xlu0 %v8185_v1, %s11643_s28  ;;  %v571_v1 = vld [vmem:[%s11628_s1 + $0xe8] sm:$0xff] }
  0xa7   : > { %801 = vmatprep.subr.mxu0 %v11647_v0  ;;  %v696_v40 = vpop.permute.xlu1 %695  ;;  %v698_v41 = vpop.permute.xlu0 %697  ;;  %1113 = vmatmul.mubr.f32.gmra.mxu1 %v566_v38  ;;  %v586_v38 = vld [vmem:[%s11628_s1 + $0x160] sm:$0xff] }
  0xa8   : > { %802 = vmatpush1.msra.mxu0 %v700_v36  ;;  %1117 = vmatprep.mubr.f32.mxu1 %v569_v39 }
  0xa9   : > { %803 = vmatprep.subr.mxu0 %v11647_v0  ;;  %1660 = vrot.lane.b32.xlu1 %v8198_v4, %s11645_s20 }
  0xaa   : > { %804 = vmatpush1.msra.mxu0 %v698_v41  ;;  %2050 = vrot.lane.b32.xlu0 %v8195_v3, %s11643_s28  ;;  %v573_v3 = vld [vmem:[%s11628_s1 + $0xf8] sm:$0xff]  ;;  %v588_v41 = vld [vmem:[%s11628_s1 + $0x170] sm:$0xff] }
  0xab   : > { %805 = vmatprep.subr.mxu0 %v11647_v0  ;;  %v692_v43 = vpop.permute.xlu1 %691  ;;  %v694_v44 = vpop.permute.xlu0 %693  ;;  %1118 = vmatmul.mubr.f32.gmra.mxu1 %v568_v42  ;;  %v6261_v42 = vld [vmem:[%s11628_s1 + $0x1c0] sm:$0xff] }
  0xac   : > { %806 = vmatpush1.msra.mxu0 %v696_v40  ;;  %1122 = vmatprep.mubr.f32.mxu1 %v571_v1 }
  0xad   : > { %807 = vmatprep.subr.mxu0 %v11647_v0  ;;  %1658 = vrot.lane.b32.xlu1 %v8211_v6, %s11645_s20 }
  0xae   : > { %808 = vmatpush1.msra.mxu0 %v694_v44  ;;  %2048 = vrot.lane.b32.xlu0 %v8188_v2, %s11643_s28  ;;  %v575_v2 = vld [vmem:[%s11628_s1 + $0x108] sm:$0xff] }
  0xaf   : > { %809 = vmatprep.subr.mxu0 %v11647_v0  ;;  %v688_v46 = vpop.permute.xlu1 %687  ;;  %v690_v47 = vpop.permute.xlu0 %689  ;;  %1123 = vmatmul.mubr.f32.gmra.mxu1 %v570_v45  ;;  %v590_v45 = vld [vmem:[%s11628_s1 + $0x180] sm:$0xff] }
  0xb0   : > { %810 = vmatpush1.msra.mxu0 %v692_v43  ;;  %1127 = vmatprep.mubr.f32.mxu1 %v573_v3  ;;  %v6264_v43 = vld [vmem:[%s11628_s1 + $0x1d8] sm:$0xff] }
  0xb1   : > { %811 = vmatprep.subr.mxu0 %v11647_v0  ;;  %1656 = vrot.lane.b32.xlu1 %v8208_v5, %s11645_s20 }
  0xb2   : > { %812 = vmatpush1.msra.mxu0 %v690_v47  ;;  %2046 = vrot.lane.b32.xlu0 %v8198_v4, %s11643_s28  ;;  %v577_v4 = vld [vmem:[%s11628_s1 + $0x118] sm:$0xff] }
  0xb3   : > { %813 = vmatprep.subr.mxu0 %v11647_v0  ;;  %v748_v49 = vpop.permute.xlu1 %747  ;;  %v750_v50 = vpop.permute.xlu0 %749  ;;  %1128 = vmatmul.mubr.f32.gmra.mxu1 %v572_v48  ;;  %v593_v48 = vld [vmem:[%s11628_s1 + $0x198] sm:$0xff] }
  0xb4   : > { %814 = vmatpush1.msra.mxu0 %v688_v46  ;;  %1132 = vmatprep.mubr.f32.mxu1 %v575_v2  ;;  %v6266_v46 = vld [vmem:[%s11628_s1 + $0x1e8] sm:$0xff]  ;;  %v6265_v2 = vld [vmem:[%s11628_s1 + $0x1e0] sm:$0xff] }
  0xb5   : > { %1654 = vrot.lane.b32.xlu1 %v8224_v8, %s11645_s20  ;;  %815 = vmatprep.subr.mxu0 %v11647_v0 }
  0xb6   : > { %816 = vmatpush2.msra.mxu0 %v750_v50  ;;  %2044 = vrot.lane.b32.xlu0 %v8211_v6, %s11643_s28  ;;  %v579_v6 = vld [vmem:[%s11628_s1 + $0x128] sm:$0xff] }
  0xb7   : > { %817 = vmatprep.subr.mxu0 %v11647_v0  ;;  %v744_v52 = vpop.permute.xlu1 %743  ;;  %v746_v53 = vpop.permute.xlu0 %745  ;;  %1133 = vmatmul.mubr.f32.gmra.mxu1 %v574_v51  ;;  %v592_v51 = vld [vmem:[%s11628_s1 + $0x190] sm:$0xff] }
  0xb8   : > { %818 = vmatpush2.msra.mxu0 %v748_v49  ;;  %1137 = vmatprep.mubr.f32.mxu1 %v577_v4  ;;  %v6267_v4 = vld [vmem:[%s11628_s1 + $0x1f0] sm:$0xff] }
  0xb9   : > { %1652 = vrot.lane.b32.xlu1 %v8221_v7, %s11645_s20  ;;  %819 = vmatprep.subr.mxu0 %v11647_v0 }
  0xba   : > { %820 = vmatpush2.msra.mxu0 %v746_v53  ;;  %2042 = vrot.lane.b32.xlu0 %v8208_v5, %s11643_s28  ;;  %v581_v5 = vld [vmem:[%s11628_s1 + $0x138] sm:$0xff] }
  0xbb   : > { %821 = vmatprep.subr.mxu0 %v11647_v0  ;;  %v740_v55 = vpop.permute.xlu1 %739  ;;  %v742_v56 = vpop.permute.xlu0 %741  ;;  %1138 = vmatmul.mubr.f32.gmra.mxu1 %v576_v54  ;;  %v595_v54 = vld [vmem:[%s11628_s1 + $0x1a8] sm:$0xff] }
  0xbc   : > { %822 = vmatpush2.msra.mxu0 %v744_v52  ;;  %1142 = vmatprep.mubr.f32.mxu1 %v579_v6  ;;  %v6269_v6 = vld [vmem:[%s11628_s1 + $0x200] sm:$0xff] }
  0xbd   : > { %1650 = vrot.lane.b32.xlu1 %v8237_v10, %s11645_s20  ;;  %823 = vmatprep.subr.mxu0 %v11647_v0 }
  0xbe   : > { %824 = vmatpush2.msra.mxu0 %v742_v56  ;;  %2040 = vrot.lane.b32.xlu0 %v8224_v8, %s11643_s28  ;;  %v583_v8 = vld [vmem:[%s11628_s1 + $0x148] sm:$0xff] }
  0xbf   : > { %825 = vmatprep.subr.mxu0 %v11647_v0  ;;  %v736_v58 = vpop.permute.xlu1 %735  ;;  %v738_v59 = vpop.permute.xlu0 %737  ;;  %1143 = vmatmul.mubr.f32.gmra.mxu1 %v578_v57  ;;  %v594_v57 = vld [vmem:[%s11628_s1 + $0x1a0] sm:$0xff] }
  0xc0   : > { %826 = vmatpush2.msra.mxu0 %v740_v55  ;;  %1147 = vmatprep.mubr.f32.mxu1 %v581_v5  ;;  %v6271_v5 = vld [vmem:[%s11628_s1 + $0x210] sm:$0xff] }
  0xc1   : > { %1648 = vrot.lane.b32.xlu1 %v8234_v9, %s11645_s20  ;;  %827 = vmatprep.subr.mxu0 %v11647_v0 }
  0xc2   : > { %828 = vmatpush2.msra.mxu0 %v738_v59  ;;  %2038 = vrot.lane.b32.xlu0 %v8221_v7, %s11643_s28  ;;  %v585_v7 = vld [vmem:[%s11628_s1 + $0x158] sm:$0xff] }
  0xc3   : > { %829 = vmatprep.subr.mxu0 %v11647_v0  ;;  %v732_v61 = vpop.permute.xlu1 %731  ;;  %v734_v62 = vpop.permute.xlu0 %733  ;;  %1148 = vmatmul.mubr.f32.gmra.mxu1 %v580_v60  ;;  %v597_v60 = vld [vmem:[%s11628_s1 + $0x1b8] sm:$0xff] }
  0xc4   : > { %830 = vmatpush2.msra.mxu0 %v736_v58  ;;  %1152 = vmatprep.mubr.f32.mxu1 %v583_v8  ;;  %v6273_v8 = vld [vmem:[%s11628_s1 + $0x220] sm:$0xff] }
  0xc5   : > { %1646 = vrot.lane.b32.xlu1 %v8250_v12, %s11645_s20  ;;  %831 = vmatprep.subr.mxu0 %v11647_v0 }
  0xc6   : > { %832 = vmatpush2.msra.mxu0 %v734_v62  ;;  %2036 = vrot.lane.b32.xlu0 %v8237_v10, %s11643_s28  ;;  %v587_v10 = vld [vmem:[%s11628_s1 + $0x168] sm:$0xff] }
  0xc7   : > { %833 = vmatprep.subr.mxu0 %v11647_v0  ;;  %v728_v29 = vpop.permute.xlu1 %727  ;;  %v730_v30 = vpop.permute.xlu0 %729  ;;  %1153 = vmatmul.mubr.f32.gmra.mxu1 %v582_v63  ;;  %v596_v63 = vld [vmem:[%s11628_s1 + $0x1b0] sm:$0xff] }
  0xc8   : > { %834 = vmatpush2.msra.mxu0 %v732_v61  ;;  %1157 = vmatprep.mubr.f32.mxu1 %v585_v7  ;;  %v6275_v7 = vld [vmem:[%s11628_s1 + $0x230] sm:$0xff] }
  0xc9   : > { %1644 = vrot.lane.b32.xlu1 %v8247_v11, %s11645_s20  ;;  %835 = vmatprep.subr.mxu0 %v11647_v0 }
  0xca   : > { %836 = vmatpush2.msra.mxu0 %v730_v30  ;;  %2034 = vrot.lane.b32.xlu0 %v8234_v9, %s11643_s28  ;;  %v589_v9 = vld [vmem:[%s11628_s1 + $0x178] sm:$0xff] }
  0xcb   : > { %837 = vmatprep.subr.mxu0 %v11647_v0  ;;  %v724_v36 = vpop.permute.xlu1 %723  ;;  %v726_v37 = vpop.permute.xlu0 %725  ;;  %1158 = vmatmul.mubr.f32.gmra.mxu1 %v584_v35  ;;  %v6277_v35 = vld [vmem:[%s11628_s1 + $0x240] sm:$0xff] }
  0xcc   : > { %838 = vmatpush2.msra.mxu0 %v728_v29  ;;  %1162 = vmatprep.mubr.f32.mxu1 %v587_v10 }
  0xcd   : > { %1642 = vrot.lane.b32.xlu1 %v8263_v14, %s11645_s20  ;;  %839 = vmatprep.subr.mxu0 %v11647_v0 }
  0xce   : > { %840 = vmatpush2.msra.mxu0 %v726_v37  ;;  %2032 = vrot.lane.b32.xlu0 %v8250_v12, %s11643_s28  ;;  %v591_v12 = vld [vmem:[%s11628_s1 + $0x188] sm:$0xff]  ;;  %v6279_v37 = vld [vmem:[%s11628_s1 + $0x250] sm:$0xff] }
  0xcf   : > { %841 = vmatprep.subr.mxu0 %v11647_v0  ;;  %v720_v39 = vpop.permute.xlu1 %719  ;;  %v722_v40 = vpop.permute.xlu0 %721  ;;  %1163 = vmatmul.mubr.f32.gmra.mxu1 %v586_v38 }
  0xd0   : > { %842 = vmatpush2.msra.mxu0 %v724_v36  ;;  %1167 = vmatprep.mubr.f32.mxu1 %v589_v9  ;;  %v6280_v36 = vld [vmem:[%s11628_s1 + $0x258] sm:$0xff]  ;;  %v6282_v9 = vld [vmem:[%s11628_s1 + $0x268] sm:$0xff] }
  0xd1   : > { %1640 = vrot.lane.b32.xlu1 %v8260_v13, %s11645_s20  ;;  %843 = vmatprep.subr.mxu0 %v11647_v0 }
  0xd2   : > { %844 = vmatpush2.msra.mxu0 %v722_v40  ;;  %2030 = vrot.lane.b32.xlu0 %v8247_v11, %s11643_s28  ;;  %v6263_v11 = vld [vmem:[%s11628_s1 + $0x1d0] sm:$0xff] }
  0xd3   : > { %845 = vmatprep.subr.mxu0 %v11647_v0  ;;  %v1279_v1 = vpop.permute.xlu1 %1278  ;;  %v1281_v44 = vpop.permute.xlu0 %1280  ;;  %1168 = vmatmul.mubr.f32.gmra.mxu1 %v588_v41  ;;  %v6284_v41 = vld [vmem:[%s11628_s1 + $0x278] sm:$0xff] }
  0xd4   : > { %846 = vmatpush2.msra.mxu0 %v720_v39  ;;  %1172 = vmatprep.mubr.f32.mxu1 %v591_v12  ;;  %v6281_v39 = vld [vmem:[%s11628_s1 + $0x260] sm:$0xff]  ;;  %v6283_v12 = vld [vmem:[%s11628_s1 + $0x270] sm:$0xff] }
  0xd5   : > { %1638 = vrot.lane.b32.xlu1 %v8276_v16, %s11645_s20  ;;  %848 = vmatmul.mubr.f32.vlgmr.msra.gmra.mxu0 %v6261_v42 }
  0xd6   : > { %852 = vmatprep.mubr.f32.mxu0 %v6264_v43  ;;  %1346 = vmatprep.subr.mxu0 %v11647_v0  ;;  %v6285_v43 = vld [vmem:[%s11628_s1 + $0x280] sm:$0xff] }
  0xd7   : > { %v1275_v3 = vpop.permute.xlu1 %1274  ;;  %1347 = vmatpush1.msra.mxu0 %v1281_v44  ;;  %2028 = vrot.lane.b32.xlu0 %v8263_v14, %s11643_s28  ;;  %v1277_v47 = vpop.permute.xlu0 %1276  ;;  %v6268_v14 = vld [vmem:[%s11628_s1 + $0x1f8] sm:$0xff] }
  0xd8   : > { %1348 = vmatprep.subr.mxu0 %v11647_v0  ;;  %1173 = vmatmul.mubr.f32.gmra.mxu1 %v590_v45  ;;  %v6288_v45 = vld [vmem:[%s11628_s1 + $0x298] sm:$0xff] }
  0xd9   : > { %1636 = vrot.lane.b32.xlu1 %v8273_v15, %s11645_s20  ;;  %853 = vmatmul.mubr.f32.gmra.mxu0 %v6263_v11  ;;  %v6287_v11 = vld [vmem:[%s11628_s1 + $0x290] sm:$0xff] }
  0xda   : > { %857 = vmatprep.mubr.f32.mxu0 %v6266_v46  ;;  %1349 = vmatpush1.msra.mxu0 %v1279_v1  ;;  %v6286_v1 = vld [vmem:[%s11628_s1 + $0x288] sm:$0xff] }
  0xdb   : > { %v1271_v49 = vpop.permute.xlu1 %1270  ;;  %1350 = vmatprep.subr.mxu0 %v11647_v0  ;;  %2026 = vrot.lane.b32.xlu0 %v8260_v13, %s11643_s28  ;;  %v1273_v50 = vpop.permute.xlu0 %1272  ;;  %v6270_v13 = vld [vmem:[%s11628_s1 + $0x208] sm:$0xff] }
  0xdc   : > { %1351 = vmatpush1.msra.mxu0 %v1277_v47  ;;  %1177 = vmatprep.mubr.f32.mxu1 %v593_v48  ;;  %v6290_v46 = vld [vmem:[%s11628_s1 + $0x2a8] sm:$0xff]  ;;  %v6289_v47 = vld [vmem:[%s11628_s1 + $0x2a0] sm:$0xff] }
  0xdd   : > { %1698 = vrot.lane.b32.xlu1 %v8289_v18, %s11645_s20  ;;  %858 = vmatmul.mubr.f32.gmra.mxu0 %v6265_v2  ;;  %v6292_v2 = vld [vmem:[%s11628_s1 + $0x2b8] sm:$0xff] }
  0xde   : > { %862 = vmatprep.mubr.f32.mxu0 %v6268_v14  ;;  %1352 = vmatprep.subr.mxu0 %v11647_v0  ;;  %v6291_v14 = vld [vmem:[%s11628_s1 + $0x2b0] sm:$0xff] }
  0xdf   : > { %v1267_v52 = vpop.permute.xlu1 %1266  ;;  %1353 = vmatpush1.msra.mxu0 %v1275_v3  ;;  %2024 = vrot.lane.b32.xlu0 %v8276_v16, %s11643_s28  ;;  %v1269_v53 = vpop.permute.xlu0 %1268  ;;  %v6272_v16 = vld [vmem:[%s11628_s1 + $0x218] sm:$0xff] }
  0xe0   : > { %1354 = vmatprep.subr.mxu0 %v11647_v0  ;;  %1178 = vmatmul.mubr.f32.gmra.mxu1 %v592_v51 }
  0xe1   : > { %1696 = vrot.lane.b32.xlu1 %v8286_v17, %s11645_s20  ;;  %863 = vmatmul.mubr.f32.gmra.mxu0 %v6267_v4  ;;  %v6293_v4 = vld [vmem:[%s11628_s1 + $0x2c0] sm:$0xff] }
  0xe2   : > { %867 = vmatprep.mubr.f32.mxu0 %v6270_v13  ;;  %1355 = vmatpush1.msra.mxu0 %v1273_v50  ;;  %v6296_v13 = vld [vmem:[%s11628_s1 + $0x2d8] sm:$0xff] }
  0xe3   : > { %v1263_v55 = vpop.permute.xlu1 %1262  ;;  %1356 = vmatprep.subr.mxu0 %v11647_v0  ;;  %2022 = vrot.lane.b32.xlu0 %v8273_v15, %s11643_s28  ;;  %v1265_v56 = vpop.permute.xlu0 %1264  ;;  %v6274_v15 = vld [vmem:[%s11628_s1 + $0x228] sm:$0xff] }
  0xe4   : > { %1357 = vmatpush1.msra.mxu0 %v1271_v49  ;;  %1182 = vmatprep.mubr.f32.mxu1 %v595_v54  ;;  %v6374_v49 = vld [vmem:[%s11628_s1 + $0x548] sm:$0xff] }
  0xe5   : > { %1694 = vrot.lane.b32.xlu1 %v8302_v20, %s11645_s20  ;;  %868 = vmatmul.mubr.f32.gmra.mxu0 %v6269_v6  ;;  %v6298_v54 = vld [vmem:[%s11628_s1 + $0x2e8] sm:$0xff] }
  0xe6   : > { %872 = vmatprep.mubr.f32.mxu0 %v6272_v16  ;;  %1358 = vmatprep.subr.mxu0 %v11647_v0 }
  0xe7   : > { %v1259_v58 = vpop.permute.xlu1 %1258  ;;  %1359 = vmatpush1.msra.mxu0 %v1269_v53  ;;  %2084 = vrot.lane.b32.xlu0 %v8289_v18, %s11643_s28  ;;  %v1261_v59 = vpop.permute.xlu0 %1260  ;;  %v6276_v18 = vld [vmem:[%s11628_s1 + $0x238] sm:$0xff] }
  0xe8   : > { %1360 = vmatprep.subr.mxu0 %v11647_v0  ;;  %1183 = vmatmul.mubr.f32.gmra.mxu1 %v594_v57  ;;  %v8013_v57 = vld [vmem:[%s8182_s16 + $0x90] sm:$0xff] }
  0xe9   : > { %1692 = vrot.lane.b32.xlu1 %v8299_v19, %s11645_s20  ;;  %873 = vmatmul.mubr.f32.gmra.mxu0 %v6271_v5 }
  0xea   : > { %877 = vmatprep.mubr.f32.mxu0 %v6274_v15  ;;  %1361 = vmatpush1.msra.mxu0 %v1267_v52 }
  0xeb   : > { %v1255_v61 = vpop.permute.xlu1 %1254  ;;  %1362 = vmatprep.subr.mxu0 %v11647_v0  ;;  %2082 = vrot.lane.b32.xlu0 %v8286_v17, %s11643_s28  ;;  %v1257_v62 = vpop.permute.xlu0 %1256  ;;  %v6278_v17 = vld [vmem:[%s11628_s1 + $0x248] sm:$0xff] }
  0xec   : > { %1363 = vmatpush1.msra.mxu0 %v1265_v56  ;;  %1187 = vmatprep.mubr.f32.mxu1 %v597_v60  ;;  %v6302_v56 = vld [vmem:[%s11628_s1 + $0x308] sm:$0xff] }
  0xed   : > { %1690 = vrot.lane.b32.xlu1 %v8315_v22, %s11645_s20  ;;  %878 = vmatmul.mubr.f32.gmra.mxu0 %v6273_v8  ;;  %v8014_v60 = vld [vmem:[%s8182_s16 + $0x88] sm:$0xff] }
  0xee   : > { %882 = vmatprep.mubr.f32.mxu0 %v6276_v18  ;;  %1364 = vmatprep.subr.mxu0 %v11647_v0 }
  0xef   : > { %v1251_v29 = vpop.permute.xlu1 %1250  ;;  %1365 = vmatpush1.msra.mxu0 %v1263_v55  ;;  %2080 = vrot.lane.b32.xlu0 %v8302_v20, %s11643_s28  ;;  %v1253_v30 = vpop.permute.xlu0 %1252  ;;  %v6300_v55 = vld [vmem:[%s11628_s1 + $0x2f8] sm:$0xff] }
  0xf0   : > { %1366 = vmatprep.subr.mxu0 %v11647_v0  ;;  %1188 = vmatmul.mubr.f32.gmra.mxu1 %v596_v63  ;;  %v8015_v63 = vld [vmem:[%s8182_s16 + $0x80] sm:$0xff] }
  0xf1   : > { %1688 = vrot.lane.b32.xlu1 %v8312_v21, %s11645_s20  ;;  %883 = vmatmul.mubr.f32.gmra.mxu0 %v6275_v7 }
  0xf2   : > { %887 = vmatprep.mubr.f32.mxu0 %v6278_v17  ;;  %1367 = vmatpush1.msra.mxu0 %v1261_v59  ;;  %v6304_v59 = vld [vmem:[%s11628_s1 + $0x318] sm:$0xff] }
  0xf3   : > { %v1311_v10 = vpop.permute.xlu1 %1310  ;;  %1368 = vmatprep.subr.mxu0 %v11647_v0  ;;  %2078 = vrot.lane.b32.xlu0 %v8299_v19, %s11643_s28  ;;  %v1313_v20 = vpop.permute.xlu0 %1312 }
  0xf4   : > { %1369 = vmatpush1.msra.mxu0 %v1259_v58  ;;  %1796 = vmatprep.mubr.f32.mxu1 %v6374_v49  ;;  %v6301_v58 = vld [vmem:[%s11628_s1 + $0x300] sm:$0xff] }
  0xf5   : > { %1686 = vrot.lane.b32.xlu1 %v8328_v24, %s11645_s20  ;;  %888 = vmatmul.mubr.f32.gmra.mxu0 %v6277_v35 }
  0xf6   : > { %892 = vmatprep.mubr.f32.mxu0 %v6280_v36  ;;  %1370 = vmatprep.subr.mxu0 %v11647_v0 }
  0xf7   : > { %v1307_v38 = vpop.permute.xlu1 %1306  ;;  %1371 = vmatpush1.msra.mxu0 %v1257_v62  ;;  %2076 = vrot.lane.b32.xlu0 %v8315_v22, %s11643_s28  ;;  %v1309_v19 = vpop.permute.xlu0 %1308  ;;  %v6306_v62 = vld [vmem:[%s11628_s1 + $0x328] sm:$0xff] }
  0xf8   : > { %1372 = vmatprep.subr.mxu0 %v11647_v0 }
  0xf9   : > { %1684 = vrot.lane.b32.xlu1 %v8325_v23, %s11645_s20  ;;  %893 = vmatmul.mubr.f32.gmra.mxu0 %v6279_v37 }
  0xfa   : > { %897 = vmatprep.mubr.f32.mxu0 %v6282_v9  ;;  %1373 = vmatpush1.msra.mxu0 %v1255_v61  ;;  %v6303_v61 = vld [vmem:[%s11628_s1 + $0x310] sm:$0xff] }
  0xfb   : > { %v1303_v40 = vpop.permute.xlu1 %1302  ;;  %1374 = vmatprep.subr.mxu0 %v11647_v0  ;;  %2074 = vrot.lane.b32.xlu0 %v8312_v21, %s11643_s28  ;;  %v1305_v22 = vpop.permute.xlu0 %1304 }
  0xfc   : > { %1375 = vmatpush1.msra.mxu0 %v1253_v30  ;;  %v6308_v30 = vld [vmem:[%s11628_s1 + $0x338] sm:$0xff] }
  0xfd   : > { %1682 = vrot.lane.b32.xlu1 %v8341_v26, %s11645_s20  ;;  %898 = vmatmul.mubr.f32.gmra.mxu0 %v6281_v39 }
  0xfe   : > { %902 = vmatprep.mubr.f32.mxu0 %v6284_v41  ;;  %1376 = vmatprep.subr.mxu0 %v11647_v0 }
  0xff   : > { %v1299_v42 = vpop.permute.xlu1 %1298  ;;  %1377 = vmatpush1.msra.mxu0 %v1251_v29  ;;  %2072 = vrot.lane.b32.xlu0 %v8328_v24, %s11643_s28  ;;  %v1301_v21 = vpop.permute.xlu0 %1300  ;;  %v6305_v29 = vld [vmem:[%s11628_s1 + $0x320] sm:$0xff] }
 0x100   : > { %1378 = vmatprep.subr.mxu0 %v11647_v0 }
 0x101   : > { %1680 = vrot.lane.b32.xlu1 %v8338_v25, %s11645_s20  ;;  %903 = vmatmul.mubr.f32.gmra.mxu0 %v6283_v12  ;;  %v6314_v12 = vld [vmem:[%s11628_s1 + $0x368] sm:$0xff] }
 0x102   : > { %907 = vmatprep.mubr.f32.mxu0 %v6286_v1  ;;  %1379 = vmatpush2.msra.mxu0 %v1313_v20  ;;  %v6310_v20 = vld [vmem:[%s11628_s1 + $0x348] sm:$0xff] }
 0x103   : > { %v8864_v44 = vpop.permute.xlu1 %1294  ;;  %1380 = vmatprep.subr.mxu0 %v11647_v0  ;;  %2070 = vrot.lane.b32.xlu0 %v8325_v23, %s11643_s28  ;;  %v1297_v24 = vpop.permute.xlu0 %1296 }
 0x104   : > { %1381 = vmatpush2.msra.mxu0 %v1311_v10  ;;  %v6307_v10 = vld [vmem:[%s11628_s1 + $0x330] sm:$0xff] }
 0x105   : > { %1678 = vrot.lane.b32.xlu1 %v8354_v28, %s11645_s20  ;;  %908 = vmatmul.mubr.f32.gmra.mxu0 %v6285_v43 }
 0x106   : > { %912 = vmatprep.mubr.f32.mxu0 %v6288_v45  ;;  %1382 = vmatprep.subr.mxu0 %v11647_v0  ;;  %v6316_v45 = vld [vmem:[%s11628_s1 + $0x378] sm:$0xff] }
 0x107   : > { %v8878_v3 = vpop.permute.xlu1 %1290  ;;  %1383 = vmatpush2.msra.mxu0 %v1309_v19  ;;  %2068 = vrot.lane.b32.xlu0 %v8341_v26, %s11643_s28  ;;  %v6312_v19 = vld [vmem:[%s11628_s1 + $0x358] sm:$0xff] }
 0x108   : > { %1384 = vmatprep.subr.mxu0 %v11647_v0  ;;  %v1293_v23 = vpop.permute.xlu0 %1292 }
 0x109   : > { %1676 = vrot.lane.b32.xlu1 %v8351_v27, %s11645_s20  ;;  %913 = vmatmul.mubr.f32.gmra.mxu0 %v6287_v11 }
 0x10a   : > { %917 = vmatprep.mubr.f32.mxu0 %v6290_v46  ;;  %1385 = vmatpush2.msra.mxu0 %v1307_v38  ;;  %v6309_v38 = vld [vmem:[%s11628_s1 + $0x340] sm:$0xff] }
 0x10b   : > { %v8891_v48 = vpop.permute.xlu1 %1286  ;;  %1386 = vmatprep.subr.mxu0 %v11647_v0  ;;  %2066 = vrot.lane.b32.xlu0 %v8338_v25, %s11643_s28  ;;  %v6294_v25 = vld [vmem:[%s11628_s1 + $0x2c8] sm:$0xff] }
 0x10c   : > { %1387 = vmatpush2.msra.mxu0 %v1305_v22  ;;  %v1289_v26 = vpop.permute.xlu0 %1288 }
 0x10d   : > { %1674 = vrot.lane.b32.xlu1 %v8373_v32, %s11645_s20  ;;  %918 = vmatmul.mubr.f32.gmra.mxu0 %v6289_v47  ;;  %v6318_v47 = vld [vmem:[%s11628_s1 + $0x388] sm:$0xff] }
 0x10e   : > { %922 = vmatprep.mubr.f32.mxu0 %v6292_v2  ;;  %1388 = vmatprep.subr.mxu0 %v11647_v0 }
 0x10f   : > { %v8908_v50 = vpop.permute.xlu1 %1282  ;;  %1389 = vmatpush2.msra.mxu0 %v1303_v40  ;;  %2064 = vrot.lane.b32.xlu0 %v8354_v28, %s11643_s28  ;;  %v6311_v40 = vld [vmem:[%s11628_s1 + $0x350] sm:$0xff] }
 0x110   : > { %1390 = vmatprep.subr.mxu0 %v11647_v0  ;;  %v1285_v51 = vpop.permute.xlu0 %1284 }
 0x111   : > { %1672 = vrot.lane.b32.xlu1 %v8370_v31, %s11645_s20  ;;  %923 = vmatmul.mubr.f32.gmra.mxu0 %v6291_v14  ;;  %v6295_v31 = vld [vmem:[%s11628_s1 + $0x2d0] sm:$0xff] }
 0x112   : > { %927 = vmatprep.mubr.f32.mxu0 %v6294_v25  ;;  %1391 = vmatpush2.msra.mxu0 %v1301_v21  ;;  %v6313_v21 = vld [vmem:[%s11628_s1 + $0x360] sm:$0xff] }
 0x113   : > { %v1665_v52 = vpop.permute.xlu1 %1664  ;;  %1392 = vmatprep.subr.mxu0 %v11647_v0  ;;  %2062 = vrot.lane.b32.xlu0 %v8351_v27, %s11643_s28 }
 0x114   : > { %1393 = vmatpush2.msra.mxu0 %v1299_v42  ;;  %v1667_v28 = vpop.permute.xlu0 %1666 }
 0x115   : > { %1670 = vrot.lane.b32.xlu1 %v8386_v34, %s11645_s20  ;;  %928 = vmatmul.mubr.f32.gmra.mxu0 %v6293_v4  ;;  %v6297_v34 = vld [vmem:[%s11628_s1 + $0x2e0] sm:$0xff]  ;;  %v6319_v4 = vld [vmem:[%s11628_s1 + $0x390] sm:$0xff] }
 0x116   : > { %932 = vmatprep.mubr.f32.mxu0 %v6296_v13  ;;  %1394 = vmatprep.subr.mxu0 %v11647_v0 }
 0x117   : > { %v1663_v53 = vpop.permute.xlu1 %1662  ;;  %1395 = vmatpush2.msra.mxu0 %v1297_v24  ;;  %1733 = vmatpush1.msra.mxu1 %v1667_v28  ;;  %v6322_v28 = vld [vmem:[%s11628_s1 + $0x3a8] sm:$0xff] }
 0x118   : > { %1396 = vmatprep.subr.mxu0 %v11647_v0  ;;  %2060 = vrot.lane.b32.xlu0 %v8373_v32, %s11643_s28  ;;  %v8939_v27 = vpop.permute.xlu0 %2052 }
 0x119   : > { %1668 = vrot.lane.b32.xlu1 %v8383_v33, %s11645_s20  ;;  %933 = vmatmul.mubr.f32.gmra.mxu0 %v6295_v31  ;;  %v6299_v33 = vld [vmem:[%s11628_s1 + $0x2f0] sm:$0xff]  ;;  %s11664_s20 = smov 124  }
 0x11a   : > { %937 = vmatprep.mubr.f32.mxu0 %v6298_v54  ;;  %1397 = vmatpush2.msra.mxu0 %v8864_v44  ;;  %v6321_v54 = vld [vmem:[%s11628_s1 + $0x3a0] sm:$0xff] }
 0x11b   : > { %v1661_v6 = vpop.permute.xlu1 %1660  ;;  %1398 = vmatprep.subr.mxu0 %v11647_v0  ;;  %1734 = vmatprep.subr.mxu1 %v11647_v0 }
 0x11c   : > { %1399 = vmatpush2.msra.mxu0 %v1293_v23  ;;  %1735 = vmatpush1.msra.mxu1 %v1665_v52  ;;  %v8952_v32 = vpop.permute.xlu0 %2050 }
 0x11d   : > { %938 = vmatmul.mubr.f32.gmra.mxu0 %v6297_v34  ;;  %1400 = vmatprep.subr.mxu0 %v11647_v0 }
 0x11e   : > { %942 = vmatprep.mubr.f32.mxu0 %v6300_v55  ;;  %1401 = vmatpush2.msra.mxu0 %v8878_v3  ;;  %v6315_v3 = vld [vmem:[%s11628_s1 + $0x370] sm:$0xff] }
 0x11f   : > { %v1659_v16 = vpop.permute.xlu1 %1658  ;;  %1402 = vmatprep.subr.mxu0 %v11647_v0  ;;  %2058 = vrot.lane.b32.xlu0 %v8013_v57, %s11643_s28  ;;  %v6326_v57 = vld [vmem:[%s11628_s1 + $0x3c8] sm:$0xff] }
 0x120   : > { %1403 = vmatpush2.msra.mxu0 %v1289_v26  ;;  %1736 = vmatprep.subr.mxu1 %v11647_v0  ;;  %v8966_v5 = vpop.permute.xlu0 %2048  ;;  %v6317_v26 = vld [vmem:[%s11628_s1 + $0x380] sm:$0xff] }
 0x121   : > { %943 = vmatmul.mubr.f32.gmra.mxu0 %v6299_v33  ;;  %1404 = vmatprep.subr.mxu0 %v11647_v0  ;;  %v6323_v33 = vld [vmem:[%s11628_s1 + $0x3b0] sm:$0xff] }
 0x122   : > { %947 = vmatprep.mubr.f32.mxu0 %v6302_v56  ;;  %1405 = vmatpush2.msra.mxu0 %v8891_v48 }
 0x123   : > { %v1657_v15 = vpop.permute.xlu1 %1656  ;;  %1406 = vmatprep.subr.mxu0 %v11647_v0  ;;  %1737 = vmatpush1.msra.mxu1 %v1663_v53 }
 0x124   : > { %1407 = vmatpush2.msra.mxu0 %v1285_v51  ;;  %2056 = vrot.lane.b32.xlu0 %v8014_v60, %s11643_s28  ;;  %v8979_v8 = vpop.permute.xlu0 %2046 }
 0x125   : > { %948 = vmatmul.mubr.f32.gmra.mxu0 %v6301_v58  ;;  %1408 = vmatprep.subr.mxu0 %v11647_v0 }
 0x126   : > { %952 = vmatprep.mubr.f32.mxu0 %v6304_v59  ;;  %1409 = vmatpush2.msra.mxu0 %v8908_v50  ;;  %v6320_v50 = vld [vmem:[%s11628_s1 + $0x398] sm:$0xff] }
 0x127   : > { %v1655_v18 = vpop.permute.xlu1 %1654  ;;  %1738 = vmatprep.subr.mxu1 %v11647_v0  ;;  %2054 = vrot.lane.b32.xlu1 %v8015_v63, %s11643_s28 }
 0x128   : > { %1739 = vmatpush1.msra.mxu1 %v1661_v6  ;;  %2118 = vmatprep.subr.mxu0 %v11647_v0  ;;  %v8993_v7 = vpop.permute.xlu0 %2044  ;;  %v6324_v6 = vld [vmem:[%s11628_s1 + $0x3b8] sm:$0xff] }
 0x129   : > { %953 = vmatmul.mubr.f32.gmra.mxu0 %v6303_v61  ;;  %1740 = vmatprep.subr.mxu1 %v11647_v0 }
 0x12a   : > { %957 = vmatprep.mubr.f32.mxu0 %v6306_v62  ;;  %1741 = vmatpush1.msra.mxu1 %v1659_v16  ;;  %v6327_v62 = vld [vmem:[%s11628_s1 + $0x3d0] sm:$0xff] }
 0x12b   : > { %v1653_v17 = vpop.permute.xlu1 %1652  ;;  %1742 = vmatprep.subr.mxu1 %v11647_v0 }
 0x12c   : > { %1743 = vmatpush1.msra.mxu1 %v1657_v15  ;;  %v9003_v35 = vpop.permute.xlu0 %2042  ;;  %v6325_v15 = vld [vmem:[%s11628_s1 + $0x3c0] sm:$0xff] }
 0x12d   : > { %958 = vmatmul.mubr.f32.gmra.mxu0 %v6305_v29  ;;  %1744 = vmatprep.subr.mxu1 %v11647_v0  ;;  %v6330_v29 = vld [vmem:[%s11628_s1 + $0x3e8] sm:$0xff] }
 0x12e   : > { %962 = vmatprep.mubr.f32.mxu0 %v6308_v30  ;;  %1745 = vmatpush1.msra.mxu1 %v1655_v18 }
 0x12f   : > { %v1651_v36 = vpop.permute.xlu1 %1650  ;;  %1746 = vmatprep.subr.mxu1 %v11647_v0 }
 0x130   : > { %1747 = vmatpush1.msra.mxu1 %v1653_v17  ;;  %v9013_v37 = vpop.permute.xlu0 %2040 }
 0x131   : > { %963 = vmatmul.mubr.f32.gmra.mxu0 %v6307_v10  ;;  %1748 = vmatprep.subr.mxu1 %v11647_v0 }
 0x132   : > { %967 = vmatprep.mubr.f32.mxu0 %v6310_v20  ;;  %1749 = vmatpush1.msra.mxu1 %v1651_v36  ;;  %v6332_v36 = vld [vmem:[%s11628_s1 + $0x3f8] sm:$0xff] }
 0x133   : > { %v1649_v9 = vpop.permute.xlu1 %1648  ;;  %1750 = vmatprep.subr.mxu1 %v11647_v0 }
 0x134   : > { %v9023_v39 = vpop.permute.xlu0 %2038  ;;  %1751 = vmatpush1.msra.mxu1 %v1649_v9  ;;  %v6331_v9 = vld [vmem:[%s11628_s1 + $0x3f0] sm:$0xff] }
 0x135   : > { %968 = vmatmul.mubr.f32.gmra.mxu0 %v6309_v38  ;;  %1752 = vmatprep.subr.mxu1 %v11647_v0 }
 0x136   : > { %972 = vmatprep.mubr.f32.mxu0 %v6312_v19  ;;  %v9029_v41 = vpop.f32.mrf.mxu1 }
 0x137   : > { %v1647_v22 = vpop.permute.xlu1 %1646 }
 0x138   : > { %v9034_v42 = vpop.permute.xlu0 %2036  ;;  %1753 = vmatpush1.msra.mxu1 %v1647_v22  ;;  %v1056_v1 = vpop.f32.mrf.mxu1 }
 0x139   : > { %973 = vmatmul.mubr.f32.gmra.mxu0 %v6311_v40  ;;  %1754 = vmatprep.subr.mxu1 %v11647_v0 }
 0x13a   : > { %977 = vmatprep.mubr.f32.mxu0 %v6314_v12  ;;  %v9040_v43 = vpop.f32.mrf.mxu1 }
 0x13b   : > { %v1645_v44 = vpop.permute.xlu1 %1644 }
 0x13c   : > { %v9045_v24 = vpop.permute.xlu0 %2034  ;;  %1755 = vmatpush1.msra.mxu1 %v1645_v44  ;;  %v1061_v11 = vpop.f32.mrf.mxu1 }
 0x13d   : > { %978 = vmatmul.mubr.f32.gmra.mxu0 %v6313_v21  ;;  %1756 = vmatprep.subr.mxu1 %v11647_v0  ;;  %v6336_v21 = vld [vmem:[%s11628_s1 + $0x418] sm:$0xff]  ;;  %v6335_v11 = vld [vmem:[%s11628_s1 + $0x410] sm:$0xff] }
 0x13e   : > { %982 = vmatprep.mubr.f32.mxu0 %v6316_v45  ;;  %v9051_v46 = vpop.f32.mrf.mxu1 }
 0x13f   : > { %v1643_v23 = vpop.permute.xlu1 %1642 }
 0x140   : > { %v9056_v48 = vpop.permute.xlu0 %2032  ;;  %1757 = vmatpush1.msra.mxu1 %v1643_v23  ;;  %v1066_v2 = vpop.f32.mrf.mxu1  ;;  %v6338_v23 = vld [vmem:[%s11628_s1 + $0x428] sm:$0xff] }
 0x141   : > { %983 = vmatmul.mubr.f32.gmra.mxu0 %v6315_v3  ;;  %1758 = vmatprep.subr.mxu1 %v11647_v0 }
 0x142   : > { %1410 = vmatprep.mubr.f32.mxu0 %v6318_v47  ;;  %v9062_v49 = vpop.f32.mrf.mxu1 }
 0x143   : > { %v1641_v14 = vpop.permute.xlu1 %1640 }
 0x144   : > { %v9067_v25 = vpop.permute.xlu0 %2030  ;;  %1759 = vmatpush1.msra.mxu1 %v1641_v14  ;;  %v1071_v51 = vpop.f32.mrf.mxu1 }
 0x145   : > { %1411 = vmatmul.mubr.f32.vlgmr.msra.gmra.mxu0 %v6317_v26  ;;  %1760 = vmatprep.subr.mxu1 %v11647_v0  ;;  %v6337_v26 = vld [vmem:[%s11628_s1 + $0x420] sm:$0xff] }
 0x146   : > { %2119 = vmatpush1.msra.mxu0 %v8939_v27  ;;  %1415 = vmatprep.mubr.f32.mxu0 %v6320_v50  ;;  %v9074_v52 = vpop.f32.mrf.mxu1  ;;  %v6340_v50 = vld [vmem:[%s11628_s1 + $0x438] sm:$0xff] }
 0x147   : > { %2120 = vmatprep.subr.mxu0 %v11647_v0  ;;  %v1639_v13 = vpop.permute.xlu1 %1638 }
 0x148   : > { %2121 = vmatpush1.msra.mxu0 %v8952_v32  ;;  %1761 = vmatpush1.msra.mxu1 %v1639_v13  ;;  %v1076_v31 = vpop.f32.mrf.mxu1  ;;  %v6339_v13 = vld [vmem:[%s11628_s1 + $0x430] sm:$0xff] }
 0x149   : > { %2122 = vmatprep.subr.mxu0 %v11647_v0  ;;  %1416 = vmatmul.mubr.f32.gmra.mxu0 %v6319_v4  ;;  %v9082_v53 = vpop.permute.xlu0 %2028  ;;  %v6342_v31 = vld [vmem:[%s11628_s1 + $0x448] sm:$0xff] }
 0x14a   : > { %2123 = vmatpush1.msra.mxu0 %v8966_v5  ;;  %1420 = vmatprep.mubr.f32.mxu0 %v6322_v28  ;;  %v9088_v27 = vpop.f32.mrf.mxu1 }
 0x14b   : > { %2124 = vmatprep.subr.mxu0 %v11647_v0  ;;  %v1637_v34 = vpop.permute.xlu1 %1636  ;;  %1762 = vmatprep.subr.mxu1 %v11647_v0 }
 0x14c   : > { %2125 = vmatpush1.msra.mxu0 %v8979_v8  ;;  %1763 = vmatpush1.msra.mxu1 %v1637_v34  ;;  %v1081_v55 = vpop.f32.mrf.mxu1  ;;  %v6328_v8 = vld [vmem:[%s11628_s1 + $0x3d8] sm:$0xff] }
 0x14d   : > { %2126 = vmatprep.subr.mxu0 %v11647_v0  ;;  %1421 = vmatmul.mubr.f32.gmra.mxu0 %v6321_v54  ;;  %v9097_v32 = vpop.permute.xlu0 %2026 }
 0x14e   : > { %2127 = vmatpush1.msra.mxu0 %v8993_v7  ;;  %1425 = vmatprep.mubr.f32.mxu0 %v6324_v6  ;;  %v9103_v16 = vpop.f32.mrf.mxu1  ;;  %v6341_v6 = vld [vmem:[%s11628_s1 + $0x440] sm:$0xff] }
 0x14f   : > { %2128 = vmatprep.subr.mxu0 %v11647_v0  ;;  %v1699_v56 = vpop.permute.xlu1 %1698  ;;  %1764 = vmatprep.subr.mxu1 %v11647_v0 }
 0x150   : > { %2129 = vmatpush1.msra.mxu0 %v9003_v35  ;;  %1765 = vmatpush2.msra.mxu1 %v1699_v56  ;;  %v1086_v5 = vpop.f32.mrf.mxu1  ;;  %v6329_v35 = vld [vmem:[%s11628_s1 + $0x3e0] sm:$0xff] }
 0x151   : > { %1426 = vmatmul.mubr.f32.gmra.mxu0 %v6323_v33  ;;  %2130 = vmatprep.subr.mxu0 %v11647_v0  ;;  %v2025_v58 = vpop.permute.xlu0 %2024  ;;  %v6343_v5 = vld [vmem:[%s11628_s1 + $0x450] sm:$0xff] }
 0x152   : > { %2131 = vmatpush1.msra.mxu0 %v9013_v37  ;;  %1430 = vmatprep.mubr.f32.mxu0 %v6326_v57  ;;  %v9116_v59 = vpop.f32.mrf.mxu1 }
 0x153   : > { %v1697_v60 = vpop.permute.xlu1 %1696  ;;  %2132 = vmatprep.subr.mxu0 %v11647_v0  ;;  %1766 = vmatprep.subr.mxu1 %v11647_v0 }
 0x154   : > { %2133 = vmatpush1.msra.mxu0 %v9023_v39  ;;  %1767 = vmatpush2.msra.mxu1 %v1697_v60  ;;  %v1091_v61 = vpop.f32.mrf.mxu1  ;;  %v6334_v39 = vld [vmem:[%s11628_s1 + $0x408] sm:$0xff] }
 0x155   : > { %1431 = vmatmul.mubr.f32.gmra.mxu0 %v6325_v15  ;;  %2134 = vmatprep.subr.mxu0 %v11647_v0  ;;  %v2023_v18 = vpop.permute.xlu0 %2022  ;;  %v6346_v15 = vld [vmem:[%s11628_s1 + $0x468] sm:$0xff] }
 0x156   : > { %1435 = vmatprep.mubr.f32.mxu0 %v6328_v8  ;;  %2135 = vmatpush1.msra.mxu0 %v9034_v42  ;;  %v9129_v63 = vpop.f32.mrf.mxu1  ;;  %v6333_v42 = vld [vmem:[%s11628_s1 + $0x400] sm:$0xff] }
 0x157   : > { %v1695_v7 = vpop.permute.xlu1 %1694  ;;  %2136 = vmatprep.subr.mxu0 %v11647_v0  ;;  %1768 = vmatprep.subr.mxu1 %v11647_v0 }
 0x158   : > { %2137 = vmatpush1.msra.mxu0 %v9045_v24  ;;  %1769 = vmatpush2.msra.mxu1 %v1695_v7  ;;  %v1096_v17 = vpop.f32.mrf.mxu1  ;;  %v6348_v7 = vld [vmem:[%s11628_s1 + $0x478] sm:$0xff] }
 0x159   : > { %1436 = vmatmul.mubr.f32.gmra.mxu0 %v6327_v62  ;;  %2138 = vmatprep.subr.mxu0 %v11647_v0  ;;  %v2085_v30 = vpop.permute.xlu0 %2084 }
 0x15a   : > { %1440 = vmatprep.mubr.f32.mxu0 %v6330_v29  ;;  %2139 = vmatpush1.msra.mxu0 %v9056_v48 }
 0x15b   : > { %v1693_v10 = vpop.permute.xlu1 %1692  ;;  %2140 = vmatprep.subr.mxu0 %v11647_v0  ;;  %1770 = vmatprep.subr.mxu1 %v11647_v0  ;;  %v9147_v20 = vpop.f32.mrf.mxu1 }
 0x15c   : > { %2141 = vmatpush1.msra.mxu0 %v9067_v25  ;;  %1771 = vmatpush2.msra.mxu1 %v1693_v10 }
 0x15d   : > { %1441 = vmatmul.mubr.f32.gmra.mxu0 %v6329_v35  ;;  %2142 = vmatprep.subr.mxu0 %v11647_v0  ;;  %v2083_v37 = vpop.permute.xlu0 %2082  ;;  %v1101_v38 = vpop.f32.mrf.mxu1  ;;  %v6347_v35 = vld [vmem:[%s11628_s1 + $0x470] sm:$0xff] }
 0x15e   : > { %1445 = vmatprep.mubr.f32.mxu0 %v6332_v36  ;;  %2143 = vmatpush1.msra.mxu0 %v9082_v53  ;;  %v6350_v36 = vld [vmem:[%s11628_s1 + $0x488] sm:$0xff] }
 0x15f   : > { %v1691_v19 = vpop.permute.xlu1 %1690  ;;  %2144 = vmatprep.subr.mxu0 %v11647_v0  ;;  %1772 = vmatprep.subr.mxu1 %v11647_v0  ;;  %v9160_v40 = vpop.f32.mrf.mxu1 }
 0x160   : > { %2145 = vmatpush1.msra.mxu0 %v9097_v32  ;;  %1773 = vmatpush2.msra.mxu1 %v1691_v19  ;;  %v6344_v32 = vld [vmem:[%s11628_s1 + $0x458] sm:$0xff]  ;;  %v6349_v19 = vld [vmem:[%s11628_s1 + $0x480] sm:$0xff] }
 0x161   : > { %1446 = vmatmul.mubr.f32.gmra.mxu0 %v6331_v9  ;;  %2146 = vmatprep.subr.mxu0 %v11647_v0  ;;  %v2081_v22 = vpop.permute.xlu0 %2080  ;;  %v1106_v12 = vpop.f32.mrf.mxu1 }
 0x162   : > { %1450 = vmatprep.mubr.f32.mxu0 %v6334_v39  ;;  %2147 = vmatpush1.msra.mxu0 %v2025_v58 }
 0x163   : > { %v1689_v1 = vpop.permute.xlu1 %1688  ;;  %2148 = vmatprep.subr.mxu0 %v11647_v0  ;;  %1774 = vmatprep.subr.mxu1 %v11647_v0  ;;  %v9172_v44 = vpop.f32.mrf.mxu1 }
 0x164   : > { %2149 = vmatpush1.msra.mxu0 %v2023_v18  ;;  %1775 = vmatpush2.msra.mxu1 %v1689_v1  ;;  %v6345_v18 = vld [vmem:[%s11628_s1 + $0x460] sm:$0xff] }
 0x165   : > { %1451 = vmatmul.mubr.f32.gmra.mxu0 %v6333_v42  ;;  %1776 = vmatprep.subr.mxu1 %v11647_v0  ;;  %v2079_v45 = vpop.permute.xlu0 %2078  ;;  %v1111_v24 = vpop.f32.mrf.mxu1 }
 0x166   : > { %1455 = vmatprep.mubr.f32.mxu0 %v6336_v21  ;;  %2150 = vmatprep.subr.mxu0 %v11647_v0  ;;  %v6351_v21 = vld [vmem:[%s11628_s1 + $0x490] sm:$0xff]  ;;  %v6354_v24 = vld [vmem:[%s11628_s1 + $0x4a8] sm:$0xff] }
 0x167   : > { %v1687_v3 = vpop.permute.xlu1 %1686  ;;  %2151 = vmatpush2.msra.mxu0 %v2085_v30  ;;  %v9182_v47 = vpop.f32.mrf.mxu1 }
 0x168   : > { %1777 = vmatpush2.msra.mxu1 %v1687_v3  ;;  %2152 = vmatprep.subr.mxu0 %v11647_v0 }
 0x169   : > { %1456 = vmatmul.mubr.f32.gmra.mxu0 %v6335_v11  ;;  %1778 = vmatprep.subr.mxu1 %v11647_v0  ;;  %v2077_v48 = vpop.permute.xlu0 %2076  ;;  %v1116_v2 = vpop.f32.mrf.mxu1 }
 0x16a   : > { %1460 = vmatprep.mubr.f32.mxu0 %v6338_v23  ;;  %2153 = vmatpush2.msra.mxu0 %v2083_v37  ;;  %v6353_v23 = vld [vmem:[%s11628_s1 + $0x4a0] sm:$0xff] }
 0x16b   : > { %v1685_v14 = vpop.permute.xlu1 %1684  ;;  %2154 = vmatprep.subr.mxu0 %v11647_v0  ;;  %v9193_v25 = vpop.f32.mrf.mxu1 }
 0x16c   : > { %1779 = vmatpush2.msra.mxu1 %v1685_v14  ;;  %2155 = vmatpush2.msra.mxu0 %v2081_v22  ;;  %v6352_v22 = vld [vmem:[%s11628_s1 + $0x498] sm:$0xff] }
 0x16d   : > { %1461 = vmatmul.mubr.f32.gmra.mxu0 %v6337_v26  ;;  %1780 = vmatprep.subr.mxu1 %v11647_v0  ;;  %v2075_v51 = vpop.permute.xlu0 %2074  ;;  %v1121_v4 = vpop.f32.mrf.mxu1  ;;  %v6356_v14 = vld [vmem:[%s11628_s1 + $0x4b8] sm:$0xff] }
 0x16e   : > { %1465 = vmatprep.mubr.f32.mxu0 %v6340_v50  ;;  %2156 = vmatprep.subr.mxu0 %v11647_v0  ;;  %v6376_v50 = vld [vmem:[%s11628_s1 + $0x558] sm:$0xff] }
 0x16f   : > { %v1683_v28 = vpop.permute.xlu1 %1682  ;;  %2157 = vmatpush2.msra.mxu0 %v2079_v45  ;;  %v9203_v53 = vpop.f32.mrf.mxu1 }
 0x170   : > { %1781 = vmatpush2.msra.mxu1 %v1683_v28  ;;  %2158 = vmatprep.subr.mxu0 %v11647_v0  ;;  %v6375_v28 = vld [vmem:[%s11628_s1 + $0x550] sm:$0xff] }
 0x171   : > { %1466 = vmatmul.mubr.f32.gmra.mxu0 %v6339_v13  ;;  %1782 = vmatprep.subr.mxu1 %v11647_v0  ;;  %v2073_v54 = vpop.permute.xlu0 %2072  ;;  %v1126_v34 = vpop.f32.mrf.mxu1  ;;  %v6355_v13 = vld [vmem:[%s11628_s1 + $0x4b0] sm:$0xff] }
 0x172   : > { %1470 = vmatprep.mubr.f32.mxu0 %v6342_v31  ;;  %2159 = vmatpush2.msra.mxu0 %v2077_v48  ;;  %v6373_v48 = vld [vmem:[%s11628_s1 + $0x540] sm:$0xff]  ;;  %v6358_v31 = vld [vmem:[%s11628_s1 + $0x4c8] sm:$0xff] }
 0x173   : > { %v1681_v55 = vpop.permute.xlu1 %1680  ;;  %2160 = vmatprep.subr.mxu0 %v11647_v0  ;;  %v9214_v33 = vpop.f32.mrf.mxu1 }
 0x174   : > { %1783 = vmatpush2.msra.mxu1 %v1681_v55  ;;  %2161 = vmatpush2.msra.mxu0 %v2075_v51 }
 0x175   : > { %1471 = vmatmul.mubr.f32.gmra.mxu0 %v6341_v6  ;;  %1784 = vmatprep.subr.mxu1 %v11647_v0  ;;  %v2071_v56 = vpop.permute.xlu0 %2070  ;;  %v1131_v57 = vpop.f32.mrf.mxu1 }
 0x176   : > { %1475 = vmatprep.mubr.f32.mxu0 %v6344_v32  ;;  %2162 = vmatprep.subr.mxu0 %v11647_v0  ;;  %v6357_v32 = vld [vmem:[%s11628_s1 + $0x4c0] sm:$0xff]  ;;  %v6360_v57 = vld [vmem:[%s11628_s1 + $0x4d8] sm:$0xff] }
 0x177   : > { %v1679_v58 = vpop.permute.xlu1 %1678  ;;  %2163 = vmatpush2.msra.mxu0 %v2073_v54  ;;  %v9224_v60 = vpop.f32.mrf.mxu1  ;;  %v6378_v54 = vld [vmem:[%s11628_s1 + $0x568] sm:$0xff] }
 0x178   : > { %1785 = vmatpush2.msra.mxu1 %v1679_v58  ;;  %2164 = vmatprep.subr.mxu0 %v11647_v0 }
 0x179   : > { %1476 = vmatmul.mubr.f32.gmra.mxu0 %v6343_v5  ;;  %1786 = vmatprep.subr.mxu1 %v11647_v0  ;;  %v2069_v8 = vpop.permute.xlu0 %2068  ;;  %v1136_v61 = vpop.f32.mrf.mxu1  ;;  %v6380_v5 = vld [vmem:[%s11628_s1 + $0x578] sm:$0xff] }
 0x17a   : > { %1480 = vmatprep.mubr.f32.mxu0 %v6346_v15  ;;  %2165 = vmatpush2.msra.mxu0 %v2071_v56  ;;  %v6377_v56 = vld [vmem:[%s11628_s1 + $0x560] sm:$0xff]  ;;  %v6359_v61 = vld [vmem:[%s11628_s1 + $0x4d0] sm:$0xff] }
 0x17b   : > { %v1677_v62 = vpop.permute.xlu1 %1676  ;;  %2166 = vmatprep.subr.mxu0 %v11647_v0  ;;  %v9235_v29 = vpop.f32.mrf.mxu1 }
 0x17c   : > { %1787 = vmatpush2.msra.mxu1 %v1677_v62  ;;  %2167 = vmatpush2.msra.mxu0 %v2069_v8 }
 0x17d   : > { %1481 = vmatmul.mubr.f32.gmra.mxu0 %v6345_v18  ;;  %1788 = vmatprep.subr.mxu1 %v11647_v0  ;;  %v2067_v17 = vpop.permute.xlu0 %2066  ;;  %v1141_v30 = vpop.f32.mrf.mxu1  ;;  %v6379_v18 = vld [vmem:[%s11628_s1 + $0x570] sm:$0xff] }
 0x17e   : > { %1485 = vmatprep.mubr.f32.mxu0 %v6348_v7  ;;  %2168 = vmatprep.subr.mxu0 %v11647_v0  ;;  %v6382_v30 = vld [vmem:[%s11628_s1 + $0x588] sm:$0xff] }
 0x17f   : > { %v1675_v10 = vpop.permute.xlu1 %1674  ;;  %2169 = vmatpush2.msra.mxu0 %v2067_v17  ;;  %v9245_v37 = vpop.f32.mrf.mxu1  ;;  %v6362_v17 = vld [vmem:[%s11628_s1 + $0x4e8] sm:$0xff] }
 0x180   : > { %1789 = vmatpush2.msra.mxu1 %v1675_v10  ;;  %2170 = vmatprep.subr.mxu0 %v11647_v0 }
 0x181   : > { %1486 = vmatmul.mubr.f32.gmra.mxu0 %v6347_v35  ;;  %1790 = vmatprep.subr.mxu1 %v11647_v0  ;;  %v2065_v38 = vpop.permute.xlu0 %2064  ;;  %v1146_v9 = vpop.f32.mrf.mxu1 }
 0x182   : > { %1490 = vmatprep.mubr.f32.mxu0 %v6350_v36  ;;  %2171 = vmatpush2.msra.mxu0 %v2065_v38  ;;  %v6361_v38 = vld [vmem:[%s11628_s1 + $0x4e0] sm:$0xff] }
 0x183   : > { %v1673_v39 = vpop.permute.xlu1 %1672  ;;  %2172 = vmatprep.subr.mxu0 %v11647_v0  ;;  %v9256_v12 = vpop.f32.mrf.mxu1  ;;  %v6381_v9 = vld [vmem:[%s11628_s1 + $0x580] sm:$0xff] }
 0x184   : > { %1791 = vmatpush2.msra.mxu1 %v1673_v39 }
 0x185   : > { %1491 = vmatmul.mubr.f32.gmra.mxu0 %v6349_v19  ;;  %1792 = vmatprep.subr.mxu1 %v11647_v0  ;;  %v2063_v42 = vpop.permute.xlu0 %2062  ;;  %v1151_v1 = vpop.f32.mrf.mxu1 }
 0x186   : > { %1495 = vmatprep.mubr.f32.mxu0 %v6352_v22  ;;  %2173 = vmatpush2.msra.mxu0 %v2063_v42  ;;  %v6364_v22 = vld [vmem:[%s11628_s1 + $0x4f8] sm:$0xff] }
 0x187   : > { %v1671_v45 = vpop.permute.xlu1 %1670  ;;  %2174 = vmatprep.subr.mxu0 %v11647_v0  ;;  %v9266_v11 = vpop.f32.mrf.mxu1  ;;  %v6384_v42 = vld [vmem:[%s11628_s1 + $0x598] sm:$0xff] }
 0x188   : > { %1793 = vmatpush2.msra.mxu1 %v1671_v45  ;;  %v6383_v45 = vld [vmem:[%s11628_s1 + $0x590] sm:$0xff] }
 0x189   : > { %1496 = vmatmul.mubr.f32.gmra.mxu0 %v6351_v21  ;;  %1794 = vmatprep.subr.mxu1 %v11647_v0  ;;  %v1156_v3 = vpop.f32.mrf.mxu1  ;;  %v6363_v21 = vld [vmem:[%s11628_s1 + $0x4f0] sm:$0xff] }
 0x18a   : > { %1500 = vmatprep.mubr.f32.mxu0 %v6354_v24  ;;  %v2061_v2 = vpop.permute.xlu0 %2060  ;;  %v6366_v3 = vld [vmem:[%s11628_s1 + $0x508] sm:$0xff] }
 0x18b   : > { %v1669_v26 = vpop.permute.xlu1 %1668  ;;  %2175 = vmatpush2.msra.mxu0 %v2061_v2  ;;  %v9281_v51 = vpop.f32.mrf.mxu1 }
 0x18c   : > { %1795 = vmatpush2.msra.mxu1 %v1669_v26  ;;  %2176 = vmatprep.subr.mxu0 %v11647_v0  ;;  %v6365_v26 = vld [vmem:[%s11628_s1 + $0x500] sm:$0xff] }
 0x18d   : > { %1501 = vmatmul.mubr.f32.gmra.mxu0 %v6353_v23  ;;  %1797 = vmatmul.mubr.f32.vlgmr.msra.gmra.mxu1 %v6373_v48  ;;  %v1161_v4 = vpop.f32.mrf.mxu1  ;;  %v6386_v23 = vld [vmem:[%s11628_s1 + $0x5a8] sm:$0xff] }
 0x18e   : > { %1505 = vmatprep.mubr.f32.mxu0 %v6356_v14  ;;  %1801 = vmatprep.mubr.f32.mxu1 %v6376_v50  ;;  %v6385_v14 = vld [vmem:[%s11628_s1 + $0x5a0] sm:$0xff] }
 0x18f   : > { %v9296_v34 = vpop.f32.mrf.mxu1 }
 0x191   : > { %1506 = vmatmul.mubr.f32.gmra.mxu0 %v6355_v13  ;;  %1802 = vmatmul.mubr.f32.gmra.mxu1 %v6375_v28  ;;  %v2059_v6 = vpop.permute.xlu0 %2058  ;;  %v1166_v55 = vpop.f32.mrf.mxu1  ;;  %v6368_v13 = vld [vmem:[%s11628_s1 + $0x518] sm:$0xff] }
 0x192   : > { %1510 = vmatprep.mubr.f32.mxu0 %v6358_v31  ;;  %1806 = vmatprep.mubr.f32.mxu1 %v6378_v54  ;;  %v6388_v28 = vld [vmem:[%s11628_s1 + $0x5b8] sm:$0xff]  ;;  %v6367_v54 = vld [vmem:[%s11628_s1 + $0x510] sm:$0xff] }
 0x193   : > { %2177 = vmatpush2.msra.mxu0 %v2059_v6  ;;  %v9310_v58 = vpop.f32.mrf.mxu1  ;;  %v6387_v6 = vld [vmem:[%s11628_s1 + $0x5b0] sm:$0xff] }
 0x194   : > { %2178 = vmatprep.subr.mxu0 %v11647_v0 }
 0x195   : > { %v9313_v15 = vpop.f32.mrf.mxu0  ;;  %1511 = vmatmul.mubr.f32.gmra.mxu0 %v6357_v32  ;;  %1807 = vmatmul.mubr.f32.gmra.mxu1 %v6377_v56  ;;  %v1171_v8 = vpop.f32.mrf.mxu1  ;;  %v6370_v32 = vld [vmem:[%s11628_s1 + $0x528] sm:$0xff] }
 0x196   : > { %1515 = vmatprep.mubr.f32.mxu0 %v6360_v57  ;;  %1811 = vmatprep.mubr.f32.mxu1 %v6380_v5  ;;  %v2057_v62 = vpop.permute.xlu0 %2056  ;;  %v6390_v56 = vld [vmem:[%s11628_s1 + $0x5c8] sm:$0xff]  ;;  %v6369_v8 = vld [vmem:[%s11628_s1 + $0x520] sm:$0xff] }
 0x197   : > { %v851_v7 = vpop.f32.mrf.mxu0  ;;  %2179 = vmatpush2.msra.mxu0 %v2057_v62 }
 0x198   : > { %2180 = vmatprep.subr.mxu0 %v11647_v0  ;;  %v9328_v35 = vpop.f32.mrf.mxu1  ;;  %v6372_v7 = vld [vmem:[%s11628_s1 + $0x538] sm:$0xff] }
 0x199   : > { %v9330_v10 = vpop.f32.mrf.mxu0  ;;  %1516 = vmatmul.mubr.f32.gmra.mxu0 %v6359_v61  ;;  %1812 = vmatmul.mubr.f32.gmra.mxu1 %v6379_v18  ;;  %v2055_v36 = vpop.permute.xlu1 %2054  ;;  %v6389_v61 = vld [vmem:[%s11628_s1 + $0x5c0] sm:$0xff] }
 0x19a   : > { %1520 = vmatprep.mubr.f32.mxu0 %v6362_v17  ;;  %1816 = vmatprep.mubr.f32.mxu1 %v6382_v30  ;;  %v1176_v19 = vpop.f32.mrf.mxu1  ;;  %v6392_v17 = vld [vmem:[%s11628_s1 + $0x5d8] sm:$0xff] }
 0x19b   : > { %v856_v39 = vpop.f32.mrf.mxu0  ;;  %2181 = vmatpush2.msra.mxu0 %v2055_v36  ;;  %v6371_v36 = vld [vmem:[%s11628_s1 + $0x530] sm:$0xff]  ;;  %v6394_v19 = vld [vmem:[%s11628_s1 + $0x5e8] sm:$0xff] }
 0x19c   : > { %v6430_v39 = vld [vmem:[%s11628_s1 + $0x708] sm:$0xff] }
 0x19d   : > { %v9344_v1 = vpop.f32.mrf.mxu0  ;;  %1521 = vmatmul.mubr.f32.gmra.mxu0 %v6361_v38  ;;  %1817 = vmatmul.mubr.f32.gmra.mxu1 %v6381_v9  ;;  %v6391_v38 = vld [vmem:[%s11628_s1 + $0x5d0] sm:$0xff] }
 0x19e   : > { %1525 = vmatprep.mubr.f32.mxu0 %v6364_v22  ;;  %1821 = vmatprep.mubr.f32.mxu1 %v6384_v42 }
 0x19f   : > { %v861_v24 = vpop.f32.mrf.mxu0 }
 0x1a0   : > { %v9358_v48 = vpop.f32.mrf.mxu1 }
 0x1a1   : > { %v9360_v2 = vpop.f32.mrf.mxu0  ;;  %1526 = vmatmul.mubr.f32.gmra.mxu0 %v6363_v21  ;;  %1822 = vmatmul.mubr.f32.gmra.mxu1 %v6383_v45  ;;  %v6393_v21 = vld [vmem:[%s11628_s1 + $0x5e0] sm:$0xff] }
 0x1a2   : > { %1530 = vmatprep.mubr.f32.mxu0 %v6366_v3  ;;  %1826 = vmatprep.mubr.f32.mxu1 %v6386_v23  ;;  %v1181_v50 = vpop.f32.mrf.mxu1  ;;  %v6429_v45 = vld [vmem:[%s11628_s1 + $0x700] sm:$0xff]  ;;  %v6396_v23 = vld [vmem:[%s11628_s1 + $0x5f8] sm:$0xff] }
 0x1a3   : > { %v866_v4 = vpop.f32.mrf.mxu0 }
 0x1a4   : > { %v6395_v4 = vld [vmem:[%s11628_s1 + $0x5f0] sm:$0xff] }
 0x1a5   : > { %v9374_v31 = vpop.f32.mrf.mxu0  ;;  %1531 = vmatmul.mubr.f32.gmra.mxu0 %v6365_v26  ;;  %1827 = vmatmul.mubr.f32.gmra.mxu1 %v6385_v14  ;;  %v6432_v26 = vld [vmem:[%s11628_s1 + $0x718] sm:$0xff]  ;;  %v8062_v14 = vmov 0  }
 0x1a6   : > { %1535 = vmatprep.mubr.f32.mxu0 %v6368_v13  ;;  %1831 = vmatprep.mubr.f32.mxu1 %v6388_v28  ;;  %v6431_v13 = vld [vmem:[%s11628_s1 + $0x710] sm:$0xff]  ;;  %v2365_v28 = vld [vmem:[%s11629_s2] sm:$0xff] }
 0x1a7   : > { %v871_v55 = vpop.f32.mrf.mxu0  ;;  %8011 = vset.pattern.permute.xlu0 %v8062_v14  ;;  %8012 = vset.pattern.permute.xlu1 %v8062_v14  ;;  %v6437_v14 = vld [vmem:[%s11628_s1 + $0x740] sm:$0xff] }
 0x1a8   : > { %v9388_v57 = vpop.f32.mrf.mxu1  ;;  %v6434_v55 = vld [vmem:[%s11628_s1 + $0x728] sm:$0xff]  ;;  %2381 = vperm.xlu0 %8011, %v2365_v28   ;;  %v6440_v28 = vld [vmem:[%s11628_s1 + $0x758] sm:$0xff] }
 0x1a9   : > { %v9390_v5 = vpop.f32.mrf.mxu0  ;;  %1536 = vmatmul.mubr.f32.gmra.mxu0 %v6367_v54  ;;  %1832 = vmatmul.mubr.f32.gmra.mxu1 %v6387_v6  ;;  %v6398_v6 = vld [vmem:[%s11628_s1 + $0x608] sm:$0xff] }
 0x1aa   : > { %1540 = vmatprep.mubr.f32.mxu0 %v6370_v32  ;;  %1836 = vmatprep.mubr.f32.mxu1 %v6390_v56  ;;  %v1186_v18 = vpop.f32.mrf.mxu1  ;;  %v2366_v32 = vld [vmem:[%s11629_s2 + $0x8] sm:$0xff] }
 0x1ab   : > { %v876_v62 = vpop.f32.mrf.mxu0  ;;  %2386 = vperm.xlu1 %8012, %v2366_v32   ;;  %v6400_v18 = vld [vmem:[%s11628_s1 + $0x618] sm:$0xff]  ;;  %v6403_v32 = vld [vmem:[%s11628_s1 + $0x630] sm:$0xff] }
 0x1ad   : > { %v9404_v30 = vpop.f32.mrf.mxu0  ;;  %1541 = vmatmul.mubr.f32.gmra.mxu0 %v6369_v8  ;;  %1837 = vmatmul.mubr.f32.gmra.mxu1 %v6389_v61  ;;  %v6397_v8 = vld [vmem:[%s11628_s1 + $0x600] sm:$0xff] }
 0x1ae   : > { %1545 = vmatprep.mubr.f32.mxu0 %v6372_v7  ;;  %1841 = vmatprep.mubr.f32.mxu1 %v6392_v17  ;;  %v6433_v61 = vld [vmem:[%s11628_s1 + $0x720] sm:$0xff]  ;;  %v6436_v7 = vld [vmem:[%s11628_s1 + $0x738] sm:$0xff] }
 0x1af   : > { %v881_v9 = vpop.f32.mrf.mxu0  ;;  %v2368_v17 = vld [vmem:[%s11629_s2 + $0x18] sm:$0xff] }
 0x1b0   : > { %v9418_v22 = vpop.f32.mrf.mxu1  ;;  %2396 = vperm.xlu0 %8011, %v2368_v17   ;;  %v6399_v9 = vld [vmem:[%s11628_s1 + $0x610] sm:$0xff]  ;;  %v2373_v17 = vld [vmem:[%s11629_s2 + $0x40] sm:$0xff] }
 0x1b1   : > { %11651 = vst [vmem:[#allocation5_spill] sm:$0xff] %v9418_v22  ;;  %v9420_v42 = vpop.f32.mrf.mxu0  ;;  %1546 = vmatmul.mubr.f32.gmra.mxu0 %v6371_v36  ;;  %1842 = vmatmul.mubr.f32.gmra.mxu1 %v6391_v38  ;;  %v2367_v36 = vld [vmem:[%s11629_s2 + $0x10] sm:$0xff]  ;;  %v1060_v22 = vadd.f32 %v9040_v43, %v9330_v10 }
 0x1b2   : > { %1846 = vmatprep.mubr.f32.mxu1 %v6394_v19  ;;  %2182 = vmatprep.mubr.f32.mxu0 %v6430_v39  ;;  %v1191_v24 = vpop.f32.mrf.mxu1  ;;  %v6435_v19 = vld [vmem:[%s11628_s1 + $0x730] sm:$0xff]  ;;  %v6402_v39 = vld [vmem:[%s11628_s1 + $0x628] sm:$0xff] }
 0x1b3   : > { %v886_v3 = vpop.f32.mrf.mxu0  ;;  %2391 = vperm.xlu1 %8012, %v2367_v36   ;;  %v2370_v24 = vld [vmem:[%s11629_s2 + $0x28] sm:$0xff]  ;;  %v6475_v10 = vld [vmem:[%s11628_s1 + $0x870] sm:$0xff] }
 0x1b4   : > { %v2369_v3 = vld [vmem:[%s11629_s2 + $0x20] sm:$0xff]  ;;  %2406 = vperm.xlu0 %8011, %v2370_v24   ;;  %v2376_v24 = vld [vmem:[%s11629_s2 + $0x58] sm:$0xff] }
 0x1b5   : > { %v9434_v50 = vpop.f32.mrf.mxu0  ;;  %1847 = vmatmul.mubr.f32.gmra.mxu1 %v6393_v21  ;;  %2183 = vmatmul.mubr.f32.vlgmr.msra.gmra.mxu0 %v6429_v45  ;;  %v6438_v45 = vld [vmem:[%s11628_s1 + $0x748] sm:$0xff] }
 0x1b6   : > { %1851 = vmatprep.mubr.f32.mxu1 %v6396_v23  ;;  %2187 = vmatprep.mubr.f32.mxu0 %v6432_v26  ;;  %v6401_v26 = vld [vmem:[%s11628_s1 + $0x620] sm:$0xff] }
 0x1b7   : > { %v891_v54 = vpop.f32.mrf.mxu0  ;;  %2401 = vperm.xlu1 %8012, %v2369_v3   ;;  %v2375_v3 = vld [vmem:[%s11629_s2 + $0x50] sm:$0xff] }
 0x1b8   : > { %v2372_v54 = vld [vmem:[%s11629_s2 + $0x38] sm:$0xff] }
 0x1b9   : > { %v9454_v56 = vpop.f32.mrf.mxu0  ;;  %1852 = vmatmul.mubr.f32.gmra.mxu1 %v6395_v4  ;;  %2188 = vmatmul.mubr.f32.gmra.mxu0 %v6431_v13  ;;  %v6404_v4 = vld [vmem:[%s11628_s1 + $0x638] sm:$0xff] }
 0x1ba   : > { %1856 = vmatprep.mubr.f32.mxu1 %v6398_v6  ;;  %2192 = vmatprep.mubr.f32.mxu0 %v6434_v55  ;;  %v2371_v6 = vld [vmem:[%s11629_s2 + $0x30] sm:$0xff] }
 0x1bb   : > { %v896_v62 = vpop.f32.mrf.mxu0  ;;  %2416 = vperm.xlu0 %8011, %v2372_v54   ;;  %2411 = vperm.xlu1 %8012, %v2371_v6   ;;  %v6446_v54 = vld [vmem:[%s11628_s1 + $0x788] sm:$0xff] }
 0x1bc   : > { %v6442_v62 = vld [vmem:[%s11628_s1 + $0x768] sm:$0xff] }
 0x1bd   : > { %v9474_v38 = vpop.f32.mrf.mxu0  ;;  %1857 = vmatmul.mubr.f32.gmra.mxu1 %v6397_v8  ;;  %2193 = vmatmul.mubr.f32.gmra.mxu0 %v6433_v61  ;;  %v6439_v8 = vld [vmem:[%s11628_s1 + $0x750] sm:$0xff]  ;;  %v6406_v61 = vld [vmem:[%s11628_s1 + $0x648] sm:$0xff] }
 0x1be   : > { %1861 = vmatprep.mubr.f32.mxu1 %v6400_v18  ;;  %2197 = vmatprep.mubr.f32.mxu0 %v6436_v7  ;;  %v2374_v7 = vld [vmem:[%s11629_s2 + $0x48] sm:$0xff] }
 0x1bf   : > { %v901_v21 = vpop.f32.mrf.mxu0  ;;  %2426 = vperm.xlu0 %8011, %v2374_v7   ;;  %2421 = vperm.xlu1 %8012, %v2373_v17   ;;  %v2378_v6 = vld [vmem:[%s11629_s2 + $0x68] sm:$0xff]  ;;  %v6412_v7 = vld [vmem:[%s11628_s1 + $0x678] sm:$0xff] }
 0x1c0   : > { %v6448_v17 = vld [vmem:[%s11628_s1 + $0x798] sm:$0xff] }
 0x1c1   : > { %v9494_v23 = vpop.f32.mrf.mxu0  ;;  %1862 = vmatmul.mubr.f32.gmra.mxu1 %v6399_v9  ;;  %2198 = vmatmul.mubr.f32.gmra.mxu0 %v6435_v19  ;;  %v6405_v9 = vld [vmem:[%s11628_s1 + $0x640] sm:$0xff] }
 0x1c2   : > { %1866 = vmatprep.mubr.f32.mxu1 %v6402_v39  ;;  %2202 = vmatprep.mubr.f32.mxu0 %v6438_v45  ;;  %v6441_v19 = vld [vmem:[%s11628_s1 + $0x760] sm:$0xff]  ;;  %v6408_v39 = vld [vmem:[%s11628_s1 + $0x658] sm:$0xff] }
 0x1c3   : > { %v906_v13 = vpop.f32.mrf.mxu0  ;;  %v6444_v45 = vld [vmem:[%s11628_s1 + $0x778] sm:$0xff]  ;;  %2436 = vperm.xlu0 %8011, %v2376_v24   ;;  %2431 = vperm.xlu1 %8012, %v2375_v3   ;;  %v6450_v24 = vld [vmem:[%s11628_s1 + $0x7a8] sm:$0xff] }
 0x1c4   : > { %v6410_v13 = vld [vmem:[%s11628_s1 + $0x668] sm:$0xff] }
 0x1c5   : > { %v9514_v55 = vpop.f32.mrf.mxu0  ;;  %1867 = vmatmul.mubr.f32.gmra.mxu1 %v6401_v26  ;;  %2203 = vmatmul.mubr.f32.gmra.mxu0 %v6437_v14  ;;  %v6407_v14 = vld [vmem:[%s11628_s1 + $0x650] sm:$0xff] }
 0x1c6   : > { %1871 = vmatprep.mubr.f32.mxu1 %v6404_v4  ;;  %2207 = vmatprep.mubr.f32.mxu0 %v6440_v28  ;;  %v6443_v4 = vld [vmem:[%s11628_s1 + $0x770] sm:$0xff] }
 0x1c7   : > { %v911_v18 = vpop.f32.mrf.mxu0  ;;  %2446 = vperm.xlu0 %8011, %v2378_v6  }
 0x1c8   : > { %v6445_v18 = vld [vmem:[%s11628_s1 + $0x780] sm:$0xff] }
 0x1c9   : > { %v9534_v36 = vpop.f32.mrf.mxu0  ;;  %1872 = vmatmul.mubr.f32.gmra.mxu1 %v6403_v32  ;;  %2208 = vmatmul.mubr.f32.gmra.mxu0 %v6439_v8  ;;  %v2377_v32 = vld [vmem:[%s11629_s2 + $0x60] sm:$0xff] }
 0x1ca   : > { %1876 = vmatprep.mubr.f32.mxu1 %v6406_v61  ;;  %2212 = vmatprep.mubr.f32.mxu0 %v6442_v62  ;;  %v6409_v61 = vld [vmem:[%s11628_s1 + $0x660] sm:$0xff] }
 0x1cb   : > { %v916_v21 = vpop.f32.mrf.mxu0  ;;  %2441 = vperm.xlu1 %8012, %v2377_v32   ;;  %v6415_v32 = vld [vmem:[%s11628_s1 + $0x690] sm:$0xff] }
 0x1cd   : > { %v9554_v26 = vpop.f32.mrf.mxu0  ;;  %1877 = vmatmul.mubr.f32.gmra.mxu1 %v6405_v9  ;;  %2213 = vmatmul.mubr.f32.gmra.mxu0 %v6441_v19  ;;  %v6411_v19 = vld [vmem:[%s11628_s1 + $0x670] sm:$0xff] }
 0x1ce   : > { %1881 = vmatprep.mubr.f32.mxu1 %v6408_v39  ;;  %2217 = vmatprep.mubr.f32.mxu0 %v6444_v45  ;;  %v6447_v39 = vld [vmem:[%s11628_s1 + $0x790] sm:$0xff]  ;;  %v6414_v45 = vld [vmem:[%s11628_s1 + $0x688] sm:$0xff] }
 0x1cf   : > { %v921_v28 = vpop.f32.mrf.mxu0 }
 0x1d0   : > { %v6416_v28 = vld [vmem:[%s11628_s1 + $0x698] sm:$0xff] }
 0x1d1   : > { %v9574_v8 = vpop.f32.mrf.mxu0  ;;  %1882 = vmatmul.mubr.f32.gmra.mxu1 %v6407_v14  ;;  %2218 = vmatmul.mubr.f32.gmra.mxu0 %v6443_v4  ;;  %v6413_v14 = vld [vmem:[%s11628_s1 + $0x680] sm:$0xff] }
 0x1d2   : > { %1886 = vmatprep.mubr.f32.mxu1 %v6410_v13  ;;  %2222 = vmatprep.mubr.f32.mxu0 %v6446_v54  ;;  %v6449_v4 = vld [vmem:[%s11628_s1 + $0x7a0] sm:$0xff]  ;;  %v6452_v54 = vld [vmem:[%s11628_s1 + $0x7b8] sm:$0xff] }
 0x1d3   : > { %v926_v62 = vpop.f32.mrf.mxu0 }
 0x1d4   : > { %v6418_v62 = vld [vmem:[%s11628_s1 + $0x6a8] sm:$0xff] }
 0x1d5   : > { %v9588_v9 = vpop.f32.mrf.mxu0  ;;  %1887 = vmatmul.mubr.f32.gmra.mxu1 %v6409_v61  ;;  %2223 = vmatmul.mubr.f32.gmra.mxu0 %v6445_v18  ;;  %v6451_v61 = vld [vmem:[%s11628_s1 + $0x7b0] sm:$0xff] }
 0x1d6   : > { %1891 = vmatprep.mubr.f32.mxu1 %v6412_v7  ;;  %2227 = vmatprep.mubr.f32.mxu0 %v6448_v17  ;;  %v6454_v7 = vld [vmem:[%s11628_s1 + $0x7c8] sm:$0xff] }
 0x1d7   : > { %v931_v21 = vpop.f32.mrf.mxu0 }
 0x1d9   : > { %v9602_v3 = vpop.f32.mrf.mxu0  ;;  %1892 = vmatmul.mubr.f32.gmra.mxu1 %v6411_v19  ;;  %2228 = vmatmul.mubr.f32.gmra.mxu0 %v6447_v39  ;;  %v6417_v19 = vld [vmem:[%s11628_s1 + $0x6a0] sm:$0xff] }
 0x1da   : > { %1896 = vmatprep.mubr.f32.mxu1 %v6414_v45  ;;  %2232 = vmatprep.mubr.f32.mxu0 %v6450_v24  ;;  %v6453_v39 = vld [vmem:[%s11628_s1 + $0x7c0] sm:$0xff]  ;;  %v6420_v45 = vld [vmem:[%s11628_s1 + $0x6b8] sm:$0xff] }
 0x1db   : > { %v936_v13 = vpop.f32.mrf.mxu0  ;;  %v6456_v24 = vld [vmem:[%s11628_s1 + $0x7d8] sm:$0xff] }
 0x1dc   : > { %v6455_v13 = vld [vmem:[%s11628_s1 + $0x7d0] sm:$0xff] }
 0x1dd   : > { %v9616_v6 = vpop.f32.mrf.mxu0  ;;  %1897 = vmatmul.mubr.f32.gmra.mxu1 %v6413_v14  ;;  %2233 = vmatmul.mubr.f32.gmra.mxu0 %v6449_v4  ;;  %v6419_v4 = vld [vmem:[%s11628_s1 + $0x6b0] sm:$0xff] }
 0x1de   : > { %1901 = vmatprep.mubr.f32.mxu1 %v6416_v28  ;;  %2237 = vmatprep.mubr.f32.mxu0 %v6452_v54  ;;  %v6422_v54 = vld [vmem:[%s11628_s1 + $0x6c8] sm:$0xff] }
 0x1df   : > { %v941_v18 = vpop.f32.mrf.mxu0 }
 0x1e0   : > { %v6421_v18 = vld [vmem:[%s11628_s1 + $0x6c0] sm:$0xff] }
 0x1e1   : > { %v9630_v17 = vpop.f32.mrf.mxu0  ;;  %1902 = vmatmul.mubr.f32.gmra.mxu1 %v6415_v32  ;;  %2238 = vmatmul.mubr.f32.gmra.mxu0 %v6451_v61  ;;  %v6458_v32 = vld [vmem:[%s11628_s1 + $0x7e8] sm:$0xff] }
 0x1e2   : > { %1906 = vmatprep.mubr.f32.mxu1 %v6418_v62  ;;  %2242 = vmatprep.mubr.f32.mxu0 %v6454_v7  ;;  %v6457_v62 = vld [vmem:[%s11628_s1 + $0x7e0] sm:$0xff] }
 0x1e3   : > { %v946_v21 = vpop.f32.mrf.mxu0 }
 0x1e5   : > { %v9644_v14 = vpop.f32.mrf.mxu0  ;;  %1907 = vmatmul.mubr.f32.gmra.mxu1 %v6417_v19  ;;  %2243 = vmatmul.mubr.f32.gmra.mxu0 %v6453_v39  ;;  %v6424_v19 = vld [vmem:[%s11628_s1 + $0x6d8] sm:$0xff] }
 0x1e6   : > { %1911 = vmatprep.mubr.f32.mxu1 %v6420_v45  ;;  %2247 = vmatprep.mubr.f32.mxu0 %v6456_v24  ;;  %v6460_v39 = vld [vmem:[%s11628_s1 + $0x7f8] sm:$0xff]  ;;  %v6423_v45 = vld [vmem:[%s11628_s1 + $0x6d0] sm:$0xff] }
 0x1e7   : > { %v951_v28 = vpop.f32.mrf.mxu0  ;;  %v6459_v24 = vld [vmem:[%s11628_s1 + $0x7f0] sm:$0xff] }
 0x1e8   : > { %v6462_v28 = vld [vmem:[%s11628_s1 + $0x808] sm:$0xff] }
 0x1e9   : > { %v9658_v61 = vpop.f32.mrf.mxu0  ;;  %1912 = vmatmul.mubr.f32.gmra.mxu1 %v6419_v4  ;;  %2248 = vmatmul.mubr.f32.gmra.mxu0 %v6455_v13  ;;  %v6426_v13 = vld [vmem:[%s11628_s1 + $0x6e8] sm:$0xff] }
 0x1ea   : > { %1916 = vmatprep.mubr.f32.mxu1 %v6422_v54  ;;  %2252 = vmatprep.mubr.f32.mxu0 %v6458_v32  ;;  %v6425_v32 = vld [vmem:[%s11628_s1 + $0x6e0] sm:$0xff] }
 0x1eb   : > { %v956_v7 = vpop.f32.mrf.mxu0 }
 0x1ec   : > { %v6428_v7 = vld [vmem:[%s11628_s1 + $0x6f8] sm:$0xff] }
 0x1ed   : > { %v9672_v21 = vpop.f32.mrf.mxu0  ;;  %1917 = vmatmul.mubr.f32.gmra.mxu1 %v6421_v18  ;;  %2253 = vmatmul.mubr.f32.gmra.mxu0 %v6457_v62  ;;  %v6461_v18 = vld [vmem:[%s11628_s1 + $0x800] sm:$0xff] }
 0x1ee   : > { %1921 = vmatprep.mubr.f32.mxu1 %v6424_v19  ;;  %2257 = vmatprep.mubr.f32.mxu0 %v6460_v39  ;;  %v6464_v19 = vld [vmem:[%s11628_s1 + $0x818] sm:$0xff] }
 0x1ef   : > { %v961_v4 = vpop.f32.mrf.mxu0 }
 0x1f1   : > { %v9686_v54 = vpop.f32.mrf.mxu0  ;;  %1922 = vmatmul.mubr.f32.gmra.mxu1 %v6423_v45  ;;  %2258 = vmatmul.mubr.f32.gmra.mxu0 %v6459_v24  ;;  %v6427_v45 = vld [vmem:[%s11628_s1 + $0x6f0] sm:$0xff] }
 0x1f2   : > { %1926 = vmatprep.mubr.f32.mxu1 %v6426_v13  ;;  %2262 = vmatprep.mubr.f32.mxu0 %v6462_v28  ;;  %v6463_v24 = vld [vmem:[%s11628_s1 + $0x810] sm:$0xff]  ;;  %v6466_v13 = vld [vmem:[%s11628_s1 + $0x828] sm:$0xff] }
 0x1f3   : > { %v966_v62 = vpop.f32.mrf.mxu0 }
 0x1f4   : > { %v6468_v62 = vld [vmem:[%s11628_s1 + $0x838] sm:$0xff] }
 0x1f5   : > { %v9700_v39 = vpop.f32.mrf.mxu0  ;;  %1927 = vmatmul.mubr.f32.gmra.mxu1 %v6425_v32  ;;  %2263 = vmatmul.mubr.f32.gmra.mxu0 %v6461_v18  ;;  %v6465_v32 = vld [vmem:[%s11628_s1 + $0x820] sm:$0xff] }
 0x1f6   : > { %1931 = vmatprep.mubr.f32.mxu1 %v6428_v7  ;;  %2267 = vmatprep.mubr.f32.mxu0 %v6464_v19  ;;  %v6467_v19 = vld [vmem:[%s11628_s1 + $0x830] sm:$0xff] }
 0x1f7   : > { %v971_v4 = vpop.f32.mrf.mxu0 }
 0x1f9   : > { %v9711_v28 = vpop.f32.mrf.mxu0  ;;  %1932 = vmatmul.mubr.f32.gmra.mxu1 %v6427_v45  ;;  %2268 = vmatmul.mubr.f32.gmra.mxu0 %v6463_v24  ;;  %v6470_v24 = vld [vmem:[%s11628_s1 + $0x848] sm:$0xff] }
 0x1fa   : > { %2272 = vmatprep.mubr.f32.mxu0 %v6466_v13  ;;  %v6469_v13 = vld [vmem:[%s11628_s1 + $0x840] sm:$0xff] }
 0x1fb   : > { %v976_v18 = vpop.f32.mrf.mxu0 }
 0x1fd   : > { %v9719_v7 = vpop.f32.mrf.mxu0  ;;  %2273 = vmatmul.mubr.f32.gmra.mxu0 %v6465_v32  ;;  %v6472_v32 = vld [vmem:[%s11628_s1 + $0x858] sm:$0xff] }
 0x1fe   : > { %2277 = vmatprep.mubr.f32.mxu0 %v6468_v62  ;;  %v1055_v62 = vadd.f32 %v9029_v41, %v9313_v15  ;;  %v6473_v15 = vld [vmem:[%s11628_s1 + $0x860] sm:$0xff] }
 0x1ff   : > { %v981_v45 = vpop.f32.mrf.mxu0 }
 0x201   : > { %v9727_v4 = vpop.f32.mrf.mxu0  ;;  %2278 = vmatmul.mubr.f32.gmra.mxu0 %v6467_v19  ;;  %v6471_v19 = vld [vmem:[%s11628_s1 + $0x850] sm:$0xff] }
 0x202   : > { %11652 = vst [vmem:[#allocation6_spill] sm:$0xff] %v9727_v4  ;;  %2282 = vmatprep.mubr.f32.mxu0 %v6470_v24 }
 0x203   : > { %v986_v18 = vpop.f32.mrf.mxu0 }
 0x204   : > { %v6474_v18 = vld [vmem:[%s11628_s1 + $0x868] sm:$0xff] }
 0x205   : > { %v1412_v45 = vpop.f32.mrf.mxu0  ;;  %2283 = vmatmul.mubr.f32.gmra.mxu0 %v6469_v13 }
 0x206   : > { %v9737_v0 = vadd.f32 %v1412_v45, %v1055_v62  ;;  %2287 = vmatprep.mubr.f32.mxu0 %v6472_v32  ;;  %v6476_v32 = vld [vmem:[%s11628_s1 + $0x878] sm:$0xff]  ;;  %v1065_v62 = vadd.f32 %v9051_v46, %v9344_v1  ;;  %v6477_v1 = vld [vmem:[%s11628_s1 + $0x880] sm:$0xff] }
 0x207   : > { %v1414_v24 = vpop.f32.mrf.mxu0 }
 0x209   : > { %v1417_v4 = vpop.f32.mrf.mxu0  ;;  %2288 = vmatmul.mubr.f32.gmra.mxu0 %v6471_v19  ;;  %v1070_v19 = vadd.f32 %v9062_v49, %v9360_v2  ;;  %v6479_v2 = vld [vmem:[%s11628_s1 + $0x890] sm:$0xff] }
 0x20a   : > { %v9747_v41 = vadd.f32 %v1417_v4, %v1060_v22  ;;  %2292 = vmatprep.mubr.f32.mxu0 %v6474_v18  ;;  %v6478_v4 = vld [vmem:[%s11628_s1 + $0x888] sm:$0xff] }
 0x20b   : > { %v1419_v13 = vpop.f32.mrf.mxu0 }
 0x20c   : > { %v1075_v13 = vadd.f32 %v9074_v52, %v9374_v31  ;;  %v6481_v31 = vld [vmem:[%s11628_s1 + $0x8a0] sm:$0xff] }
 0x20d   : > { %v1422_v45 = vpop.f32.mrf.mxu0  ;;  %2293 = vmatmul.mubr.f32.gmra.mxu0 %v6473_v15  ;;  %v6480_v15 = vld [vmem:[%s11628_s1 + $0x898] sm:$0xff] }
 0x20e   : > { %v9757_v43 = vadd.f32 %v1422_v45, %v1065_v62  ;;  %2297 = vmatprep.mubr.f32.mxu0 %v6476_v32  ;;  %v6482_v45 = vld [vmem:[%s11628_s1 + $0x8a8] sm:$0xff] }
 0x20f   : > { %v1424_v22 = vpop.f32.mrf.mxu0 }
 0x211   : > { %v1427_v24 = vpop.f32.mrf.mxu0  ;;  %2298 = vmatmul.mubr.f32.gmra.mxu0 %v6475_v10  ;;  %v1080_v10 = vadd.f32 %v9088_v27, %v9390_v5  ;;  %v6483_v5 = vld [vmem:[%s11628_s1 + $0x8b0] sm:$0xff] }
 0x212   : > { %v9767_v46 = vadd.f32 %v1427_v24, %v1070_v19  ;;  %2302 = vmatprep.mubr.f32.mxu0 %v6478_v4  ;;  %v6484_v19 = vld [vmem:[%s11628_s1 + $0x8b8] sm:$0xff]  ;;  %v1085_v24 = vadd.f32 %v9103_v16, %v9404_v30  ;;  %v1095_v16 = vadd.f32 %v9129_v63, %v9434_v50  ;;  %v1110_v63 = vadd.f32 %v9172_v44, %v9494_v23  ;;  %v2464_v23 = vld [vmem:[%s11630_s3 + $0x8] sm:$0xff] }
 0x213   : > { %v1429_v18 = vpop.f32.mrf.mxu0  ;;  %v2466_v50 = vld [vmem:[%s11630_s3 + $0x18] sm:$0xf]  ;;  %v1115_v44 = vadd.f32 %v9182_v47, %v9514_v55 }
 0x214   : > { %7184 = vmatprep.subr.msk.mxu1 %vm2510_vm0, %v2466_v50 }
 0x215   : > { %v1432_v32 = vpop.f32.mrf.mxu0  ;;  %2303 = vmatmul.mubr.f32.gmra.mxu0 %v6477_v1  ;;  %7185 = vmatpush3.msk.msra.mxu1 %vm2510_vm0, %v2466_v50 }
 0x216   : > { %v9777_v49 = vadd.f32 %v1432_v32, %v1075_v13  ;;  %2307 = vmatprep.mubr.f32.mxu0 %v6480_v15  ;;  %v1090_v15 = vadd.f32 %v9116_v59, %v9420_v42  ;;  %v1105_v59 = vadd.f32 %v9160_v40, %v9474_v38  ;;  %v2465_v40 = vld [vmem:[%s11630_s3 + $0x10] sm:$0xff] }
 0x217   : > { %v1434_v62 = vpop.f32.mrf.mxu0  ;;  %7186 = vmatprep.subr.mxu1 %v2465_v40 }
 0x218   : > { %7187 = vmatpush3.msra.mxu1 %v2465_v40 }
 0x219   : > { %v1437_v22 = vpop.f32.mrf.mxu0  ;;  %2308 = vmatmul.mubr.f32.gmra.mxu0 %v6479_v2  ;;  %7188 = vmatprep.subr.mxu1 %v2464_v23 }
 0x21a   : > { %v9787_v52 = vadd.f32 %v1437_v22, %v1080_v10  ;;  %2312 = vmatprep.mubr.f32.mxu0 %v6482_v45  ;;  %v1100_v10 = vadd.f32 %v9147_v20, %v9454_v56  ;;  %7189 = vmatpush3.msra.mxu1 %v2464_v23  ;;  %v1150_v23 = vadd.f32 %v9256_v12, %v9630_v17 }
 0x21b   : > { %v1439_v4 = vpop.f32.mrf.mxu0 }
 0x21d   : > { %v1442_v1 = vpop.f32.mrf.mxu0  ;;  %2313 = vmatmul.mubr.f32.gmra.mxu0 %v6481_v31 }
 0x21e   : > { %v9797_v27 = vadd.f32 %v1442_v1, %v1085_v24  ;;  %2317 = vmatprep.mubr.f32.mxu0 %v6484_v19 }
 0x21f   : > { %v1444_v18 = vpop.f32.mrf.mxu0 }
 0x220   : > { %v2463_v18 = vld [vmem:[%s11630_s3] sm:$0xff] }
 0x221   : > { %v1447_v13 = vpop.f32.mrf.mxu0  ;;  %2318 = vmatmul.mubr.f32.gmra.mxu0 %v6483_v5  ;;  %7190 = vmatprep.subr.mxu1 %v2463_v18 }
 0x222   : > { %v9804_v32 = vadd.f32 %v1447_v13, %v1090_v15  ;;  %v1120_v13 = vadd.f32 %v9193_v25, %v9534_v36  ;;  %7191 = vmatpush3.msra.mxu1 %v2463_v18  ;;  %v1135_v25 = vadd.f32 %v9224_v60, %v9588_v9 }
 0x223   : > { %v1449_v2 = vpop.f32.mrf.mxu0 }
 0x225   : > { %v1452_v30 = vpop.f32.mrf.mxu0 }
 0x226   : > { %v9808_v62 = vadd.f32 %v1452_v30, %v1095_v16  ;;  %v1125_v16 = vadd.f32 %v9203_v53, %v9554_v26  ;;  %v1140_v53 = vadd.f32 %v9235_v29, %v9602_v3 }
 0x227   : > { %v1454_v45 = vpop.f32.mrf.mxu0 }
 0x229   : > { %v1457_v22 = vpop.f32.mrf.mxu0 }
 0x22a   : > { %v9812_v31 = vadd.f32 %v1457_v22, %v1100_v10  ;;  %v1130_v22 = vadd.f32 %v9214_v33, %v9574_v8  ;;  %v1145_v33 = vadd.f32 %v9245_v37, %v9616_v6 }
 0x22b   : > { %v1459_v4 = vpop.f32.mrf.mxu0 }
 0x22d   : > { %v1462_v42 = vpop.f32.mrf.mxu0 }
 0x22e   : > { %v9816_v19 = vadd.f32 %v1462_v42, %v1105_v59 }
 0x22f   : > { %v1464_v24 = vpop.f32.mrf.mxu0 }
 0x231   : > { %v1467_v20 = vpop.f32.mrf.mxu0 }
 0x232   : > { %v9824_v56 = vadd.f32 %v1467_v20, %v1110_v63 }
 0x233   : > { %v1469_v38 = vpop.f32.mrf.mxu0 }
 0x235   : > { %v1472_v1 = vpop.f32.mrf.mxu0 }
 0x236   : > { %v9835_v5 = vadd.f32 %v1472_v1, %v1115_v44 }
 0x237   : > { %v1474_v15 = vpop.f32.mrf.mxu0 }
 0x238   : > { %v1155_v15 = vadd.f32 %v9266_v11, %v9644_v14 }
 0x239   : > { %v1477_v47 = vpop.f32.mrf.mxu0 }
 0x23a   : > { %v9842_v55 = vadd.f32 %v1477_v47, %v1120_v13 }
 0x23b   : > { %v1479_v2 = vpop.f32.mrf.mxu0 }
 0x23d   : > { %v1482_v30 = vpop.f32.mrf.mxu0 }
 0x23e   : > { %v9846_v45 = vadd.f32 %v1482_v30, %v1125_v16  ;;  %v1160_v16 = vadd.f32 %v9281_v51, %v9658_v61 }
 0x23f   : > { %v1484_v10 = vpop.f32.mrf.mxu0 }
 0x241   : > { %v1487_v4 = vpop.f32.mrf.mxu0 }
 0x242   : > { %v9850_v59 = vadd.f32 %v1487_v4, %v1130_v22  ;;  %v1165_v4 = vadd.f32 %v9296_v34, %v9672_v21 }
 0x243   : > { %v1489_v42 = vpop.f32.mrf.mxu0 }
 0x245   : > { %v1492_v36 = vpop.f32.mrf.mxu0 }
 0x246   : > { %v9854_v24 = vadd.f32 %v1492_v36, %v1135_v25 }
 0x247   : > { %v1494_v63 = vpop.f32.mrf.mxu0 }
 0x248   : > { %v1170_v63 = vadd.f32 %v9310_v58, %v9686_v54 }
 0x249   : > { %v1497_v26 = vpop.f32.mrf.mxu0 }
 0x24a   : > { %v9858_v50 = vadd.f32 %v1497_v26, %v1140_v53 }
 0x24b   : > { %v1499_v20 = vpop.f32.mrf.mxu0 }
 0x24d   : > { %v1502_v8 = vpop.f32.mrf.mxu0  ;;  %v1798_v40 = vpop.f32.mrf.mxu1 }
 0x24e   : > { %v9862_v38 = vadd.f32 %v1502_v8, %v1145_v33  ;;  %v9865_v60 = vadd.f32 %v1798_v40, %v9737_v0  ;;  %v1175_v33 = vadd.f32 %v9328_v35, %v9700_v39  ;;  %v1180_v35 = vadd.f32 %v9358_v48, %v9711_v28 }
 0x24f   : > { %v1504_v9 = vpop.f32.mrf.mxu0  ;;  %v1800_v44 = vpop.f32.mrf.mxu1 }
 0x251   : > { %v1507_v29 = vpop.f32.mrf.mxu0  ;;  %v1803_v3 = vpop.f32.mrf.mxu1 }
 0x252   : > { %v9869_v1 = vadd.f32 %v1507_v29, %v1150_v23  ;;  %v9872_v18 = vadd.f32 %v1803_v3, %v9747_v41 }
 0x253   : > { %v1509_v37 = vpop.f32.mrf.mxu0  ;;  %v1805_v6 = vpop.f32.mrf.mxu1 }
 0x254   : > { %v1185_v6 = vadd.f32 %v9388_v57, %v9719_v7 }
 0x255   : > { %v1512_v13 = vpop.f32.mrf.mxu0  ;;  %v1808_v0 = vpop.f32.mrf.mxu1 }
 0x256   : > { %v9876_v47 = vadd.f32 %v1512_v13, %v1155_v15  ;;  %v9879_v2 = vadd.f32 %v1808_v0, %v9757_v43 }
 0x257   : > { %v1514_v12 = vpop.f32.mrf.mxu0  ;;  %v1810_v17 = vpop.f32.mrf.mxu1 }
 0x258   : > { %v11653_v12 = vld [vmem:[#allocation6_spill] sm:$0xff]  ;;  %v11654_v17 = vld [vmem:[#allocation5_spill] sm:$0xff] }
 0x259   : > { %v1517_v30 = vpop.f32.mrf.mxu0  ;;  %v1813_v41 = vpop.f32.mrf.mxu1 }
 0x25a   : > { %v9883_v10 = vadd.f32 %v1517_v30, %v1160_v16  ;;  %v9886_v22 = vadd.f32 %v1813_v41, %v9767_v46  ;;  %v1190_v16 = vadd.f32 %v11654_v17, %v11653_v12 }
 0x25b   : > { %v1519_v11 = vpop.f32.mrf.mxu0  ;;  %v1815_v14 = vpop.f32.mrf.mxu1 }
 0x25d   : > { %v1522_v42 = vpop.f32.mrf.mxu0  ;;  %v1818_v43 = vpop.f32.mrf.mxu1 }
 0x25e   : > { %v9890_v25 = vadd.f32 %v1522_v42, %v1165_v4  ;;  %v9893_v36 = vadd.f32 %v1818_v43, %v9777_v49  ;;  %v9907_v49 = vld [vmem:[%s11631_s4 + $0x18] sm:$0xf] }
 0x25f   : > { %v1524_v51 = vpop.f32.mrf.mxu0  ;;  %v1820_v61 = vpop.f32.mrf.mxu1  ;;  %7213 = vmatprep.subr.msk.mxu1 %vm2510_vm0, %v9907_v49 }
 0x261   : > { %v1527_v53 = vpop.f32.mrf.mxu0  ;;  %v1823_v46 = vpop.f32.mrf.mxu1 }
 0x262   : > { %v9897_v26 = vadd.f32 %v1527_v53, %v1170_v63  ;;  %v9900_v20 = vadd.f32 %v1823_v46, %v9787_v52 }
 0x263   : > { %v1529_v34 = vpop.f32.mrf.mxu0  ;;  %v1825_v21 = vpop.f32.mrf.mxu1 }
 0x265   : > { %v1532_v8 = vpop.f32.mrf.mxu0  ;;  %v1828_v40 = vpop.f32.mrf.mxu1 }
 0x266   : > { %v9911_v58 = vadd.f32 %v1532_v8, %v1175_v33  ;;  %v9914_v54 = vadd.f32 %v1828_v40, %v9797_v27 }
 0x267   : > { %v1534_v52 = vpop.f32.mrf.mxu0  ;;  %v1830_v9 = vpop.f32.mrf.mxu1 }
 0x269   : > { %v1537_v39 = vpop.f32.mrf.mxu0  ;;  %v1833_v44 = vpop.f32.mrf.mxu1 }
 0x26a   : > { %v9918_v23 = vadd.f32 %v1537_v39, %v1180_v35  ;;  %v9921_v29 = vadd.f32 %v1833_v44, %v9804_v32 }
 0x26b   : > { %v1539_v3 = vpop.f32.mrf.mxu0  ;;  %v1835_v37 = vpop.f32.mrf.mxu1 }
 0x26d   : > { %v1542_v15 = vpop.f32.mrf.mxu0  ;;  %v1838_v27 = vpop.f32.mrf.mxu1 }
 0x26e   : > { %v9925_v13 = vadd.f32 %v1542_v15, %v1185_v6  ;;  %v9928_v0 = vadd.f32 %v1838_v27, %v9808_v62 }
 0x26f   : > { %v1544_v48 = vpop.f32.mrf.mxu0  ;;  %v1840_v28 = vpop.f32.mrf.mxu1 }
 0x271   : > { %v1547_v30 = vpop.f32.mrf.mxu0  ;;  %v1843_v32 = vpop.f32.mrf.mxu1 }
 0x272   : > { %v9932_v41 = vadd.f32 %v1547_v30, %v1190_v16  ;;  %v9935_v11 = vadd.f32 %v1843_v32, %v9812_v31 }
 0x273   : > { %v1549_v57 = vpop.f32.mrf.mxu0  ;;  %v1845_v7 = vpop.f32.mrf.mxu1 }
 0x274   : > { %11655 = vst [vmem:[#allocation6_spill] sm:$0xff] %v9932_v41  ;;  %v2387_v41 = vpop.permute.xlu1 %2386 }
 0x275   : > { %v1848_v14 = vpop.f32.mrf.mxu1  ;;  %v2184_v4 = vpop.f32.mrf.mxu0 }
 0x276   : > { %v9938_v42 = vadd.f32 %v1848_v14, %v9816_v19 }
 0x277   : > { %v1850_v62 = vpop.f32.mrf.mxu1  ;;  %v2186_v43 = vpop.f32.mrf.mxu0 }
 0x279   : > { %v1853_v51 = vpop.f32.mrf.mxu1  ;;  %v9940_v61 = vpop.f32.mrf.mxu0 }
 0x27a   : > { %v9943_v63 = vadd.f32 %v1853_v51, %v9824_v56 }
 0x27b   : > { %v1855_v53 = vpop.f32.mrf.mxu1  ;;  %v2191_v46 = vpop.f32.mrf.mxu0 }
 0x27d   : > { %v1858_v34 = vpop.f32.mrf.mxu1  ;;  %v9945_v31 = vpop.f32.mrf.mxu0 }
 0x27e   : > { %v9948_v21 = vadd.f32 %v1858_v34, %v9835_v5 }
 0x27f   : > { %v1860_v33 = vpop.f32.mrf.mxu1  ;;  %v2196_v8 = vpop.f32.mrf.mxu0 }
 0x281   : > { %v1863_v19 = vpop.f32.mrf.mxu1  ;;  %v9950_v40 = vpop.f32.mrf.mxu0 }
 0x282   : > { %v9953_v52 = vadd.f32 %v1863_v19, %v9842_v55 }
 0x283   : > { %v1865_v9 = vpop.f32.mrf.mxu1  ;;  %v2201_v35 = vpop.f32.mrf.mxu0 }
 0x284   : > { %11656 = vst [vmem:[#allocation5_spill] sm:$0xff] %v9953_v52 }
 0x285   : > { %v1868_v56 = vpop.f32.mrf.mxu1  ;;  %v9955_v39 = vpop.f32.mrf.mxu0 }
 0x287   : > { %v1870_v44 = vpop.f32.mrf.mxu1  ;;  %v2206_v3 = vpop.f32.mrf.mxu0 }
 0x289   : > { %v1873_v37 = vpop.f32.mrf.mxu1  ;;  %v9957_v6 = vpop.f32.mrf.mxu0 }
 0x28b   : > { %v1875_v5 = vpop.f32.mrf.mxu1  ;;  %v2211_v15 = vpop.f32.mrf.mxu0 }
 0x28d   : > { %v1878_v27 = vpop.f32.mrf.mxu1  ;;  %v9959_v48 = vpop.f32.mrf.mxu0 }
 0x28f   : > { %v1880_v28 = vpop.f32.mrf.mxu1  ;;  %v2216_v12 = vpop.f32.mrf.mxu0 }
 0x291   : > { %v1883_v17 = vpop.f32.mrf.mxu1  ;;  %v9961_v55 = vpop.f32.mrf.mxu0 }
 0x293   : > { %v1885_v16 = vpop.f32.mrf.mxu1  ;;  %v2221_v30 = vpop.f32.mrf.mxu0 }
 0x295   : > { %v9963_v32 = vpop.f32.mrf.mxu1  ;;  %v9965_v57 = vpop.f32.mrf.mxu0 }
 0x297   : > { %v1890_v7 = vpop.f32.mrf.mxu1  ;;  %v2226_v14 = vpop.f32.mrf.mxu0 }
 0x298   : > { %v1951_v14 = vadd.f32 %v1868_v56, %v9846_v45  ;;  %v2324_v45 = vadd.f32 %v9940_v61, %v9872_v18  ;;  %v2392_v61 = vpop.permute.xlu1 %2391 }
 0x299   : > { %v9967_v62 = vpop.f32.mrf.mxu1  ;;  %v9969_v43 = vpop.f32.mrf.mxu0 }
 0x29b   : > { %v1895_v51 = vpop.f32.mrf.mxu1  ;;  %v2231_v53 = vpop.f32.mrf.mxu0 }
 0x29d   : > { %v9971_v46 = vpop.f32.mrf.mxu1  ;;  %v9973_v34 = vpop.f32.mrf.mxu0 }
 0x29f   : > { %v1900_v33 = vpop.f32.mrf.mxu1  ;;  %v2236_v8 = vpop.f32.mrf.mxu0 }
 0x2a0   : > { %v2323_v33 = vadd.f32 %v2184_v4, %v9865_v60  ;;  %v1953_v4 = vadd.f32 %v1878_v27, %v9854_v24  ;;  %v2651_v24 = vld [vmem:[%s11631_s4 + $0x10] sm:$0xff]  ;;  %v1954_v27 = vadd.f32 %v1883_v17, %v9858_v50 }
 0x2a1   : > { %v9975_v19 = vpop.f32.mrf.mxu1  ;;  %v9977_v9 = vpop.f32.mrf.mxu0 }
 0x2a3   : > { %v1905_v35 = vpop.f32.mrf.mxu1  ;;  %v2241_v44 = vpop.f32.mrf.mxu0 }
 0x2a4   : > { %v2382_v35 = vpop.permute.xlu0 %2381 }
 0x2a5   : > { %v9979_v3 = vpop.f32.mrf.mxu1  ;;  %v9981_v5 = vpop.f32.mrf.mxu0 }
 0x2a6   : > { %11657 = vst [vmem:[#allocation7_spill] sm:$0xff] %v9981_v5 }
 0x2a7   : > { %v1910_v15 = vpop.f32.mrf.mxu1  ;;  %v2246_v28 = vpop.f32.mrf.mxu0 }
 0x2a8   : > { %v1952_v15 = vadd.f32 %v1873_v37, %v9850_v59  ;;  %v2325_v37 = vadd.f32 %v9945_v31, %v9879_v2  ;;  %v2650_v2 = vld [vmem:[%s11631_s4 + $0x8] sm:$0xff] }
 0x2a9   : > { %v9983_v12 = vpop.f32.mrf.mxu1  ;;  %v9985_v16 = vpop.f32.mrf.mxu0 }
 0x2aa   : > { %11658 = vst [vmem:[#allocation8_spill] sm:$0xff] %v9985_v16 }
 0x2ab   : > { %v1915_v30 = vpop.f32.mrf.mxu1  ;;  %v2251_v7 = vpop.f32.mrf.mxu0 }
 0x2ad   : > { %v9988_v51 = vpop.f32.mrf.mxu1  ;;  %v2254_v53 = vpop.f32.mrf.mxu0 }
 0x2ae   : > { %v2337_v8 = vadd.f32 %v2254_v53, %v1951_v14 }
 0x2af   : > { %v1920_v44 = vpop.f32.mrf.mxu1  ;;  %v2256_v52 = vpop.f32.mrf.mxu0 }
 0x2b0   : > { %v2351_v28 = vmax.f32 %v2323_v33, %v2337_v8 }
 0x2b1   : > { %v9992_v5 = vpop.f32.mrf.mxu1  ;;  %v2259_v16 = vpop.f32.mrf.mxu0 }
 0x2b2   : > { %v9996_v56 = vadd.f32 %v2382_v35, %v2351_v28  ;;  %v2338_v30 = vadd.f32 %v2259_v16, %v1952_v15  ;;  %v2649_v28 = vld [vmem:[%s11631_s4] sm:$0xff] }
 0x2b3   : > { %v1925_v7 = vpop.f32.mrf.mxu1  ;;  %v2261_v60 = vpop.f32.mrf.mxu0 }
 0x2b4   : > { %v2352_v14 = vmax.f32 %v2324_v45, %v2338_v30  ;;  %7192 = vmatprep.mubr.msk.f32.mxu1 %vm2467_vm1, %v9996_v56  ;;  %v2327_v30 = vadd.f32 %v9955_v39, %v9893_v36 }
 0x2b5   : > { %v10001_v59 = vpop.f32.mrf.mxu1  ;;  %v2264_v52 = vpop.f32.mrf.mxu0 }
 0x2b6   : > { %v10005_v53 = vadd.f32 %v2387_v41, %v2352_v14  ;;  %v2339_v18 = vadd.f32 %v2264_v52, %v1953_v4  ;;  %v2326_v41 = vadd.f32 %v9950_v40, %v9886_v22  ;;  %v2397_v22 = vpop.permute.xlu0 %2396  ;;  %v2402_v14 = vpop.permute.xlu1 %2401 }
 0x2b7   : > { %v1930_v33 = vpop.f32.mrf.mxu1  ;;  %v2266_v16 = vpop.f32.mrf.mxu0 }
 0x2b8   : > { %v2353_v8 = vmax.f32 %v2325_v37, %v2339_v18  ;;  %7193 = vmatmul.mubr.msk.f32.vlgmr.msra.gmra.mxu1 %vm2467_vm1, %v10005_v53  ;;  %v2328_v37 = vadd.f32 %v9957_v6, %v9900_v20  ;;  %v2329_v16 = vadd.f32 %v9959_v48, %v9914_v54  ;;  %v1958_v6 = vadd.f32 %v9975_v19, %v9883_v10 }
 0x2b9   : > { %v10013_v35 = vpop.f32.mrf.mxu1  ;;  %v2269_v44 = vpop.f32.mrf.mxu0  ;;  %7214 = vmatpush3.msk.msra.mxu1 %vm2510_vm0, %v9907_v49  ;;  %v1955_v49 = vadd.f32 %v9963_v32, %v9862_v38  ;;  %v1956_v38 = vadd.f32 %v9967_v62, %v9869_v1  ;;  %v1959_v48 = vadd.f32 %v9979_v3, %v9890_v25  ;;  %v2332_v3 = vadd.f32 %v9969_v43, %v9935_v11 }
 0x2ba   : > { %v10022_v31 = vadd.f32 %v2392_v61, %v2353_v8  ;;  %v2340_v50 = vadd.f32 %v2269_v44, %v1954_v27  ;;  %7215 = vmatprep.subr.mxu1 %v2651_v24  ;;  %v1957_v61 = vadd.f32 %v9971_v46, %v9876_v47  ;;  %v2407_v1 = vpop.permute.xlu0 %2406  ;;  %v2412_v47 = vpop.permute.xlu1 %2411  ;;  %v2330_v44 = vadd.f32 %v9961_v55, %v9921_v29 }
 0x2bb   : > { %v2271_v17 = vpop.f32.mrf.mxu0  ;;  %v1935_v15 = vpop.f32.mrf.mxu1  ;;  %7216 = vmatpush3.msra.mxu1 %v2651_v24  ;;  %v1960_v29 = vadd.f32 %v9983_v12, %v9897_v26  ;;  %v2333_v26 = vadd.f32 %v9973_v34, %v9938_v42  ;;  %v1962_v11 = vadd.f32 %v9992_v5, %v9918_v23  ;;  %v1963_v42 = vadd.f32 %v10001_v59, %v9925_v13  ;;  %v11659_v23 = vld [vmem:[#allocation7_spill] sm:$0xff]  ;;  %v11661_v13 = vld [vmem:[#allocation5_spill] sm:$0xff]  ;;  %v11662_v59 = vld [vmem:[#allocation8_spill] sm:$0xff] }
 0x2bc   : > { %v2354_v45 = vmax.f32 %v2326_v41, %v2340_v50  ;;  %7195 = vmatprep.mubr.msk.f32.mxu1 %vm2467_vm1, %v10022_v31  ;;  %7217 = vmatprep.subr.mxu1 %v2650_v2  ;;  %v2331_v17 = vadd.f32 %v9965_v57, %v9928_v0  ;;  %v1961_v0 = vadd.f32 %v9988_v51, %v9911_v58 }
 0x2bd   : > { %v2274_v40 = vpop.f32.mrf.mxu0  ;;  %7218 = vmatpush3.msra.mxu1 %v2650_v2  ;;  %v2334_v58 = vadd.f32 %v9977_v9, %v9943_v63  ;;  %v2335_v5 = vadd.f32 %v11659_v23, %v9948_v21 }
 0x2be   : > { %v10033_v7 = vadd.f32 %v2397_v22, %v2354_v45  ;;  %v2341_v60 = vadd.f32 %v2274_v40, %v1955_v49  ;;  %7219 = vmatprep.subr.mxu1 %v2649_v28  ;;  %v2417_v10 = vpop.permute.xlu0 %2416  ;;  %v2422_v45 = vpop.permute.xlu1 %2421 }
 0x2bf   : > { %v2276_v4 = vpop.f32.mrf.mxu0  ;;  %7220 = vmatpush3.msra.mxu1 %v2649_v28 }
 0x2c0   : > { %v2355_v32 = vmax.f32 %v2327_v30, %v2341_v60  ;;  %7196 = vmatmul.mubr.msk.f32.gmra.mxu1 %vm2467_vm1, %v10033_v7 }
 0x2c1   : > { %v2279_v52 = vpop.f32.mrf.mxu0 }
 0x2c2   : > { %v10041_v18 = vadd.f32 %v2402_v14, %v2355_v32  ;;  %v2342_v36 = vadd.f32 %v2279_v52, %v1956_v38  ;;  %v2427_v60 = vpop.permute.xlu0 %2426  ;;  %v2432_v14 = vpop.permute.xlu1 %2431 }
 0x2c3   : > { %v2281_v39 = vpop.f32.mrf.mxu0 }
 0x2c4   : > { %v2356_v33 = vmax.f32 %v2328_v37, %v2342_v36  ;;  %7198 = vmatprep.mubr.msk.f32.mxu1 %vm2467_vm1, %v10041_v18 }
 0x2c5   : > { %v2284_v62 = vpop.f32.mrf.mxu0 }
 0x2c6   : > { %v10049_v24 = vadd.f32 %v2407_v1, %v2356_v33  ;;  %v2343_v27 = vadd.f32 %v2284_v62, %v1957_v61  ;;  %v2437_v39 = vpop.permute.xlu0 %2436 }
 0x2c7   : > { %v2286_v20 = vpop.f32.mrf.mxu0 }
 0x2c8   : > { %v2357_v8 = vmax.f32 %v2329_v16, %v2343_v27  ;;  %7199 = vmatmul.mubr.msk.f32.gmra.mxu1 %vm2467_vm1, %v10049_v24  ;;  %v11660_v16 = vld [vmem:[#allocation6_spill] sm:$0xff]  ;;  %v2442_v27 = vpop.permute.xlu1 %2441 }
 0x2c9   : > { %v2289_v46 = vpop.f32.mrf.mxu0  ;;  %v1964_v63 = vadd.f32 %v10013_v35, %v11660_v16 }
 0x2ca   : > { %v10057_v2 = vadd.f32 %v2412_v47, %v2357_v8  ;;  %v2344_v41 = vadd.f32 %v2289_v46, %v1958_v6  ;;  %v2336_v6 = vadd.f32 %v11662_v59, %v11661_v13  ;;  %v2447_v21 = vpop.permute.xlu0 %2446 }
 0x2cb   : > { %v2291_v54 = vpop.f32.mrf.mxu0 }
 0x2cc   : > { %v2358_v50 = vmax.f32 %v2330_v44, %v2344_v41  ;;  %7201 = vmatprep.mubr.msk.f32.mxu1 %vm2467_vm1, %v10057_v2 }
 0x2cd   : > { %v2294_v19 = vpop.f32.mrf.mxu0 }
 0x2ce   : > { %v2456_v15 = vadd.f32 %v2417_v10, %v2358_v50  ;;  %v2345_v28 = vadd.f32 %v2294_v19, %v1959_v48 }
 0x2cf   : > { %v2296_v49 = vpop.f32.mrf.mxu0 }
 0x2d0   : > { %v2359_v55 = vmax.f32 %v2331_v17, %v2345_v28  ;;  %7202 = vmatmul.mubr.msk.f32.gmra.mxu1 %vm2467_vm1, %v2456_v15 }
 0x2d1   : > { %v2299_v25 = vpop.f32.mrf.mxu0 }
 0x2d2   : > { %v2457_v22 = vadd.f32 %v2422_v45, %v2359_v55  ;;  %v2346_v40 = vadd.f32 %v2299_v25, %v1960_v29 }
 0x2d3   : > { %v2301_v30 = vpop.f32.mrf.mxu0 }
 0x2d4   : > { %v2360_v57 = vmax.f32 %v2332_v3, %v2346_v40  ;;  %7204 = vmatprep.mubr.msk.f32.mxu1 %vm2467_vm1, %v2457_v22 }
 0x2d5   : > { %v2304_v4 = vpop.f32.mrf.mxu0 }
 0x2d6   : > { %v2458_v12 = vadd.f32 %v2427_v60, %v2360_v57  ;;  %v2347_v38 = vadd.f32 %v2304_v4, %v1961_v0 }
 0x2d7   : > { %v2306_v32 = vpop.f32.mrf.mxu0 }
 0x2d8   : > { %v2361_v43 = vmax.f32 %v2333_v26, %v2347_v38  ;;  %7205 = vmatmul.mubr.msk.f32.gmra.mxu1 %vm2467_vm1, %v2458_v12 }
 0x2d9   : > { %v2309_v52 = vpop.f32.mrf.mxu0 }
 0x2da   : > { %v2459_v51 = vadd.f32 %v2432_v14, %v2361_v43  ;;  %v2348_v37 = vadd.f32 %v2309_v52, %v1962_v11 }
 0x2db   : > { %v2311_v36 = vpop.f32.mrf.mxu0 }
 0x2dc   : > { %v2362_v34 = vmax.f32 %v2334_v58, %v2348_v37  ;;  %7207 = vmatprep.mubr.msk.f32.mxu1 %vm2467_vm1, %v2459_v51 }
 0x2dd   : > { %v2314_v61 = vpop.f32.mrf.mxu0 }
 0x2de   : > { %v2460_v33 = vadd.f32 %v2437_v39, %v2362_v34  ;;  %v2349_v1 = vadd.f32 %v2314_v61, %v1963_v42 }
 0x2df   : > { %v2316_v62 = vpop.f32.mrf.mxu0 }
 0x2e0   : > { %v2363_v9 = vmax.f32 %v2335_v5, %v2349_v1  ;;  %7208 = vmatmul.mubr.msk.f32.gmra.mxu1 %vm2467_vm1, %v2460_v33  ;;  %v2840_v5 = vld [vmem:[#allocation2 + $0xa0] sm:$0xff] }
 0x2e1   : > { %v2319_v20 = vpop.f32.mrf.mxu0 }
 0x2e2   : > { %v2461_v8 = vadd.f32 %v2442_v27, %v2363_v9  ;;  %v2350_v47 = vadd.f32 %v2319_v20, %v1964_v63 }
 0x2e3   : > { %v2321_v46 = vpop.f32.mrf.mxu0 }
 0x2e4   : > { %v2364_v44 = vmax.f32 %v2336_v6, %v2350_v47  ;;  %7210 = vmatprep.mubr.msk.f32.mxu1 %vm2467_vm1, %v2461_v8  ;;  %v3368_v6 = vld [vmem:[#allocation2 + $0x140] sm:$0xff]  ;;  %v4302_v47 = vld [vmem:[%s11633_s6 + $0x8] sm:$0xff]  ;;  %v4303_v46 = vld [vmem:[%s11633_s6 + $0x10] sm:$0xff] }
 0x2e5   : > { %7386 = vmatprep.mubr.msk.f32.mxu0 %vm2916_vm2, %v3368_v6 }
 0x2e6   : > { %v2462_v41 = vadd.f32 %v2447_v21, %v2364_v44  ;;  %v4304_v21 = vld [vmem:[%s11633_s6 + $0x18] sm:$0xff] }
 0x2e8   : > { %7211 = vmatmul.mubr.msk.f32.gmra.mxu1 %vm2467_vm1, %v2462_v41 }
 0x2e9   : > { %7221 = vmatprep.mubr.msk.f32.mxu1 %vm2467_vm1, %v9996_v56 }
 0x2ec   : > { %7222 = vmatmul.mubr.msk.f32.vlgmr.msra.gmra.mxu1 %vm2467_vm1, %v10005_v53 }
 0x2ed   : > { %7224 = vmatprep.mubr.msk.f32.mxu1 %vm2467_vm1, %v10022_v31 }
 0x2f0   : > { %7225 = vmatmul.mubr.msk.f32.gmra.mxu1 %vm2467_vm1, %v10033_v7 }
 0x2f1   : > { %7227 = vmatprep.mubr.msk.f32.mxu1 %vm2467_vm1, %v10041_v18 }
 0x2f4   : > { %7228 = vmatmul.mubr.msk.f32.gmra.mxu1 %vm2467_vm1, %v10049_v24 }
 0x2f5   : > { %7230 = vmatprep.mubr.msk.f32.mxu1 %vm2467_vm1, %v10057_v2 }
 0x2f8   : > { %7231 = vmatmul.mubr.msk.f32.gmra.mxu1 %vm2467_vm1, %v2456_v15 }
 0x2f9   : > { %7233 = vmatprep.mubr.msk.f32.mxu1 %vm2467_vm1, %v2457_v22 }
 0x2fc   : > { %7234 = vmatmul.mubr.msk.f32.gmra.mxu1 %vm2467_vm1, %v2458_v12 }
 0x2fd   : > { %7236 = vmatprep.mubr.msk.f32.mxu1 %vm2467_vm1, %v2459_v51 }
 0x300   : > { %7237 = vmatmul.mubr.msk.f32.gmra.mxu1 %vm2467_vm1, %v2460_v33 }
 0x301   : > { %7239 = vmatprep.mubr.msk.f32.mxu1 %vm2467_vm1, %v2461_v8  ;;  %v4301_v8 = vld [vmem:[%s11633_s6] sm:$0xff] }
 0x304   : > { %7240 = vmatmul.mubr.msk.f32.gmra.mxu1 %vm2467_vm1, %v2462_v41 }
 0x305   : > { %7270 = vmatprep.mubr.msk.f32.mxu1 %vm2916_vm2, %v2840_v5 }
 0x378   : > { %v10113_v56 = vpop.f32.mrf.mxu1 }
 0x37a   : > { %v10115_v53 = vpop.f32.mrf.mxu1 }
 0x380   : > { %v7197_v35 = vpop.f32.mrf.mxu1 }
 0x382   : > { %v10117_v31 = vpop.f32.mrf.mxu1 }
 0x388   : > { %v7200_v7 = vpop.f32.mrf.mxu1 }
 0x38a   : > { %v2600_v18 = vpop.f32.mrf.mxu1 }
 0x390   : > { %v7203_v24 = vpop.f32.mrf.mxu1 }
 0x392   : > { %v2610_v2 = vpop.f32.mrf.mxu1 }
 0x398   : > { %v7206_v54 = vpop.f32.mrf.mxu1 }
 0x39a   : > { %v2620_v48 = vpop.f32.mrf.mxu1 }
 0x3a0   : > { %v7209_v50 = vpop.f32.mrf.mxu1 }
 0x3a2   : > { %v2630_v10 = vpop.f32.mrf.mxu1 }
 0x3a8   : > { %v7212_v19 = vpop.f32.mrf.mxu1 }
 0x3aa   : > { %v2640_v17 = vpop.f32.mrf.mxu1 }
 0x3ac   : > { %v7223_v15 = vpop.f32.mrf.mxu1 }
 0x3ad   : > { %v2792_v63 = vmax.f32 %v10113_v56, %v7223_v15  ;;  %v4305_v56 = vld [vmem:[%s11633_s6 + $0x20] sm:$0xff] }
 0x3ae   : > { %v2722_v28 = vpop.f32.mrf.mxu1 }
 0x3af   : > { %v2791_v27 = vmax.f32 %v10115_v53, %v2722_v28  ;;  %v10169_v13 = vmax.f32 %v2792_v63, 0.0  ;;  %v2857_v63 = vld [vmem:[#allocation2 + $0x128] sm:$0xff] }
 0x3b0   : > { %v7226_v49 = vpop.f32.mrf.mxu1 }
 0x3b1   : > { %v2794_v33 = vmax.f32 %v7197_v35, %v7226_v49  ;;  %v10173_v59 = vmax.f32 %v2791_v27, 0.0  ;;  %v4306_v35 = vld [vmem:[%s11633_s6 + $0x28] sm:$0xff] }
 0x3b2   : > { %v2732_v29 = vpop.f32.mrf.mxu1 }
 0x3b3   : > { %v2793_v62 = vmax.f32 %v10117_v31, %v2732_v29  ;;  %v10160_v9 = vmax.f32 %v2794_v33, 0.0  ;;  %v2855_v33 = vld [vmem:[#allocation2 + $0x118] sm:$0xff] }
 0x3b4   : > { %v7229_v55 = vpop.f32.mrf.mxu1 }
 0x3b5   : > { %v2796_v34 = vmax.f32 %v7200_v7, %v7229_v55  ;;  %v10165_v20 = vmax.f32 %v2793_v62, 0.0  ;;  %v4307_v7 = vld [vmem:[%s11633_s6 + $0x30] sm:$0xff]  ;;  %v2841_v55 = vld [vmem:[#allocation2 + $0xa8] sm:$0xff]  ;;  %v2856_v62 = vld [vmem:[#allocation2 + $0x120] sm:$0xff] }
 0x3b6   : > { %v2742_v45 = vpop.f32.mrf.mxu1 }
 0x3b7   : > { %v2795_v61 = vmax.f32 %v2600_v18, %v2742_v45  ;;  %v10149_v1 = vmax.f32 %v2796_v34, 0.0  ;;  %v2853_v34 = vld [vmem:[#allocation2 + $0x108] sm:$0xff] }
 0x3b8   : > { %v7232_v25 = vpop.f32.mrf.mxu1 }
 0x3b9   : > { %v2798_v51 = vmax.f32 %v7203_v24, %v7232_v25  ;;  %v10155_v16 = vmax.f32 %v2795_v61, 0.0  ;;  %v4308_v24 = vld [vmem:[%s11633_s6 + $0x38] sm:$0xff]  ;;  %v2842_v25 = vld [vmem:[#allocation2 + $0xb0] sm:$0xff] }
 0x3ba   : > { %v2752_v3 = vpop.f32.mrf.mxu1 }
 0x3bb   : > { %v2797_v36 = vmax.f32 %v2610_v2, %v2752_v3  ;;  %v10141_v39 = vmax.f32 %v2798_v51, 0.0  ;;  %v2851_v51 = vld [vmem:[#allocation2 + $0xf8] sm:$0xff] }
 0x3bc   : > { %v7235_v22 = vpop.f32.mrf.mxu1 }
 0x3bd   : > { %v2800_v43 = vmax.f32 %v7206_v54, %v7235_v22  ;;  %v10145_v23 = vmax.f32 %v2797_v36, 0.0  ;;  %v4309_v54 = vld [vmem:[%s11633_s6 + $0x40] sm:$0xff]  ;;  %v2843_v22 = vld [vmem:[#allocation2 + $0xb8] sm:$0xff] }
 0x3be   : > { %v2762_v40 = vpop.f32.mrf.mxu1  ;;  %v2852_v36 = vld [vmem:[#allocation2 + $0x100] sm:$0xff] }
 0x3bf   : > { %v2799_v52 = vmax.f32 %v2620_v48, %v2762_v40  ;;  %v10133_v37 = vmax.f32 %v2800_v43, 0.0  ;;  %v2844_v40 = vld [vmem:[#allocation2 + $0xc0] sm:$0xff]  ;;  %v2849_v43 = vld [vmem:[#allocation2 + $0xe8] sm:$0xff] }
 0x3c0   : > { %v7238_v30 = vpop.f32.mrf.mxu1 }
 0x3c1   : > { %v2802_v26 = vmax.f32 %v7209_v50, %v7238_v30  ;;  %v10137_v42 = vmax.f32 %v2799_v52, 0.0  ;;  %v4310_v50 = vld [vmem:[%s11633_s6 + $0x48] sm:$0xff] }
 0x3c2   : > { %v2772_v0 = vpop.f32.mrf.mxu1 }
 0x3c3   : > { %v2801_v32 = vmax.f32 %v2630_v10, %v2772_v0  ;;  %v10125_v14 = vmax.f32 %v2802_v26, 0.0 }
 0x3c4   : > { %v7241_v57 = vpop.f32.mrf.mxu1 }
 0x3c5   : > { %v2804_v60 = vmax.f32 %v7212_v19, %v7241_v57  ;;  %v10129_v58 = vmax.f32 %v2801_v32, 0.0  ;;  %v2845_v57 = vld [vmem:[#allocation2 + $0xc8] sm:$0xff] }
 0x3c6   : > { %v2782_v4 = vpop.f32.mrf.mxu1 }
 0x3c7   : > { %v10119_v12 = vmax.f32 %v2804_v60, 0.0  ;;  %v2803_v38 = vmax.f32 %v2640_v17, %v2782_v4  ;;  %v2846_v60 = vld [vmem:[#allocation2 + $0xd0] sm:$0xff] }
 0x3c9   : > { %v10121_v11 = vmax.f32 %v2803_v38, 0.0  ;;  %2900 = vrot.lane.b32.xlu1 %v10119_v12, %s8058_s17  ;;  %v2848_v38 = vld [vmem:[#allocation2 + $0xe0] sm:$0xff] }
 0x3cb   : > { %2898 = vrot.lane.b32.xlu0 %v10121_v11, %s8058_s17 }
 0x3cd   : > { %2896 = vrot.lane.b32.xlu1 %v10125_v14, %s8058_s17 }
 0x3cf   : > { %2894 = vrot.lane.b32.xlu0 %v10129_v58, %s8058_s17 }
 0x3d1   : > { %2892 = vrot.lane.b32.xlu1 %v10133_v37, %s8058_s17 }
 0x3d3   : > { %2890 = vrot.lane.b32.xlu0 %v10137_v42, %s8058_s17 }
 0x3d5   : > { %2888 = vrot.lane.b32.xlu1 %v10141_v39, %s8058_s17 }
 0x3d7   : > { %2886 = vrot.lane.b32.xlu0 %v10145_v23, %s8058_s17 }
 0x3d9   : > { %2884 = vrot.lane.b32.xlu1 %v10149_v1, %s8058_s17 }
 0x3db   : > { %2882 = vrot.lane.b32.xlu0 %v10155_v16, %s8058_s17 }
 0x3dd   : > { %2880 = vrot.lane.b32.xlu1 %v10160_v9, %s8058_s17 }
 0x3df   : > { %2878 = vrot.lane.b32.xlu0 %v10165_v20, %s8058_s17 }
 0x3e1   : > { %2876 = vrot.lane.b32.xlu1 %v10169_v13, %s8058_s17 }
 0x3e3   : > { %2874 = vrot.lane.b32.xlu0 %v10173_v59, %s8058_s17 }
 0x3e5   : > { %3414 = vrot.lane.b32.xlu1 %v10119_v12, %s8059_s24 }
 0x3e7   : > { %3408 = vrot.lane.b32.xlu0 %v10129_v58, %s8059_s24 }
 0x3e9   : > { %3410 = vrot.lane.b32.xlu1 %v10125_v14, %s8059_s24 }
 0x3eb   : > { %3404 = vrot.lane.b32.xlu0 %v10137_v42, %s8059_s24 }
 0x3ed   : > { %3406 = vrot.lane.b32.xlu1 %v10133_v37, %s8059_s24 }
 0x3ef   : > { %3400 = vrot.lane.b32.xlu0 %v10145_v23, %s8059_s24 }
 0x3f1   : > { %3402 = vrot.lane.b32.xlu1 %v10141_v39, %s8059_s24 }
 0x3f3   : > { %3396 = vrot.lane.b32.xlu0 %v10155_v16, %s8059_s24 }
 0x3f5   : > { %3398 = vrot.lane.b32.xlu1 %v10149_v1, %s8059_s24 }
 0x3f7   : > { %3412 = vrot.lane.b32.xlu0 %v10121_v11, %s8059_s24 }
 0x3f9   : > { %3394 = vrot.lane.b32.xlu1 %v10160_v9, %s8059_s24 }
 0x3fb   : > { %3392 = vrot.lane.b32.xlu0 %v10165_v20, %s8059_s24 }
 0x3fd   : > { %3390 = vrot.lane.b32.xlu1 %v10169_v13, %s8059_s24 }
 0x3ff   : > { %3388 = vrot.lane.b32.xlu0 %v10173_v59, %s8059_s24 }
 0x401   : > { %3722 = vrot.lane.b32.xlu1 %v10119_v12, %s11663_s26 }
 0x403   : > { %3718 = vrot.lane.b32.xlu0 %v10125_v14, %s11663_s26 }
 0x405   : > { %4030 = vrot.lane.b32.xlu1 %v10119_v12, %s11664_s20 }
 0x407   : > { %3716 = vrot.lane.b32.xlu0 %v10129_v58, %s11663_s26 }
 0x409   : > { %4026 = vrot.lane.b32.xlu1 %v10125_v14, %s11664_s20 }
 0x40b   : > { %3714 = vrot.lane.b32.xlu0 %v10133_v37, %s11663_s26 }
 0x40d   : > { %4024 = vrot.lane.b32.xlu1 %v10129_v58, %s11664_s20 }
 0x40f   : > { %3712 = vrot.lane.b32.xlu0 %v10137_v42, %s11663_s26 }
 0x411   : > { %4022 = vrot.lane.b32.xlu1 %v10133_v37, %s11664_s20 }
 0x413   : > { %3710 = vrot.lane.b32.xlu0 %v10141_v39, %s11663_s26 }
 0x415   : > { %4020 = vrot.lane.b32.xlu1 %v10137_v42, %s11664_s20 }
 0x417   : > { %3708 = vrot.lane.b32.xlu0 %v10145_v23, %s11663_s26 }
 0x419   : > { %4018 = vrot.lane.b32.xlu1 %v10141_v39, %s11664_s20 }
 0x41b   : > { %3720 = vrot.lane.b32.xlu0 %v10121_v11, %s11663_s26 }
 0x41d   : > { %4028 = vrot.lane.b32.xlu1 %v10121_v11, %s11664_s20 }
 0x41f   : > { %3706 = vrot.lane.b32.xlu0 %v10149_v1, %s11663_s26 }
 0x421   : > { %4016 = vrot.lane.b32.xlu1 %v10145_v23, %s11664_s20 }
 0x423   : > { %3704 = vrot.lane.b32.xlu0 %v10155_v16, %s11663_s26 }
 0x425   : > { %4014 = vrot.lane.b32.xlu1 %v10149_v1, %s11664_s20 }
 0x427   : > { %3702 = vrot.lane.b32.xlu0 %v10160_v9, %s11663_s26 }
 0x429   : > { %4012 = vrot.lane.b32.xlu1 %v10155_v16, %s11664_s20 }
 0x42b   : > { %3700 = vrot.lane.b32.xlu0 %v10165_v20, %s11663_s26 }
 0x42d   : > { %4010 = vrot.lane.b32.xlu1 %v10160_v9, %s11664_s20 }
 0x42f   : > { %3698 = vrot.lane.b32.xlu0 %v10169_v13, %s11663_s26 }
 0x431   : > { %4008 = vrot.lane.b32.xlu1 %v10165_v20, %s11664_s20 }
 0x433   : > { %3696 = vrot.lane.b32.xlu0 %v10173_v59, %s11663_s26 }
 0x435   : > { %4006 = vrot.lane.b32.xlu1 %v10169_v13, %s11664_s20 }
 0x437   : > { %4004 = vrot.lane.b32.xlu0 %v10173_v59, %s11664_s20 }
 0x439   : > { %4313 = vperm.xlu1 %8012, %v4301_v8  }
 0x43b   : > { %v2901_v44 = vpop.permute.xlu1 %2900  ;;  %4318 = vperm.xlu0 %8011, %v4302_v47   ;;  %v2820_v47 = vld [vmem:[#allocation2 + $0x8] sm:$0xff] }
 0x43c   : > { %7242 = vmatprep.subr.mxu1 %v2901_v44 }
 0x43d   : > { %7243 = vmatpush3.msra.mxu1 %v2901_v44  ;;  %4323 = vperm.xlu1 %8012, %v4303_v46   ;;  %v2899_v41 = vpop.permute.xlu0 %2898  ;;  %v2821_v44 = vld [vmem:[#allocation2 + $0x10] sm:$0xff] }
 0x43e   : > { %7244 = vmatprep.subr.mxu1 %v2899_v41 }
 0x43f   : > { %v2897_v53 = vpop.permute.xlu1 %2896  ;;  %4328 = vperm.xlu0 %8011, %v4304_v21   ;;  %7245 = vmatpush3.msra.mxu1 %v2899_v41  ;;  %v2822_v41 = vld [vmem:[#allocation2 + $0x18] sm:$0xff] }
 0x440   : > { %7246 = vmatprep.subr.mxu1 %v2897_v53 }
 0x441   : > { %4333 = vperm.xlu1 %8012, %v4305_v56   ;;  %7247 = vmatpush3.msra.mxu1 %v2897_v53  ;;  %v2895_v31 = vpop.permute.xlu0 %2894  ;;  %v3369_v56 = vld [vmem:[#allocation2 + $0x148] sm:$0xff]  ;;  %v2823_v53 = vld [vmem:[#allocation2 + $0x20] sm:$0xff] }
 0x442   : > { %7248 = vmatprep.subr.mxu1 %v2895_v31 }
 0x443   : > { %v2893_v18 = vpop.permute.xlu1 %2892  ;;  %4338 = vperm.xlu0 %8011, %v4306_v35   ;;  %7249 = vmatpush3.msra.mxu1 %v2895_v31  ;;  %v3370_v31 = vld [vmem:[#allocation2 + $0x150] sm:$0xff] }
 0x444   : > { %7250 = vmatprep.subr.mxu1 %v2893_v18 }
 0x445   : > { %4343 = vperm.xlu1 %8012, %v4307_v7   ;;  %7251 = vmatpush3.msra.mxu1 %v2893_v18  ;;  %v2891_v2 = vpop.permute.xlu0 %2890  ;;  %v2824_v18 = vld [vmem:[#allocation2 + $0x28] sm:$0xff] }
 0x446   : > { %7252 = vmatprep.subr.mxu1 %v2891_v2 }
 0x447   : > { %v2889_v48 = vpop.permute.xlu1 %2888  ;;  %4348 = vperm.xlu0 %8011, %v4308_v24   ;;  %7253 = vmatpush3.msra.mxu1 %v2891_v2  ;;  %v3371_v24 = vld [vmem:[#allocation2 + $0x158] sm:$0xff]  ;;  %v2825_v2 = vld [vmem:[#allocation2 + $0x30] sm:$0xff] }
 0x448   : > { %7254 = vmatprep.subr.mxu1 %v2889_v48 }
 0x449   : > { %4353 = vperm.xlu1 %8012, %v4309_v54   ;;  %7255 = vmatpush3.msra.mxu1 %v2889_v48  ;;  %v2887_v10 = vpop.permute.xlu0 %2886  ;;  %v3372_v54 = vld [vmem:[#allocation2 + $0x160] sm:$0xff] }
 0x44a   : > { %7256 = vmatprep.subr.mxu1 %v2887_v10 }
 0x44b   : > { %v2885_v19 = vpop.permute.xlu1 %2884  ;;  %4358 = vperm.xlu0 %8011, %v4310_v50   ;;  %7257 = vmatpush3.msra.mxu1 %v2887_v10  ;;  %v2826_v10 = vld [vmem:[#allocation2 + $0x38] sm:$0xff] }
 0x44c   : > { %7258 = vmatprep.subr.mxu1 %v2885_v19 }
 0x44d   : > { %7259 = vmatpush3.msra.mxu1 %v2885_v19  ;;  %v2883_v17 = vpop.permute.xlu0 %2882  ;;  %v3373_v19 = vld [vmem:[#allocation2 + $0x168] sm:$0xff] }
 0x44e   : > { %7260 = vmatprep.subr.mxu1 %v2883_v17 }
 0x44f   : > { %v2881_v15 = vpop.permute.xlu1 %2880  ;;  %7261 = vmatpush3.msra.mxu1 %v2883_v17  ;;  %v2827_v17 = vld [vmem:[#allocation2 + $0x40] sm:$0xff] }
 0x450   : > { %7262 = vmatprep.subr.mxu1 %v2881_v15 }
 0x451   : > { %7263 = vmatpush3.msra.mxu1 %v2881_v15  ;;  %v2879_v28 = vpop.permute.xlu0 %2878 }
 0x452   : > { %7264 = vmatprep.subr.mxu1 %v2879_v28 }
 0x453   : > { %v2877_v49 = vpop.permute.xlu1 %2876  ;;  %7265 = vmatpush3.msra.mxu1 %v2879_v28  ;;  %v3374_v28 = vld [vmem:[#allocation2 + $0x170] sm:$0xff] }
 0x454   : > { %7266 = vmatprep.subr.mxu1 %v2877_v49 }
 0x455   : > { %7267 = vmatpush3.msra.mxu1 %v2877_v49  ;;  %v2875_v29 = vpop.permute.xlu0 %2874 }
 0x456   : > { %7268 = vmatprep.subr.mxu1 %v2875_v29 }
 0x457   : > { %v3415_v45 = vpop.permute.xlu1 %3414  ;;  %7269 = vmatpush3.msra.mxu1 %v2875_v29  ;;  %v2828_v29 = vld [vmem:[#allocation2 + $0x48] sm:$0xff] }
 0x458   : > { %7271 = vmatmul.mubr.msk.f32.vlgmr.msra.gmra.mxu1 %vm2916_vm2, %v2841_v55  ;;  %7300 = vmatprep.subr.mxu1 %v10119_v12  ;;  %v3375_v55 = vld [vmem:[#allocation2 + $0x178] sm:$0xff] }
 0x459   : > { %7358 = vmatprep.subr.mxu0 %v3415_v45  ;;  %7301 = vmatpush3.msra.mxu1 %v10119_v12  ;;  %v3409_v3 = vpop.permute.xlu0 %3408  ;;  %v2847_v12 = vld [vmem:[#allocation2 + $0xd8] sm:$0xff] }
 0x45a   : > { %7359 = vmatpush3.msra.mxu0 %v3415_v45  ;;  %7302 = vmatprep.subr.mxu1 %v10121_v11 }
 0x45b   : > { %v3411_v30 = vpop.permute.xlu1 %3410  ;;  %7273 = vmatprep.mubr.msk.f32.mxu1 %vm2916_vm2, %v2842_v25  ;;  %7303 = vmatpush3.msra.mxu1 %v10121_v11  ;;  %v2829_v25 = vld [vmem:[#allocation2 + $0x50] sm:$0xff] }
 0x45c   : > { %7274 = vmatmul.mubr.msk.f32.gmra.mxu1 %vm2916_vm2, %v2843_v22  ;;  %7304 = vmatprep.subr.mxu1 %v10125_v14 }
 0x45d   : > { %7305 = vmatpush3.msra.mxu1 %v10125_v14  ;;  %v10303_v0 = vpop.permute.xlu0 %3404  ;;  %7276 = vmatprep.mubr.msk.f32.mxu1 %vm2916_vm2, %v2844_v40  ;;  %v2850_v14 = vld [vmem:[#allocation2 + $0xf0] sm:$0xff]  ;;  %v2830_v40 = vld [vmem:[#allocation2 + $0x58] sm:$0xff] }
 0x45e   : > { %7306 = vmatprep.subr.mxu1 %v10129_v58 }
 0x45f   : > { %v3407_v4 = vpop.permute.xlu1 %3406  ;;  %7307 = vmatpush3.msra.mxu1 %v10129_v58 }
 0x460   : > { %7277 = vmatmul.mubr.msk.f32.gmra.mxu1 %vm2916_vm2, %v2845_v57  ;;  %7308 = vmatprep.subr.mxu1 %v10133_v37  ;;  %v2831_v57 = vld [vmem:[#allocation2 + $0x60] sm:$0xff] }
 0x461   : > { %7309 = vmatpush3.msra.mxu1 %v10133_v37  ;;  %v10311_v26 = vpop.permute.xlu0 %3400  ;;  %7279 = vmatprep.mubr.msk.f32.mxu1 %vm2916_vm2, %v2846_v60  ;;  %v3378_v60 = vld [vmem:[#allocation2 + $0x190] sm:$0xff] }
 0x462   : > { %7310 = vmatprep.subr.mxu1 %v10137_v42 }
 0x463   : > { %v3403_v32 = vpop.permute.xlu1 %3402  ;;  %7311 = vmatpush3.msra.mxu1 %v10137_v42 }
 0x464   : > { %7280 = vmatmul.mubr.msk.f32.gmra.mxu1 %vm2916_vm2, %v2847_v12  ;;  %7312 = vmatprep.subr.mxu1 %v10141_v39  ;;  %v3379_v12 = vld [vmem:[#allocation2 + $0x198] sm:$0xff] }
 0x465   : > { %7313 = vmatpush3.msra.mxu1 %v10141_v39  ;;  %v10319_v11 = vpop.permute.xlu0 %3396  ;;  %7282 = vmatprep.mubr.msk.f32.mxu1 %vm2916_vm2, %v2848_v38 }
 0x466   : > { %7314 = vmatprep.subr.mxu1 %v10145_v23 }
 0x467   : > { %v3399_v52 = vpop.permute.xlu1 %3398  ;;  %7315 = vmatpush3.msra.mxu1 %v10145_v23  ;;  %v2854_v23 = vld [vmem:[#allocation2 + $0x110] sm:$0xff] }
 0x468   : > { %7283 = vmatmul.mubr.msk.f32.gmra.mxu1 %vm2916_vm2, %v2849_v43  ;;  %7316 = vmatprep.subr.mxu1 %v10149_v1 }
 0x469   : > { %7317 = vmatpush3.msra.mxu1 %v10149_v1  ;;  %v3413_v58 = vpop.permute.xlu0 %3412  ;;  %7285 = vmatprep.mubr.msk.f32.mxu1 %vm2916_vm2, %v2850_v14  ;;  %v2834_v14 = vld [vmem:[#allocation2 + $0x78] sm:$0xff] }
 0x46a   : > { %7318 = vmatprep.subr.mxu1 %v10155_v16  ;;  %7360 = vmatprep.subr.mxu0 %v3413_v58 }
 0x46b   : > { %v3395_v37 = vpop.permute.xlu1 %3394  ;;  %7319 = vmatpush3.msra.mxu1 %v10155_v16  ;;  %7361 = vmatpush3.msra.mxu0 %v3413_v58 }
 0x46c   : > { %7286 = vmatmul.mubr.msk.f32.gmra.mxu1 %vm2916_vm2, %v2851_v51  ;;  %7320 = vmatprep.subr.mxu1 %v10160_v9  ;;  %v2835_v51 = vld [vmem:[#allocation2 + $0x80] sm:$0xff] }
 0x46d   : > { %7362 = vmatprep.subr.mxu0 %v3411_v30  ;;  %7321 = vmatpush3.msra.mxu1 %v10160_v9  ;;  %v3393_v42 = vpop.permute.xlu0 %3392  ;;  %v2858_v9 = vld [vmem:[#allocation2 + $0x130] sm:$0xff] }
 0x46e   : > { %7363 = vmatpush3.msra.mxu0 %v3411_v30  ;;  %7322 = vmatprep.subr.mxu1 %v10165_v20  ;;  %v3377_v30 = vld [vmem:[#allocation2 + $0x188] sm:$0xff] }
 0x46f   : > { %7364 = vmatprep.subr.mxu0 %v3409_v3  ;;  %v3391_v39 = vpop.permute.xlu1 %3390  ;;  %7288 = vmatprep.mubr.msk.f32.mxu1 %vm2916_vm2, %v2852_v36 }
 0x470   : > { %7323 = vmatpush3.msra.mxu1 %v10165_v20  ;;  %7365 = vmatpush3.msra.mxu0 %v3409_v3  ;;  %v3376_v3 = vld [vmem:[#allocation2 + $0x180] sm:$0xff] }
 0x471   : > { %7289 = vmatmul.mubr.msk.f32.gmra.mxu1 %vm2916_vm2, %v2853_v34  ;;  %7324 = vmatprep.subr.mxu1 %v10169_v13  ;;  %v3389_v61 = vpop.permute.xlu0 %3388  ;;  %v3383_v34 = vld [vmem:[#allocation2 + $0x1b8] sm:$0xff] }
 0x472   : > { %7366 = vmatprep.subr.mxu0 %v3407_v4  ;;  %7325 = vmatpush3.msra.mxu1 %v10169_v13  ;;  %v2859_v13 = vld [vmem:[#allocation2 + $0x138] sm:$0xff] }
 0x473   : > { %7367 = vmatpush3.msra.mxu0 %v3407_v4  ;;  %7326 = vmatprep.subr.mxu1 %v10173_v59  ;;  %v3723_v5 = vpop.permute.xlu1 %3722 }
 0x474   : > { %7368 = vmatprep.subr.mxu0 %v10303_v0  ;;  %7291 = vmatprep.mubr.msk.f32.mxu1 %vm2916_vm2, %v2854_v23  ;;  %v3384_v23 = vld [vmem:[#allocation2 + $0x1c0] sm:$0xff] }
 0x475   : > { %7327 = vmatpush3.msra.mxu1 %v10173_v59  ;;  %7369 = vmatpush3.msra.mxu0 %v10303_v0  ;;  %v10344_v1 = vpop.permute.xlu0 %3718  ;;  %v2819_v59 = vld [vmem:[#allocation2] sm:$0xff] }
 0x476   : > { %7292 = vmatmul.mubr.msk.f32.gmra.mxu1 %vm2916_vm2, %v2855_v33  ;;  %7370 = vmatprep.subr.mxu0 %v3403_v32  ;;  %v2838_v33 = vld [vmem:[#allocation2 + $0x98] sm:$0xff] }
 0x477   : > { %7416 = vmatprep.subr.mxu1 %v3723_v5  ;;  %7371 = vmatpush3.msra.mxu0 %v3403_v32  ;;  %v4031_v16 = vpop.permute.xlu1 %4030  ;;  %v2833_v32 = vld [vmem:[#allocation2 + $0x70] sm:$0xff] }
 0x478   : > { %7372 = vmatprep.subr.mxu0 %v10311_v26  ;;  %7294 = vmatprep.mubr.msk.f32.mxu1 %vm2916_vm2, %v2856_v62 }
 0x479   : > { %7373 = vmatpush3.msra.mxu0 %v10311_v26  ;;  %v10350_v27 = vpop.permute.xlu0 %3716  ;;  %v2832_v26 = vld [vmem:[#allocation2 + $0x68] sm:$0xff] }
 0x47a   : > { %7295 = vmatmul.mubr.msk.f32.gmra.mxu1 %vm2916_vm2, %v2857_v63  ;;  %7374 = vmatprep.subr.mxu0 %v3399_v52  ;;  %v3676_v63 = vld [vmem:[#allocation2 + $0x1e0] sm:$0xff] }
 0x47b   : > { %7375 = vmatpush3.msra.mxu0 %v3399_v52  ;;  %v10353_v20 = vpop.permute.xlu1 %4026  ;;  %7297 = vmatprep.mubr.msk.f32.mxu1 %vm2916_vm2, %v2858_v9  ;;  %v3381_v52 = vld [vmem:[#allocation2 + $0x1a8] sm:$0xff]  ;;  %v3387_v9 = vld [vmem:[#allocation2 + $0x1d8] sm:$0xff] }
 0x47c   : > { %7376 = vmatprep.subr.mxu0 %v10319_v11 }
 0x47d   : > { %7377 = vmatpush3.msra.mxu0 %v10319_v11  ;;  %v10358_v6 = vpop.permute.xlu0 %3714  ;;  %v3380_v11 = vld [vmem:[#allocation2 + $0x1a0] sm:$0xff] }
 0x47e   : > { %7298 = vmatmul.mubr.msk.f32.gmra.mxu1 %vm2916_vm2, %v2859_v13  ;;  %7378 = vmatprep.subr.mxu0 %v3395_v37  ;;  %v3678_v13 = vld [vmem:[#allocation2 + $0x1f0] sm:$0xff] }
 0x47f   : > { %7379 = vmatpush3.msra.mxu0 %v3395_v37  ;;  %v10361_v8 = vpop.permute.xlu1 %4024  ;;  %7328 = vmatprep.mubr.msk.f32.mxu1 %vm2916_vm2, %v2819_v59  ;;  %v3382_v37 = vld [vmem:[#allocation2 + $0x1b0] sm:$0xff]  ;;  %v3984_v59 = vld [vmem:[#allocation2 + $0x280] sm:$0xff] }
 0x480   : > { %7380 = vmatprep.subr.mxu0 %v3393_v42 }
 0x481   : > { %7381 = vmatpush3.msra.mxu0 %v3393_v42  ;;  %v10364_v46 = vpop.permute.xlu0 %3712  ;;  %v2836_v42 = vld [vmem:[#allocation2 + $0x88] sm:$0xff] }
 0x482   : > { %7329 = vmatmul.mubr.msk.f32.vlgmr.msra.gmra.mxu1 %vm2916_vm2, %v2820_v47  ;;  %7382 = vmatprep.subr.mxu0 %v3391_v39  ;;  %v3985_v47 = vld [vmem:[#allocation2 + $0x288] sm:$0xff] }
 0x483   : > { %7417 = vmatpush3.msra.mxu1 %v3723_v5  ;;  %7383 = vmatpush3.msra.mxu0 %v3391_v39  ;;  %v10367_v21 = vpop.permute.xlu1 %4022 }
 0x484   : > { %7384 = vmatprep.subr.mxu0 %v3389_v61  ;;  %7331 = vmatprep.mubr.msk.f32.mxu1 %vm2916_vm2, %v2821_v44  ;;  %v3986_v44 = vld [vmem:[#allocation2 + $0x290] sm:$0xff] }
 0x485   : > { %7385 = vmatpush3.msra.mxu0 %v3389_v61  ;;  %v10370_v35 = vpop.permute.xlu0 %3710  ;;  %v2837_v61 = vld [vmem:[#allocation2 + $0x90] sm:$0xff] }
 0x486   : > { %7332 = vmatmul.mubr.msk.f32.gmra.mxu1 %vm2916_vm2, %v2822_v41  ;;  %7387 = vmatmul.mubr.msk.f32.vlgmr.msra.gmra.mxu0 %vm2916_vm2, %v3369_v56  ;;  %v3987_v41 = vld [vmem:[#allocation2 + $0x298] sm:$0xff]  ;;  %v3682_v56 = vld [vmem:[#allocation2 + $0x210] sm:$0xff] }
 0x487   : > { %7474 = vmatprep.subr.mxu0 %v4031_v16  ;;  %v10374_v7 = vpop.permute.xlu1 %4020  ;;  %7334 = vmatprep.mubr.msk.f32.mxu1 %vm2916_vm2, %v2823_v53  ;;  %v3988_v53 = vld [vmem:[#allocation2 + $0x2a0] sm:$0xff] }
 0x488   : > { %7475 = vmatpush3.msra.mxu0 %v4031_v16  ;;  %7389 = vmatprep.mubr.msk.f32.mxu0 %vm2916_vm2, %v3370_v31  ;;  %v3386_v16 = vld [vmem:[#allocation2 + $0x1d0] sm:$0xff]  ;;  %v3989_v31 = vld [vmem:[#allocation2 + $0x2a8] sm:$0xff] }
 0x489   : > { %v10378_v48 = vpop.permute.xlu0 %3708 }
 0x48a   : > { %7335 = vmatmul.mubr.msk.f32.gmra.mxu1 %vm2916_vm2, %v2824_v18  ;;  %7390 = vmatmul.mubr.msk.f32.gmra.mxu0 %vm2916_vm2, %v3371_v24  ;;  %v3990_v18 = vld [vmem:[#allocation2 + $0x2b0] sm:$0xff]  ;;  %v3685_v24 = vld [vmem:[#allocation2 + $0x228] sm:$0xff] }
 0x48b   : > { %v10382_v50 = vpop.permute.xlu1 %4018  ;;  %7337 = vmatprep.mubr.msk.f32.mxu1 %vm2916_vm2, %v2825_v2  ;;  %7392 = vmatprep.mubr.msk.f32.mxu0 %vm2916_vm2, %v3372_v54  ;;  %v3991_v2 = vld [vmem:[#allocation2 + $0x2b8] sm:$0xff]  ;;  %v3686_v54 = vld [vmem:[#allocation2 + $0x230] sm:$0xff] }
 0x48d   : > { %v3721_v15 = vpop.permute.xlu0 %3720 }
 0x48e   : > { %7338 = vmatmul.mubr.msk.f32.gmra.mxu1 %vm2916_vm2, %v2826_v10  ;;  %7393 = vmatmul.mubr.msk.f32.gmra.mxu0 %vm2916_vm2, %v3373_v19  ;;  %v3993_v10 = vld [vmem:[#allocation2 + $0x2c8] sm:$0xff]  ;;  %v3688_v19 = vld [vmem:[#allocation2 + $0x240] sm:$0xff] }
 0x48f   : > { %7418 = vmatprep.subr.mxu1 %v3721_v15  ;;  %v4029_v49 = vpop.permute.xlu1 %4028  ;;  %7340 = vmatprep.mubr.msk.f32.mxu1 %vm2916_vm2, %v2827_v17  ;;  %v3994_v17 = vld [vmem:[#allocation2 + $0x2d0] sm:$0xff] }
 0x490   : > { %7395 = vmatprep.mubr.msk.f32.mxu0 %vm2916_vm2, %v3374_v28  ;;  %7419 = vmatpush3.msra.mxu1 %v3721_v15  ;;  %v3689_v15 = vld [vmem:[#allocation2 + $0x248] sm:$0xff]  ;;  %v3995_v28 = vld [vmem:[#allocation2 + $0x2d8] sm:$0xff] }
 0x491   : > { %7420 = vmatprep.subr.mxu1 %v10344_v1  ;;  %7476 = vmatprep.subr.mxu0 %v4029_v49  ;;  %v3707_v45 = vpop.permute.xlu0 %3706 }
 0x492   : > { %7341 = vmatmul.mubr.msk.f32.gmra.mxu1 %vm2916_vm2, %v2828_v29  ;;  %7396 = vmatmul.mubr.msk.f32.gmra.mxu0 %vm2916_vm2, %v3375_v55  ;;  %v3996_v29 = vld [vmem:[#allocation2 + $0x2e0] sm:$0xff]  ;;  %v3691_v55 = vld [vmem:[#allocation2 + $0x258] sm:$0xff] }
 0x493   : > { %7421 = vmatpush3.msra.mxu1 %v10344_v1  ;;  %7477 = vmatpush3.msra.mxu0 %v4029_v49  ;;  %v4017_v22 = vpop.permute.xlu1 %4016  ;;  %v3385_v1 = vld [vmem:[#allocation2 + $0x1c8] sm:$0xff]  ;;  %v3690_v49 = vld [vmem:[#allocation2 + $0x250] sm:$0xff] }
 0x494   : > { %7422 = vmatprep.subr.mxu1 %v10350_v27  ;;  %7478 = vmatprep.subr.mxu0 %v10353_v20 }
 0x495   : > { %7343 = vmatprep.mubr.msk.f32.mxu1 %vm2916_vm2, %v2829_v25  ;;  %7398 = vmatprep.mubr.msk.f32.mxu0 %vm2916_vm2, %v3376_v3  ;;  %v3705_v0 = vpop.permute.xlu0 %3704  ;;  %v3692_v25 = vld [vmem:[#allocation2 + $0x260] sm:$0xff]  ;;  %v3998_v3 = vld [vmem:[#allocation2 + $0x2f0] sm:$0xff] }
 0x496   : > { %7423 = vmatpush3.msra.mxu1 %v10350_v27  ;;  %7479 = vmatpush3.msra.mxu0 %v10353_v20  ;;  %v3677_v27 = vld [vmem:[#allocation2 + $0x1e8] sm:$0xff] }
 0x497   : > { %7344 = vmatmul.mubr.msk.f32.gmra.mxu1 %vm2916_vm2, %v2830_v40  ;;  %7399 = vmatmul.mubr.msk.f32.gmra.mxu0 %vm2916_vm2, %v3377_v30  ;;  %v4015_v4 = vpop.permute.xlu1 %4014  ;;  %v3999_v40 = vld [vmem:[#allocation2 + $0x2f8] sm:$0xff]  ;;  %v3694_v30 = vld [vmem:[#allocation2 + $0x270] sm:$0xff] }
 0x498   : > { %7424 = vmatprep.subr.mxu1 %v10358_v6  ;;  %7480 = vmatprep.subr.mxu0 %v10361_v8 }
 0x499   : > { %7425 = vmatpush3.msra.mxu1 %v10358_v6  ;;  %7481 = vmatpush3.msra.mxu0 %v10361_v8  ;;  %v3703_v38 = vpop.permute.xlu0 %3702  ;;  %v3679_v8 = vld [vmem:[#allocation2 + $0x1f8] sm:$0xff] }
 0x49a   : > { %7426 = vmatprep.subr.mxu1 %v10364_v46  ;;  %7482 = vmatprep.subr.mxu0 %v10367_v21 }
 0x49b   : > { %7346 = vmatprep.mubr.msk.f32.mxu1 %vm2916_vm2, %v2831_v57  ;;  %7401 = vmatprep.mubr.msk.f32.mxu0 %vm2916_vm2, %v3378_v60  ;;  %v4013_v43 = vpop.permute.xlu1 %4012  ;;  %v3695_v57 = vld [vmem:[#allocation2 + $0x278] sm:$0xff]  ;;  %v4001_v60 = vld [vmem:[#allocation2 + $0x308] sm:$0xff] }
 0x49c   : > { %7427 = vmatpush3.msra.mxu1 %v10364_v46  ;;  %7483 = vmatpush3.msra.mxu0 %v10367_v21  ;;  %v3680_v46 = vld [vmem:[#allocation2 + $0x200] sm:$0xff]  ;;  %v3681_v21 = vld [vmem:[#allocation2 + $0x208] sm:$0xff] }
 0x49d   : > { %7347 = vmatmul.mubr.msk.f32.gmra.mxu1 %vm2916_vm2, %v2832_v26  ;;  %7402 = vmatmul.mubr.msk.f32.gmra.mxu0 %vm2916_vm2, %v3379_v12  ;;  %v3701_v58 = vpop.permute.xlu0 %3700  ;;  %v4003_v26 = vld [vmem:[#allocation2 + $0x318] sm:$0xff]  ;;  %v4372_v12 = vld [vmem:[%s11634_s7 + $0x8] sm:$0x3] }
 0x49e   : > { %7428 = vmatprep.subr.mxu1 %v10370_v35  ;;  %7484 = vmatprep.subr.mxu0 %v10374_v7 }
 0x49f   : > { %7429 = vmatpush3.msra.mxu1 %v10370_v35  ;;  %7485 = vmatpush3.msra.mxu0 %v10374_v7  ;;  %v4011_v36 = vpop.permute.xlu1 %4010  ;;  %v3683_v35 = vld [vmem:[#allocation2 + $0x218] sm:$0xff]  ;;  %v3684_v7 = vld [vmem:[#allocation2 + $0x220] sm:$0xff] }
 0x4a0   : > { %7430 = vmatprep.subr.mxu1 %v10378_v48  ;;  %7486 = vmatprep.subr.mxu0 %v10382_v50 }
 0x4a1   : > { %7349 = vmatprep.mubr.msk.f32.mxu1 %vm2916_vm2, %v2833_v32  ;;  %7404 = vmatprep.mubr.msk.f32.mxu0 %vm2916_vm2, %v3380_v11  ;;  %v3699_v39 = vpop.permute.xlu0 %3698  ;;  %v4371_v32 = vld [vmem:[%s11634_s7] sm:$0xff] }
 0x4a2   : > { %7431 = vmatpush3.msra.mxu1 %v10378_v48  ;;  %7487 = vmatpush3.msra.mxu0 %v10382_v50  ;;  %v3992_v48 = vld [vmem:[#allocation2 + $0x2c0] sm:$0xff]  ;;  %v3687_v50 = vld [vmem:[#allocation2 + $0x238] sm:$0xff] }
 0x4a3   : > { %7350 = vmatmul.mubr.msk.f32.gmra.mxu1 %vm2916_vm2, %v2834_v14  ;;  %7405 = vmatmul.mubr.msk.f32.gmra.mxu0 %vm2916_vm2, %v3381_v52  ;;  %v4009_v5 = vpop.permute.xlu1 %4008  ;;  %v4523_v11 = vld [vmem:[%s11635_s8] sm:$0xff] }
 0x4a4   : > { %7432 = vmatprep.subr.mxu1 %v3707_v45  ;;  %7488 = vmatprep.subr.mxu0 %v4017_v22 }
 0x4a5   : > { %7433 = vmatpush3.msra.mxu1 %v3707_v45  ;;  %7489 = vmatpush3.msra.mxu0 %v4017_v22  ;;  %v3697_v62 = vpop.permute.xlu0 %3696  ;;  %v3997_v45 = vld [vmem:[#allocation2 + $0x2e8] sm:$0xff] }
 0x4a6   : > { %7434 = vmatprep.subr.mxu1 %v3705_v0  ;;  %7490 = vmatprep.subr.mxu0 %v4015_v4  ;;  %v3693_v22 = vld [vmem:[#allocation2 + $0x268] sm:$0xff] }
 0x4a7   : > { %7352 = vmatprep.mubr.msk.f32.mxu1 %vm2916_vm2, %v2835_v51  ;;  %7407 = vmatprep.mubr.msk.f32.mxu0 %vm2916_vm2, %v3382_v37  ;;  %v4007_v20 = vpop.permute.xlu1 %4006 }
 0x4a8   : > { %7435 = vmatpush3.msra.mxu1 %v3705_v0  ;;  %7491 = vmatpush3.msra.mxu0 %v4015_v4  ;;  %v4000_v0 = vld [vmem:[#allocation2 + $0x300] sm:$0xff]  ;;  %v4002_v4 = vld [vmem:[#allocation2 + $0x310] sm:$0xff] }
 0x4a9   : > { %7353 = vmatmul.mubr.msk.f32.gmra.mxu1 %vm2916_vm2, %v2836_v42  ;;  %7408 = vmatmul.mubr.msk.f32.gmra.mxu0 %vm2916_vm2, %v3383_v34  ;;  %v4005_v6 = vpop.permute.xlu0 %4004 }
 0x4aa   : > { %7436 = vmatprep.subr.mxu1 %v3703_v38  ;;  %7492 = vmatprep.subr.mxu0 %v4013_v43 }
 0x4ab   : > { %7437 = vmatpush3.msra.mxu1 %v3703_v38  ;;  %7493 = vmatpush3.msra.mxu0 %v4013_v43  ;;  %v4524_v38 = vld [vmem:[%s11635_s8 + $0x8] sm:$0x3]  ;;  %v11665_v43 = vmov 0.0  }
 0x4ac   : > { %7438 = vmatprep.subr.mxu1 %v3701_v58  ;;  %7494 = vmatprep.subr.mxu0 %v4011_v36 }
 0x4ad   : > { %7355 = vmatprep.mubr.msk.f32.mxu1 %vm2916_vm2, %v2837_v61  ;;  %7410 = vmatprep.mubr.msk.f32.mxu0 %vm2916_vm2, %v3384_v23 }
 0x4ae   : > { %7439 = vmatpush3.msra.mxu1 %v3701_v58  ;;  %7495 = vmatpush3.msra.mxu0 %v4011_v36 }
 0x4af   : > { %7356 = vmatmul.mubr.msk.f32.gmra.mxu1 %vm2916_vm2, %v2838_v33  ;;  %7411 = vmatmul.mubr.msk.f32.gmra.mxu0 %vm2916_vm2, %v3385_v1 }
 0x4b0   : > { %7440 = vmatprep.subr.mxu1 %v3699_v39  ;;  %7496 = vmatprep.subr.mxu0 %v4009_v5 }
 0x4b1   : > { %7441 = vmatpush3.msra.mxu1 %v3699_v39  ;;  %7497 = vmatpush3.msra.mxu0 %v4009_v5 }
 0x4b2   : > { %7442 = vmatprep.subr.mxu1 %v3697_v62  ;;  %7413 = vmatprep.mubr.msk.f32.mxu0 %vm2916_vm2, %v3386_v16 }
 0x4b3   : > { %7443 = vmatpush3.msra.mxu1 %v3697_v62  ;;  %7444 = vmatprep.mubr.msk.f32.mxu1 %vm2916_vm2, %v3676_v63 }
 0x4b4   : > { %7414 = vmatmul.mubr.msk.f32.gmra.mxu0 %vm2916_vm2, %v3387_v9  ;;  %7445 = vmatmul.mubr.msk.f32.vlgmr.msra.gmra.mxu1 %vm2916_vm2, %v3677_v27 }
 0x4b5   : > { %7498 = vmatprep.subr.mxu0 %v4007_v20  ;;  %7447 = vmatprep.mubr.msk.f32.mxu1 %vm2916_vm2, %v3678_v13 }
 0x4b6   : > { %7499 = vmatpush3.msra.mxu0 %v4007_v20  ;;  %7502 = vmatprep.mubr.msk.f32.mxu0 %vm2916_vm2, %v3984_v59 }
 0x4b7   : > { %7500 = vmatprep.subr.mxu0 %v4005_v6  ;;  %7532 = vmatprep.subr.msk.mxu1 %vm4404_vm3, %v4372_v12 }
 0x4b8   : > { %7501 = vmatpush3.msra.mxu0 %v4005_v6  ;;  %7448 = vmatmul.mubr.msk.f32.gmra.mxu1 %vm2916_vm2, %v3679_v8 }
 0x4b9   : > { %7503 = vmatmul.mubr.msk.f32.vlgmr.msra.gmra.mxu0 %vm2916_vm2, %v3985_v47  ;;  %7450 = vmatprep.mubr.msk.f32.mxu1 %vm2916_vm2, %v3680_v46 }
 0x4ba   : > { %7505 = vmatprep.mubr.msk.f32.mxu0 %vm2916_vm2, %v3986_v44  ;;  %7551 = vmatprep.subr.msk.mxu0 %vm4404_vm3, %v4524_v38 }
 0x4bb   : > { %7533 = vmatpush3.msk.msra.mxu1 %vm4404_vm3, %v4372_v12  ;;  %7552 = vmatpush3.msk.msra.mxu0 %vm4404_vm3, %v4524_v38 }
 0x4bc   : > { %7451 = vmatmul.mubr.msk.f32.gmra.mxu1 %vm2916_vm2, %v3681_v21  ;;  %7534 = vmatprep.subr.mxu1 %v4371_v32 }
 0x4bd   : > { %7506 = vmatmul.mubr.msk.f32.gmra.mxu0 %vm2916_vm2, %v3987_v41  ;;  %7453 = vmatprep.mubr.msk.f32.mxu1 %vm2916_vm2, %v3682_v56 }
 0x4be   : > { %7508 = vmatprep.mubr.msk.f32.mxu0 %vm2916_vm2, %v3988_v53  ;;  %7553 = vmatprep.subr.mxu0 %v4523_v11 }
 0x4bf   : > { %7535 = vmatpush3.msra.mxu1 %v4371_v32  ;;  %7554 = vmatpush3.msra.mxu0 %v4523_v11 }
 0x4c0   : > { %7454 = vmatmul.mubr.msk.f32.gmra.mxu1 %vm2916_vm2, %v3683_v35  ;;  %7570 = vmatprep.subr.mxu1 %v11665_v43 }
 0x4c1   : > { %7509 = vmatmul.mubr.msk.f32.gmra.mxu0 %vm2916_vm2, %v3989_v31  ;;  %7456 = vmatprep.mubr.msk.f32.mxu1 %vm2916_vm2, %v3684_v7 }
 0x4c2   : > { %7511 = vmatprep.mubr.msk.f32.mxu0 %vm2916_vm2, %v3990_v18  ;;  %7635 = vmatprep.subr.mxu0 %v11665_v43 }
 0x4c4   : > { %7457 = vmatmul.mubr.msk.f32.gmra.mxu1 %vm2916_vm2, %v3685_v24 }
 0x4c5   : > { %7512 = vmatmul.mubr.msk.f32.gmra.mxu0 %vm2916_vm2, %v3991_v2  ;;  %7459 = vmatprep.mubr.msk.f32.mxu1 %vm2916_vm2, %v3686_v54 }
 0x4c6   : > { %7514 = vmatprep.mubr.msk.f32.mxu0 %vm2916_vm2, %v3992_v48 }
 0x4c8   : > { %7460 = vmatmul.mubr.msk.f32.gmra.mxu1 %vm2916_vm2, %v3687_v50 }
 0x4c9   : > { %7515 = vmatmul.mubr.msk.f32.gmra.mxu0 %vm2916_vm2, %v3993_v10  ;;  %7462 = vmatprep.mubr.msk.f32.mxu1 %vm2916_vm2, %v3688_v19 }
 0x4ca   : > { %7517 = vmatprep.mubr.msk.f32.mxu0 %vm2916_vm2, %v3994_v17 }
 0x4cc   : > { %7463 = vmatmul.mubr.msk.f32.gmra.mxu1 %vm2916_vm2, %v3689_v15 }
 0x4cd   : > { %7518 = vmatmul.mubr.msk.f32.gmra.mxu0 %vm2916_vm2, %v3995_v28  ;;  %7465 = vmatprep.mubr.msk.f32.mxu1 %vm2916_vm2, %v3690_v49 }
 0x4ce   : > { %7520 = vmatprep.mubr.msk.f32.mxu0 %vm2916_vm2, %v3996_v29 }
 0x4d0   : > { %7466 = vmatmul.mubr.msk.f32.gmra.mxu1 %vm2916_vm2, %v3691_v55 }
 0x4d1   : > { %7521 = vmatmul.mubr.msk.f32.gmra.mxu0 %vm2916_vm2, %v3997_v45  ;;  %7468 = vmatprep.mubr.msk.f32.mxu1 %vm2916_vm2, %v3692_v25 }
 0x4d2   : > { %7523 = vmatprep.mubr.msk.f32.mxu0 %vm2916_vm2, %v3998_v3 }
 0x4d4   : > { %7469 = vmatmul.mubr.msk.f32.gmra.mxu1 %vm2916_vm2, %v3693_v22 }
 0x4d5   : > { %7524 = vmatmul.mubr.msk.f32.gmra.mxu0 %vm2916_vm2, %v3999_v40  ;;  %7471 = vmatprep.mubr.msk.f32.mxu1 %vm2916_vm2, %v3694_v30 }
 0x4d6   : > { %7526 = vmatprep.mubr.msk.f32.mxu0 %vm2916_vm2, %v4000_v0 }
 0x4d8   : > { %7472 = vmatmul.mubr.msk.f32.gmra.mxu1 %vm2916_vm2, %v3695_v57 }
 0x4d9   : > { %7527 = vmatmul.mubr.msk.f32.gmra.mxu0 %vm2916_vm2, %v4001_v60 }
 0x4da   : > { %7529 = vmatprep.mubr.msk.f32.mxu0 %vm2916_vm2, %v4002_v4 }
 0x4dd   : > { %7530 = vmatmul.mubr.msk.f32.gmra.mxu0 %vm2916_vm2, %v4003_v26 }
 0x518   : > { %v10490_v14 = vpop.f32.mrf.mxu1 }
 0x51a   : > { %v10492_v52 = vpop.f32.mrf.mxu1 }
 0x51c   : > { %v10494_v58 = vpop.f32.mrf.mxu1 }
 0x51e   : > { %v10496_v51 = vpop.f32.mrf.mxu1 }
 0x520   : > { %v10498_v37 = vpop.f32.mrf.mxu1 }
 0x522   : > { %v10500_v36 = vpop.f32.mrf.mxu1 }
 0x524   : > { %v10502_v42 = vpop.f32.mrf.mxu1 }
 0x526   : > { %v10504_v34 = vpop.f32.mrf.mxu1 }
 0x528   : > { %v10506_v39 = vpop.f32.mrf.mxu1 }
 0x52a   : > { %v10508_v61 = vpop.f32.mrf.mxu1 }
 0x52c   : > { %v10510_v23 = vpop.f32.mrf.mxu1 }
 0x52e   : > { %v10512_v5 = vpop.f32.mrf.mxu1 }
 0x531   : > { %v10514_v33 = vpop.f32.mrf.mxu1 }
 0x533   : > { %v10516_v1 = vpop.f32.mrf.mxu1 }
 0x536   : > { %v10518_v62 = vpop.f32.mrf.mxu1 }
 0x538   : > { %v10520_v16 = vpop.f32.mrf.mxu1 }
 0x53a   : > { %v10522_v63 = vpop.f32.mrf.mxu1 }
 0x53c   : > { %v10524_v9 = vpop.f32.mrf.mxu1 }
 0x53d   : > { %11666 = vst [vmem:[#allocation7_spill] sm:$0xff] %v10524_v9 }
 0x53e   : > { %v10526_v27 = vpop.f32.mrf.mxu1 }
 0x53f   : > { %11667 = vst [vmem:[#allocation6_spill] sm:$0xff] %v10526_v27 }
 0x540   : > { %v10528_v20 = vpop.f32.mrf.mxu1 }
 0x541   : > { %11668 = vst [vmem:[#allocation5_spill] sm:$0xff] %v10528_v20 }
 0x542   : > { %v7330_v13 = vpop.f32.mrf.mxu1 }
 0x544   : > { %v3268_v59 = vpop.f32.mrf.mxu1 }
 0x546   : > { %v7333_v6 = vpop.f32.mrf.mxu1  ;;  %v7388_v8 = vpop.f32.mrf.mxu0 }
 0x548   : > { %v3278_v47 = vpop.f32.mrf.mxu1  ;;  %v3556_v46 = vpop.f32.mrf.mxu0 }
 0x54a   : > { %v7336_v44 = vpop.f32.mrf.mxu1  ;;  %v7391_v21 = vpop.f32.mrf.mxu0 }
 0x54c   : > { %v3288_v41 = vpop.f32.mrf.mxu1  ;;  %v3566_v56 = vpop.f32.mrf.mxu0 }
 0x54e   : > { %v7339_v53 = vpop.f32.mrf.mxu1  ;;  %v7394_v35 = vpop.f32.mrf.mxu0 }
 0x550   : > { %v3298_v31 = vpop.f32.mrf.mxu1  ;;  %v3576_v7 = vpop.f32.mrf.mxu0 }
 0x552   : > { %v7342_v18 = vpop.f32.mrf.mxu1  ;;  %v10530_v24 = vpop.f32.mrf.mxu0 }
 0x554   : > { %v10532_v2 = vpop.f32.mrf.mxu1  ;;  %v10534_v54 = vpop.f32.mrf.mxu0 }
 0x557   : > { %v7345_v48 = vpop.f32.mrf.mxu1  ;;  %v10536_v50 = vpop.f32.mrf.mxu0 }
 0x559   : > { %v3318_v10 = vpop.f32.mrf.mxu1  ;;  %v10538_v19 = vpop.f32.mrf.mxu0 }
 0x55d   : > { %v7348_v17 = vpop.f32.mrf.mxu1  ;;  %v7403_v15 = vpop.f32.mrf.mxu0 }
 0x55f   : > { %v10540_v28 = vpop.f32.mrf.mxu1  ;;  %v10542_v49 = vpop.f32.mrf.mxu0 }
 0x563   : > { %v10544_v29 = vpop.f32.mrf.mxu1  ;;  %v10546_v55 = vpop.f32.mrf.mxu0 }
 0x565   : > { %v10548_v45 = vpop.f32.mrf.mxu1  ;;  %v10550_v25 = vpop.f32.mrf.mxu0 }
 0x569   : > { %v10552_v3 = vpop.f32.mrf.mxu1  ;;  %v10554_v22 = vpop.f32.mrf.mxu0 }
 0x56a   : > { %11669 = vst [vmem:[#allocation8_spill] sm:$0xff] %v10554_v22 }
 0x56b   : > { %v10556_v40 = vpop.f32.mrf.mxu1  ;;  %v10558_v30 = vpop.f32.mrf.mxu0 }
 0x56c   : > { %11670 = vst [vmem:[#allocation9_spill] sm:$0xff] %v10556_v40  ;;  %11671 = vst [vmem:[#allocation10_spill] sm:$0xff] %v10558_v30 }
 0x56f   : > { %v10560_v0 = vpop.f32.mrf.mxu1  ;;  %v10562_v57 = vpop.f32.mrf.mxu0 }
 0x570   : > { %11672 = vst [vmem:[#allocation11_spill] sm:$0xff] %v10560_v0  ;;  %11673 = vst [vmem:[#allocation12_spill] sm:$0xff] %v10562_v57 }
 0x571   : > { %v10564_v60 = vpop.f32.mrf.mxu1  ;;  %v10566_v4 = vpop.f32.mrf.mxu0 }
 0x572   : > { %11674 = vst [vmem:[#allocation13_spill] sm:$0xff] %v10564_v60  ;;  %11675 = vst [vmem:[#allocation14_spill] sm:$0xff] %v10566_v4 }
 0x574   : > { %v10568_v26 = vpop.f32.mrf.mxu0  ;;  %v7446_v12 = vpop.f32.mrf.mxu1 }
 0x575   : > { %11676 = vst [vmem:[#allocation15_spill] sm:$0xff] %v10568_v26 }
 0x576   : > { %v10570_v38 = vpop.f32.mrf.mxu0  ;;  %v3864_v32 = vpop.f32.mrf.mxu1 }
 0x577   : > { %11677 = vst [vmem:[#allocation16_spill] sm:$0xff] %v10570_v38 }
 0x578   : > { %v10572_v11 = vpop.f32.mrf.mxu1 }
 0x579   : > { %11678 = vst [vmem:[#allocation17_spill] sm:$0xff] %v10572_v11  ;;  %v7504_v43 = vpop.f32.mrf.mxu0 }
 0x57a   : > { %v10574_v20 = vpop.f32.mrf.mxu1 }
 0x57b   : > { %11679 = vst [vmem:[#allocation18_spill] sm:$0xff] %v10574_v20  ;;  %v4172_v27 = vpop.f32.mrf.mxu0  ;;  %v3274_v20 = vadd.f32 %v7330_v13, %v10490_v14  ;;  %v3324_v14 = vadd.f32 %v7345_v48, %v10510_v23  ;;  %v3309_v23 = vadd.f32 %v10532_v2, %v10508_v61  ;;  %v3329_v61 = vadd.f32 %v10540_v28, %v10516_v1 }
 0x57c   : > { %v10576_v30 = vpop.f32.mrf.mxu1  ;;  %v3339_v48 = vadd.f32 %v10548_v45, %v10520_v16  ;;  %v11694_v16 = vld [vmem:[#allocation10_spill] sm:$0xff] }
 0x57d   : > { %11680 = vst [vmem:[#allocation19_spill] sm:$0xff] %v10576_v30  ;;  %v10578_v0 = vpop.f32.mrf.mxu0  ;;  %v3269_v30 = vadd.f32 %v3268_v59, %v10492_v52  ;;  %v3304_v52 = vadd.f32 %v7339_v53, %v10502_v42  ;;  %v3299_v59 = vadd.f32 %v3298_v31, %v10504_v34  ;;  %v3334_v34 = vadd.f32 %v7348_v17, %v10514_v33 }
 0x57e   : > { %11681 = vst [vmem:[#allocation20_spill] sm:$0xff] %v10578_v0  ;;  %v10580_v57 = vpop.f32.mrf.mxu1  ;;  %v10629_v53 = vadd.f32 %v10538_v19, %v3309_v23  ;;  %v3344_v33 = vadd.f32 %v10544_v29, %v10518_v62  ;;  %v3669_v45 = vadd.f32 %v11694_v16, %v3339_v48  ;;  %v11709_v16 = vld [vmem:[#allocation15_spill] sm:$0xff] }
 0x57f   : > { %11682 = vst [vmem:[#allocation21_spill] sm:$0xff] %v10580_v57  ;;  %v10582_v60 = vpop.f32.mrf.mxu0  ;;  %v3284_v57 = vadd.f32 %v7333_v6, %v10494_v58  ;;  %v3319_v6 = vadd.f32 %v3318_v10, %v10512_v5  ;;  %v10619_v42 = vadd.f32 %v10534_v54, %v3299_v59  ;;  %v3354_v10 = vadd.f32 %v10552_v3, %v10522_v63 }
 0x580   : > { %11683 = vst [vmem:[#allocation22_spill] sm:$0xff] %v10582_v60  ;;  %v10584_v4 = vpop.f32.mrf.mxu1  ;;  %v3656_v60 = vadd.f32 %v7388_v8, %v3274_v20  ;;  %v3666_v8 = vadd.f32 %v7403_v15, %v3324_v14  ;;  %v11690_v1 = vld [vmem:[#allocation17_spill] sm:$0xff] }
 0x581   : > { %11684 = vst [vmem:[#allocation23_spill] sm:$0xff] %v10584_v4  ;;  %v10586_v26 = vpop.f32.mrf.mxu0  ;;  %v3279_v4 = vadd.f32 %v3278_v47, %v10496_v51  ;;  %v3658_v11 = vadd.f32 %v7391_v21, %v3284_v57  ;;  %v11693_v57 = vld [vmem:[#allocation9_spill] sm:$0xff] }
 0x582   : > { %11685 = vst [vmem:[#allocation24_spill] sm:$0xff] %v10586_v26  ;;  %v10588_v38 = vpop.f32.mrf.mxu1  ;;  %v3294_v26 = vadd.f32 %v7336_v44, %v10498_v37  ;;  %v3314_v37 = vadd.f32 %v7342_v18, %v10506_v39  ;;  %v4319_v39 = vpop.permute.xlu0 %4318  ;;  %v3964_v21 = vadd.f32 %v7446_v12, %v3656_v60 }
 0x583   : > { %11686 = vst [vmem:[#allocation25_spill] sm:$0xff] %v10588_v38  ;;  %v10590_v40 = vpop.f32.mrf.mxu0  ;;  %v3966_v19 = vadd.f32 %v11690_v1, %v3658_v11 }
 0x584   : > { %11687 = vst [vmem:[#allocation26_spill] sm:$0xff] %v10590_v40  ;;  %v10592_v9 = vpop.f32.mrf.mxu1  ;;  %v3655_v40 = vadd.f32 %v3556_v46, %v3269_v30  ;;  %v3660_v58 = vadd.f32 %v7394_v35, %v3294_v26  ;;  %v4314_v46 = vpop.permute.xlu1 %4313  ;;  %v10625_v5 = vadd.f32 %v10536_v50, %v3314_v37  ;;  %v3668_v35 = vadd.f32 %v10546_v55, %v3334_v34  ;;  %v11691_v55 = vld [vmem:[#allocation8_spill] sm:$0xff]  ;;  %v11692_v30 = vld [vmem:[#allocation7_spill] sm:$0xff] }
 0x585   : > { %11688 = vst [vmem:[#allocation27_spill] sm:$0xff] %v10592_v9  ;;  %v10595_v22 = vpop.f32.mrf.mxu0  ;;  %v3289_v9 = vadd.f32 %v3288_v41, %v10500_v36  ;;  %v10614_v36 = vadd.f32 %v10530_v24, %v3304_v52  ;;  %v4272_v18 = vadd.f32 %v7504_v43, %v3964_v21  ;;  %v3667_v50 = vadd.f32 %v10550_v25, %v3329_v61  ;;  %v11695_v25 = vld [vmem:[#allocation18_spill] sm:$0xff]  ;;  %v11696_v3 = vld [vmem:[#allocation20_spill] sm:$0xff]  ;;  %v11698_v52 = vld [vmem:[#allocation11_spill] sm:$0xff] }
 0x586   : > { %11689 = vst [vmem:[#allocation28_spill] sm:$0xff] %v10595_v22  ;;  %v10599_v0 = vpop.f32.mrf.mxu1  ;;  %v3657_v22 = vadd.f32 %v3566_v56, %v3279_v4  ;;  %v3349_v60 = vadd.f32 %v11693_v57, %v11692_v30  ;;  %v4329_v63 = vpop.permute.xlu0 %4328  ;;  %v4274_v12 = vadd.f32 %v11696_v3, %v3966_v19  ;;  %v11699_v37 = vld [vmem:[#allocation12_spill] sm:$0xff]  ;;  %v11706_v19 = vld [vmem:[#allocation14_spill] sm:$0xff] }
 0x587   : > { %v10603_v38 = vpop.f32.mrf.mxu0  ;;  %v3659_v51 = vadd.f32 %v3576_v7, %v3289_v9  ;;  %v3665_v9 = vadd.f32 %v10542_v49, %v3319_v6  ;;  %v3963_v7 = vadd.f32 %v3864_v32, %v3655_v40  ;;  %v3670_v40 = vadd.f32 %v11691_v55, %v3344_v33  ;;  %v11701_v23 = vld [vmem:[#allocation22_spill] sm:$0xff]  ;;  %v11702_v33 = vld [vmem:[#allocation5_spill] sm:$0xff] }
 0x588   : > { %v7461_v13 = vpop.f32.mrf.mxu1  ;;  %v4324_v43 = vpop.permute.xlu1 %4323  ;;  %v3965_v4 = vadd.f32 %v11695_v25, %v3657_v22  ;;  %v3672_v6 = vadd.f32 %v11699_v37, %v3354_v10 }
 0x589   : > { %v10609_v20 = vpop.f32.mrf.mxu0  ;;  %v3974_v41 = vadd.f32 %v7461_v13, %v3666_v8  ;;  %v4271_v62 = vadd.f32 %v4172_v27, %v3963_v7  ;;  %v11697_v13 = vld [vmem:[#allocation6_spill] sm:$0xff]  ;;  %v11700_v8 = vld [vmem:[#allocation19_spill] sm:$0xff]  ;;  %v11704_v7 = vld [vmem:[#allocation21_spill] sm:$0xff] }
 0x58a   : > { %v3914_v47 = vpop.f32.mrf.mxu1  ;;  %v3364_v59 = vadd.f32 %v11698_v52, %v11697_v13  ;;  %v4273_v34 = vadd.f32 %v11701_v23, %v3965_v4  ;;  %v3971_v23 = vadd.f32 %v10599_v0, %v10629_v53 }
 0x58b   : > { %v10622_v44 = vpop.f32.mrf.mxu0  ;;  %v3973_v24 = vadd.f32 %v3914_v47, %v3665_v9  ;;  %v3968_v47 = vadd.f32 %v11700_v8, %v3660_v58 }
 0x58c   : > { %v7464_v56 = vpop.f32.mrf.mxu1  ;;  %v4334_v1 = vpop.permute.xlu1 %4333 }
 0x58d   : > { %v7519_v31 = vpop.f32.mrf.mxu0  ;;  %v3976_v15 = vadd.f32 %v7464_v56, %v3668_v35  ;;  %v11703_v35 = vld [vmem:[#allocation13_spill] sm:$0xff]  ;;  %v11711_v4 = vld [vmem:[#allocation28_spill] sm:$0xff] }
 0x58e   : > { %v4282_v2 = vadd.f32 %v7519_v31, %v3974_v41  ;;  %v3924_v54 = vpop.f32.mrf.mxu1  ;;  %v3359_v31 = vadd.f32 %v11703_v35, %v11702_v33 }
 0x58f   : > { %v4222_v17 = vpop.f32.mrf.mxu0  ;;  %v3975_v32 = vadd.f32 %v3924_v54, %v3667_v50 }
 0x590   : > { %v4292_v28 = vmax.f32 %v4272_v18, %v4282_v2  ;;  %v4281_v49 = vadd.f32 %v4222_v17, %v3973_v24  ;;  %v7467_v29 = vpop.f32.mrf.mxu1  ;;  %v3967_v18 = vadd.f32 %v11704_v7, %v3659_v51  ;;  %v11705_v24 = vld [vmem:[#allocation24_spill] sm:$0xff]  ;;  %v3671_v17 = vadd.f32 %v11706_v19, %v3349_v60  ;;  %v11710_v60 = vld [vmem:[#allocation25_spill] sm:$0xff] }
 0x591   : > { %v7522_v26 = vpop.f32.mrf.mxu0  ;;  %v3978_v22 = vadd.f32 %v7467_v29, %v3670_v40  ;;  %v4276_v2 = vadd.f32 %v11705_v24, %v3968_v47  ;;  %v3969_v25 = vadd.f32 %v11710_v60, %v10619_v42  ;;  %v4344_v47 = vpop.permute.xlu1 %4343 }
 0x592   : > { %v4291_v27 = vmax.f32 %v4271_v62, %v4281_v49  ;;  %v4284_v11 = vadd.f32 %v7522_v26, %v3976_v15  ;;  %v3934_v14 = vpop.f32.mrf.mxu1  ;;  %v4362_v54 = vadd.f32 %v4319_v39, %v4292_v28  ;;  %v11707_v62 = vld [vmem:[#allocation23_spill] sm:$0xff]  ;;  %v11708_v49 = vld [vmem:[#allocation26_spill] sm:$0xff]  ;;  %v4339_v39 = vpop.permute.xlu0 %4338 }
 0x593   : > { %v4232_v9 = vpop.f32.mrf.mxu0  ;;  %v3977_v50 = vadd.f32 %v3934_v14, %v3669_v45  ;;  %v3970_v15 = vadd.f32 %v11707_v62, %v10614_v36  ;;  %v4275_v51 = vadd.f32 %v11708_v49, %v3967_v18  ;;  %v3674_v45 = vadd.f32 %v11709_v16, %v3364_v59  ;;  %v11713_v14 = vld [vmem:[#allocation27_spill] sm:$0xff] }
 0x594   : > { %v4361_v21 = vadd.f32 %v4314_v46, %v4291_v27  ;;  %v4294_v41 = vmax.f32 %v4274_v12, %v4284_v11  ;;  %v4283_v56 = vadd.f32 %v4232_v9, %v3975_v32  ;;  %v7470_v61 = vpop.f32.mrf.mxu1  ;;  %v3972_v13 = vadd.f32 %v11713_v14, %v10625_v5 }
 0x595   : > { %v7525_v48 = vpop.f32.mrf.mxu0  ;;  %v3980_v55 = vadd.f32 %v7470_v61, %v3672_v6  ;;  %v4278_v36 = vadd.f32 %v11711_v4, %v3970_v15  ;;  %v4277_v52 = vadd.f32 %v10603_v38, %v3969_v25  ;;  %v4279_v61 = vadd.f32 %v10622_v44, %v3971_v23  ;;  %v4682_v23 = vld [vmem:[%s11636_s9 + $0x20] sm:$0xff] }
 0x596   : > { %v4293_v10 = vmax.f32 %v4273_v34, %v4283_v56  ;;  %v4286_v58 = vadd.f32 %v7525_v48, %v3978_v22  ;;  %7536 = vmatprep.mubr.msk.f32.mxu1 %vm4373_vm4, %v4361_v21  ;;  %7555 = vmatprep.mubr.msk.f32.mxu0 %vm4373_vm4, %v4361_v21  ;;  %v3944_v46 = vpop.f32.mrf.mxu1  ;;  %v4364_v26 = vadd.f32 %v4329_v63, %v4294_v41  ;;  %v4349_v21 = vpop.permute.xlu0 %4348  ;;  %v11714_v44 = vmov 0.0  }
 0x597   : > { %v4242_v29 = vpop.f32.mrf.mxu0  ;;  %7537 = vmatmul.mubr.msk.f32.vlgmr.msra.gmra.mxu1 %vm4373_vm4, %v4362_v54  ;;  %7556 = vmatmul.mubr.msk.f32.vlgmr.msra.gmra.mxu0 %vm4373_vm4, %v4362_v54  ;;  %v3979_v12 = vadd.f32 %v3944_v46, %v3671_v17  ;;  %v4280_v34 = vadd.f32 %v10609_v20, %v3972_v13 }
 0x598   : > { %v4363_v28 = vadd.f32 %v4324_v43, %v4293_v10  ;;  %v4296_v40 = vmax.f32 %v4276_v2, %v4286_v58  ;;  %v4285_v30 = vadd.f32 %v4242_v29, %v3977_v50  ;;  %v7473_v57 = vpop.f32.mrf.mxu1  ;;  %v11712_v43 = vld [vmem:[#allocation16_spill] sm:$0xff] }
 0x599   : > { %v7528_v3 = vpop.f32.mrf.mxu0  ;;  %v3673_v11 = vadd.f32 %v11712_v43, %v3359_v31  ;;  %v3982_v37 = vadd.f32 %v7473_v57, %v3674_v45  ;;  %v4354_v31 = vpop.permute.xlu1 %4353 }
 0x59a   : > { %v4295_v32 = vmax.f32 %v4275_v51, %v4285_v30  ;;  %v4288_v27 = vadd.f32 %v7528_v3, %v3980_v55  ;;  %7539 = vmatprep.mubr.msk.f32.mxu1 %vm4373_vm4, %v4363_v28  ;;  %7558 = vmatprep.mubr.msk.f32.mxu0 %vm4373_vm4, %v4363_v28  ;;  %v3954_v59 = vpop.f32.mrf.mxu1  ;;  %v4366_v9 = vadd.f32 %v4339_v39, %v4296_v40  ;;  %v4359_v7 = vpop.permute.xlu0 %4358 }
 0x59b   : > { %v4252_v42 = vpop.f32.mrf.mxu0  ;;  %7540 = vmatmul.mubr.msk.f32.gmra.mxu1 %vm4373_vm4, %v4364_v26  ;;  %7559 = vmatmul.mubr.msk.f32.gmra.mxu0 %vm4373_vm4, %v4364_v26  ;;  %v3981_v38 = vadd.f32 %v3954_v59, %v3673_v11 }
 0x59c   : > { %v4365_v63 = vadd.f32 %v4334_v1, %v4295_v32  ;;  %v4298_v6 = vmax.f32 %v4278_v36, %v4288_v27  ;;  %v4287_v8 = vadd.f32 %v4252_v42, %v3979_v12 }
 0x59d   : > { %v7531_v5 = vpop.f32.mrf.mxu0 }
 0x59e   : > { %v4297_v22 = vmax.f32 %v4277_v52, %v4287_v8  ;;  %v4290_v41 = vadd.f32 %v7531_v5, %v3982_v37  ;;  %7542 = vmatprep.mubr.msk.f32.mxu1 %vm4373_vm4, %v4365_v63  ;;  %7561 = vmatprep.mubr.msk.f32.mxu0 %vm4373_vm4, %v4365_v63  ;;  %v4368_v33 = vadd.f32 %v4349_v21, %v4298_v6  ;;  %v4678_v37 = vld [vmem:[%s11636_s9] sm:$0xff]  ;;  %v4679_v6 = vld [vmem:[%s11636_s9 + $0x8] sm:$0xff]  ;;  %v4680_v8 = vld [vmem:[%s11636_s9 + $0x10] sm:$0xff] }
 0x59f   : > { %v4262_v56 = vpop.f32.mrf.mxu0  ;;  %7543 = vmatmul.mubr.msk.f32.gmra.mxu1 %vm4373_vm4, %v4366_v9  ;;  %7562 = vmatmul.mubr.msk.f32.gmra.mxu0 %vm4373_vm4, %v4366_v9  ;;  %v4684_v9 = vld [vmem:[%s11636_s9 + $0x30] sm:$0xff]  ;;  %v4685_v5 = vld [vmem:[%s11636_s9 + $0x38] sm:$0xff]  ;;  %v4686_v21 = vld [vmem:[%s11636_s9 + $0x40] sm:$0xff] }
 0x5a0   : > { %v4367_v0 = vadd.f32 %v4344_v47, %v4297_v22  ;;  %v4300_v53 = vmax.f32 %v4280_v34, %v4290_v41  ;;  %v4289_v20 = vadd.f32 %v4262_v56, %v3981_v38  ;;  %v4681_v47 = vld [vmem:[%s11636_s9 + $0x18] sm:$0xff]  ;;  %v4683_v34 = vld [vmem:[%s11636_s9 + $0x28] sm:$0xff]  ;;  %v4688_v22 = vld [vmem:[%s11636_s9 + $0x50] sm:$0xff] }
 0x5a1   : > { %v4687_v38 = vld [vmem:[%s11636_s9 + $0x48] sm:$0xff]  ;;  %v4689_v41 = vld [vmem:[%s11636_s9 + $0x58] sm:$0xff]  ;;  %v4690_v56 = vld [vmem:[%s11636_s9 + $0x60] sm:$0xff] }
 0x5a2   : > { %v4299_v35 = vmax.f32 %v4279_v61, %v4289_v20  ;;  %7545 = vmatprep.mubr.msk.f32.mxu1 %vm4373_vm4, %v4367_v0  ;;  %7564 = vmatprep.mubr.msk.f32.mxu0 %vm4373_vm4, %v4367_v0  ;;  %v4370_v24 = vadd.f32 %v4359_v7, %v4300_v53  ;;  %v4691_v61 = vld [vmem:[%s11636_s9 + $0x68] sm:$0xff]  ;;  %v4692_v0 = vld [vmem:[%s11636_s9 + $0x70] sm:$0xff] }
 0x5a3   : > { %7546 = vmatmul.mubr.msk.f32.gmra.mxu1 %vm4373_vm4, %v4368_v33  ;;  %7565 = vmatmul.mubr.msk.f32.gmra.mxu0 %vm4373_vm4, %v4368_v33 }
 0x5a4   : > { %v4369_v18 = vadd.f32 %v4354_v31, %v4299_v35 }
 0x5a6   : > { %7548 = vmatprep.mubr.msk.f32.mxu1 %vm4373_vm4, %v4369_v18  ;;  %7567 = vmatprep.mubr.msk.f32.mxu0 %vm4373_vm4, %v4369_v18 }
 0x5a7   : > { %7549 = vmatmul.mubr.msk.f32.gmra.mxu1 %vm4373_vm4, %v4370_v24  ;;  %7568 = vmatmul.mubr.msk.f32.gmra.mxu0 %vm4373_vm4, %v4370_v24 }
 0x5a8   : > { %7590 = vmatprep.mubr.msk.f32.mxu1 %vm8063_vm5, %v11714_v44  ;;  %7655 = vmatprep.mubr.msk.f32.mxu0 %vm8063_vm5, %v11714_v44 }
 0x657   : > { %v10697_v2 = vpop.f32.mrf.mxu1  ;;  %v10699_v54 = vpop.f32.mrf.mxu0 }
 0x658   : > { %v4644_v13 = vmax.f32 %v10697_v2, %v10699_v54 }
 0x659   : > { %v10701_v48 = vpop.f32.mrf.mxu1  ;;  %v10703_v50 = vpop.f32.mrf.mxu0 }
 0x65a   : > { %v4643_v52 = vmax.f32 %v10701_v48, %v10703_v50  ;;  %v10763_v42 = vmax.f32 %v4644_v13, 0.0 }
 0x65b   : > { %v7541_v10 = vpop.f32.mrf.mxu1  ;;  %v7560_v58 = vpop.f32.mrf.mxu0 }
 0x65c   : > { %v4646_v43 = vmax.f32 %v7541_v10, %v7560_v58  ;;  %v10769_v63 = vmax.f32 %v4643_v52, 0.0  ;;  %v6659_v52 = vld [vmem:[%s11636_s9 + $0xb0] sm:$0xff] }
 0x65d   : > { %v4484_v46 = vpop.f32.mrf.mxu1  ;;  %v4604_v1 = vpop.f32.mrf.mxu0 }
 0x65e   : > { %v4645_v11 = vmax.f32 %v4484_v46, %v4604_v1  ;;  %v10746_v14 = vmax.f32 %v4646_v43, 0.0  ;;  %v6658_v43 = vld [vmem:[%s11636_s9 + $0xa8] sm:$0xff] }
 0x65f   : > { %v7544_v19 = vpop.f32.mrf.mxu1  ;;  %v7563_v17 = vpop.f32.mrf.mxu0 }
 0x660   : > { %v4648_v62 = vmax.f32 %v7544_v19, %v7563_v17  ;;  %v10757_v59 = vmax.f32 %v4645_v11, 0.0  ;;  %v6652_v19 = vld [vmem:[%s11636_s9 + $0x78] sm:$0xff] }
 0x661   : > { %v4494_v15 = vpop.f32.mrf.mxu1  ;;  %v4614_v49 = vpop.f32.mrf.mxu0 }
 0x662   : > { %v10705_v51 = vmax.f32 %v4648_v62, 0.0  ;;  %v4647_v29 = vmax.f32 %v4494_v15, %v4614_v49  ;;  %v6653_v15 = vld [vmem:[%s11636_s9 + $0x80] sm:$0xff] }
 0x663   : > { %v7547_v39 = vpop.f32.mrf.mxu1  ;;  %v7566_v28 = vpop.f32.mrf.mxu0 }
 0x664   : > { %v4650_v55 = vmax.f32 %v7547_v39, %v7566_v28  ;;  %5176 = vrot.lane.b32.xlu1 %v10705_v51, %s8059_s24  ;;  %4930 = vrot.lane.b32.xlu0 %v10705_v51, %s8058_s17  ;;  %v10711_v57 = vmax.f32 %v4647_v29, 0.0  ;;  %v6682_v29 = vld [vmem:[%s11636_s9 + $0xf0] sm:$0xff]  ;;  %v6654_v28 = vld [vmem:[%s11636_s9 + $0x88] sm:$0xff] }
 0x665   : > { %v4504_v40 = vpop.f32.mrf.mxu1  ;;  %v4624_v30 = vpop.f32.mrf.mxu0 }
 0x666   : > { %v10713_v16 = vmax.f32 %v4650_v55, 0.0  ;;  %v4649_v45 = vmax.f32 %v4504_v40, %v4624_v30  ;;  %v6683_v40 = vld [vmem:[%s11636_s9 + $0xf8] sm:$0xff] }
 0x667   : > { %v7550_v60 = vpop.f32.mrf.mxu1  ;;  %v7569_v25 = vpop.f32.mrf.mxu0 }
 0x668   : > { %v4652_v4 = vmax.f32 %v7550_v60, %v7569_v25  ;;  %4928 = vrot.lane.b32.xlu0 %v10711_v57, %s8058_s17  ;;  %5180 = vrot.lane.b32.xlu1 %v10713_v16, %s8059_s24  ;;  %v10719_v3 = vmax.f32 %v4649_v45, 0.0  ;;  %v6684_v45 = vld [vmem:[%s11636_s9 + $0x100] sm:$0xff]  ;;  %v6656_v25 = vld [vmem:[%s11636_s9 + $0x98] sm:$0xff] }
 0x669   : > { %v4514_v36 = vpop.f32.mrf.mxu1  ;;  %v4634_v26 = vpop.f32.mrf.mxu0 }
 0x66a   : > { %v10721_v12 = vmax.f32 %v4652_v4, 0.0  ;;  %v4651_v32 = vmax.f32 %v4514_v36, %v4634_v26  ;;  %v6685_v36 = vld [vmem:[%s11636_s9 + $0x108] sm:$0xff] }
 0x66c   : > { %v10723_v27 = vmax.f32 %v4651_v32, 0.0  ;;  %4934 = vrot.lane.b32.xlu0 %v10713_v16, %s8058_s17  ;;  %5178 = vrot.lane.b32.xlu1 %v10719_v3, %s8059_s24  ;;  %v6686_v32 = vld [vmem:[%s11636_s9 + $0x110] sm:$0xff] }
 0x66d   : > { %7571 = vmatpush3.msra.mxu1 %v10721_v12 }
 0x66e   : > { %7572 = vmatprep.subr.mxu1 %v11714_v44 }
 0x66f   : > { %7573 = vmatpush3.msra.mxu1 %v10723_v27 }
 0x670   : > { %7574 = vmatprep.subr.mxu1 %v11714_v44  ;;  %4932 = vrot.lane.b32.xlu0 %v10719_v3, %s8058_s17 }
 0x671   : > { %4938 = vrot.lane.b32.xlu1 %v10721_v12, %s8058_s17  ;;  %7575 = vmatpush3.msra.mxu1 %v10713_v16 }
 0x672   : > { %7576 = vmatprep.subr.mxu1 %v11714_v44 }
 0x673   : > { %7577 = vmatpush3.msra.mxu1 %v10719_v3 }
 0x674   : > { %7578 = vmatprep.subr.mxu1 %v11714_v44  ;;  %4936 = vrot.lane.b32.xlu0 %v10723_v27, %s8058_s17 }
 0x675   : > { %5184 = vrot.lane.b32.xlu1 %v10721_v12, %s8059_s24  ;;  %7579 = vmatpush3.msra.mxu1 %v10705_v51 }
 0x676   : > { %7580 = vmatprep.subr.mxu1 %v11714_v44 }
 0x677   : > { %7581 = vmatpush3.msra.mxu1 %v10711_v57 }
 0x678   : > { %7582 = vmatprep.subr.mxu1 %v11714_v44  ;;  %4926 = vrot.lane.b32.xlu0 %v10746_v14, %s8058_s17 }
 0x679   : > { %5182 = vrot.lane.b32.xlu1 %v10723_v27, %s8059_s24  ;;  %7583 = vmatpush3.msra.mxu1 %v10746_v14 }
 0x67a   : > { %7584 = vmatprep.subr.mxu1 %v11714_v44 }
 0x67b   : > { %7585 = vmatpush3.msra.mxu1 %v10757_v59 }
 0x67c   : > { %7586 = vmatprep.subr.mxu1 %v11714_v44  ;;  %4924 = vrot.lane.b32.xlu0 %v10757_v59, %s8058_s17 }
 0x67d   : > { %5174 = vrot.lane.b32.xlu1 %v10711_v57, %s8059_s24  ;;  %7587 = vmatpush3.msra.mxu1 %v10763_v42 }
 0x67e   : > { %7588 = vmatprep.subr.mxu1 %v11714_v44 }
 0x67f   : > { %7589 = vmatpush3.msra.mxu1 %v10769_v63 }
 0x680   : > { %4922 = vrot.lane.b32.xlu0 %v10763_v42, %s8058_s17  ;;  %7591 = vmatmul.mubr.msk.f32.vlgmr.msra.gmra.mxu1 %vm4693_vm6, %v4678_v37 }
 0x681   : > { %5172 = vrot.lane.b32.xlu1 %v10746_v14, %s8059_s24  ;;  %7593 = vmatprep.mubr.msk.f32.mxu1 %vm8063_vm5, %v11714_v44 }
 0x682   : > { %7700 = vmatprep.subr.mxu1 %v11714_v44 }
 0x684   : > { %4920 = vrot.lane.b32.xlu0 %v10769_v63, %s8058_s17  ;;  %7594 = vmatmul.mubr.msk.f32.gmra.mxu1 %vm4693_vm6, %v4679_v6  ;;  %v6660_v6 = vld [vmem:[%s11636_s9 + $0xb8] sm:$0xff] }
 0x685   : > { %5170 = vrot.lane.b32.xlu1 %v10757_v59, %s8059_s24  ;;  %7596 = vmatprep.mubr.msk.f32.mxu1 %vm8063_vm5, %v11714_v44 }
 0x688   : > { %5166 = vrot.lane.b32.xlu0 %v10769_v63, %s8059_s24  ;;  %7597 = vmatmul.mubr.msk.f32.gmra.mxu1 %vm4693_vm6, %v4680_v8 }
 0x689   : > { %5168 = vrot.lane.b32.xlu1 %v10763_v42, %s8059_s24  ;;  %7599 = vmatprep.mubr.msk.f32.mxu1 %vm8063_vm5, %v11714_v44  ;;  %s6789_s24 = sshll.u32 %s11716_s19, 4 }
 0x68a   : > { %s509_s21 = scalar_lea.vmem %s11642_s15, %s6789_s24 }
 0x68c   : > { %5426 = vrot.lane.b32.xlu0 %v10713_v16, %s11663_s26  ;;  %7600 = vmatmul.mubr.msk.f32.gmra.mxu1 %vm4693_vm6, %v4681_v47  ;;  %v6689_v47 = vld [vmem:[%s11636_s9 + $0x128] sm:$0xff] }
 0x68d   : > { %5430 = vrot.lane.b32.xlu1 %v10721_v12, %s11663_s26  ;;  %7602 = vmatprep.mubr.msk.f32.mxu1 %vm8063_vm5, %v11714_v44 }
 0x690   : > { %5424 = vrot.lane.b32.xlu0 %v10719_v3, %s11663_s26  ;;  %7603 = vmatmul.mubr.msk.f32.gmra.mxu1 %vm4693_vm6, %v4682_v23 }
 0x691   : > { %5676 = vrot.lane.b32.xlu1 %v10721_v12, %s11664_s20  ;;  %7605 = vmatprep.mubr.msk.f32.mxu1 %vm8063_vm5, %v11714_v44 }
 0x694   : > { %5422 = vrot.lane.b32.xlu0 %v10705_v51, %s11663_s26  ;;  %7606 = vmatmul.mubr.msk.f32.gmra.mxu1 %vm4693_vm6, %v4683_v34  ;;  %v6661_v34 = vld [vmem:[%s11636_s9 + $0xc0] sm:$0xff] }
 0x695   : > { %5672 = vrot.lane.b32.xlu1 %v10713_v16, %s11664_s20  ;;  %7608 = vmatprep.mubr.msk.f32.mxu1 %vm8063_vm5, %v11714_v44 }
 0x698   : > { %5420 = vrot.lane.b32.xlu0 %v10711_v57, %s11663_s26  ;;  %7609 = vmatmul.mubr.msk.f32.gmra.mxu1 %vm4693_vm6, %v4684_v9 }
 0x699   : > { %5670 = vrot.lane.b32.xlu1 %v10719_v3, %s11664_s20  ;;  %7611 = vmatprep.mubr.msk.f32.mxu1 %vm8063_vm5, %v11714_v44  ;;  %v6657_v3 = vld [vmem:[%s11636_s9 + $0xa0] sm:$0xff] }
 0x69c   : > { %5428 = vrot.lane.b32.xlu0 %v10723_v27, %s11663_s26  ;;  %7612 = vmatmul.mubr.msk.f32.gmra.mxu1 %vm4693_vm6, %v4685_v5  ;;  %v6690_v5 = vld [vmem:[%s11636_s9 + $0x130] sm:$0xff] }
 0x69d   : > { %5668 = vrot.lane.b32.xlu1 %v10705_v51, %s11664_s20  ;;  %7614 = vmatprep.mubr.msk.f32.mxu1 %vm8063_vm5, %v11714_v44 }
 0x6a0   : > { %5418 = vrot.lane.b32.xlu0 %v10746_v14, %s11663_s26  ;;  %7615 = vmatmul.mubr.msk.f32.gmra.mxu1 %vm4693_vm6, %v4686_v21 }
 0x6a1   : > { %5674 = vrot.lane.b32.xlu1 %v10723_v27, %s11664_s20  ;;  %7617 = vmatprep.mubr.msk.f32.mxu1 %vm8063_vm5, %v11714_v44 }
 0x6a4   : > { %5416 = vrot.lane.b32.xlu0 %v10757_v59, %s11663_s26  ;;  %7618 = vmatmul.mubr.msk.f32.gmra.mxu1 %vm4693_vm6, %v4687_v38  ;;  %v6662_v38 = vld [vmem:[%s11636_s9 + $0xc8] sm:$0xff] }
 0x6a5   : > { %5666 = vrot.lane.b32.xlu1 %v10711_v57, %s11664_s20  ;;  %7620 = vmatprep.mubr.msk.f32.mxu1 %vm8063_vm5, %v11714_v44  ;;  %v6655_v57 = vld [vmem:[%s11636_s9 + $0x90] sm:$0xff] }
 0x6a8   : > { %5414 = vrot.lane.b32.xlu0 %v10763_v42, %s11663_s26  ;;  %7621 = vmatmul.mubr.msk.f32.gmra.mxu1 %vm4693_vm6, %v4688_v22  ;;  %v6691_v22 = vld [vmem:[%s11636_s9 + $0x138] sm:$0xff] }
 0x6a9   : > { %5664 = vrot.lane.b32.xlu1 %v10746_v14, %s11664_s20  ;;  %7623 = vmatprep.mubr.msk.f32.mxu1 %vm8063_vm5, %v11714_v44  ;;  %v6687_v14 = vld [vmem:[%s11636_s9 + $0x118] sm:$0xff] }
 0x6ac   : > { %5412 = vrot.lane.b32.xlu0 %v10769_v63, %s11663_s26  ;;  %7624 = vmatmul.mubr.msk.f32.gmra.mxu1 %vm4693_vm6, %v4689_v41 }
 0x6ad   : > { %5662 = vrot.lane.b32.xlu1 %v10757_v59, %s11664_s20  ;;  %7626 = vmatprep.mubr.msk.f32.mxu1 %vm8063_vm5, %v11714_v44 }
 0x6b0   : > { %5658 = vrot.lane.b32.xlu0 %v10769_v63, %s11664_s20  ;;  %7627 = vmatmul.mubr.msk.f32.gmra.mxu1 %vm4693_vm6, %v4690_v56  ;;  %v6663_v56 = vld [vmem:[%s11636_s9 + $0xd0] sm:$0xff] }
 0x6b1   : > { %5660 = vrot.lane.b32.xlu1 %v10763_v42, %s11664_s20  ;;  %7629 = vmatprep.mubr.msk.f32.mxu1 %vm8063_vm5, %v11714_v44  ;;  %v6688_v42 = vld [vmem:[%s11636_s9 + $0x120] sm:$0xff] }
 0x6b4   : > { %7630 = vmatmul.mubr.msk.f32.gmra.mxu1 %vm4693_vm6, %v4691_v61  ;;  %v6692_v61 = vld [vmem:[%s11636_s9 + $0x140] sm:$0xff] }
 0x6b5   : > { %7632 = vmatprep.mubr.msk.f32.mxu1 %vm8063_vm5, %v11714_v44 }
 0x6b8   : > { %7633 = vmatmul.mubr.msk.f32.gmra.mxu1 %vm4693_vm6, %v4692_v0 }
 0x6b9   : > { %7720 = vmatprep.mubr.msk.f32.mxu1 %vm8063_vm5, %v11714_v44 }
 0x6d6   : > { %v5177_v53 = vpop.permute.xlu1 %5176  ;;  %v4931_v20 = vpop.permute.xlu0 %4930 }
 0x6da   : > { %v5181_v33 = vpop.permute.xlu1 %5180  ;;  %v4929_v35 = vpop.permute.xlu0 %4928 }
 0x6de   : > { %v5179_v31 = vpop.permute.xlu1 %5178  ;;  %v4935_v7 = vpop.permute.xlu0 %4934 }
 0x6e2   : > { %v4933_v18 = vpop.permute.xlu0 %4932 }
 0x6e3   : > { %v4939_v24 = vpop.permute.xlu1 %4938 }
 0x6e4   : > { %7636 = vmatpush3.msra.mxu0 %v4939_v24  ;;  %v6696_v24 = vld [vmem:[%s11636_s9 + $0x160] sm:$0xff] }
 0x6e5   : > { %7637 = vmatprep.subr.mxu0 %v11714_v44 }
 0x6e6   : > { %v4937_v2 = vpop.permute.xlu0 %4936 }
 0x6e7   : > { %v5185_v54 = vpop.permute.xlu1 %5184  ;;  %7638 = vmatpush3.msra.mxu0 %v4937_v2  ;;  %v6713_v2 = vld [vmem:[%s11636_s9 + $0x170] sm:$0xff] }
 0x6e8   : > { %7701 = vmatpush3.msra.mxu1 %v5185_v54  ;;  %7639 = vmatprep.subr.mxu0 %v11714_v44  ;;  %v6742_v54 = vld [vmem:[%s11636_s9 + $0x1e0] sm:$0xff] }
 0x6e9   : > { %7640 = vmatpush3.msra.mxu0 %v4935_v7  ;;  %7702 = vmatprep.subr.mxu1 %v11714_v44  ;;  %v6695_v7 = vld [vmem:[%s11636_s9 + $0x158] sm:$0xff] }
 0x6ea   : > { %7641 = vmatprep.subr.mxu0 %v11714_v44  ;;  %v4927_v48 = vpop.permute.xlu0 %4926 }
 0x6eb   : > { %v5183_v50 = vpop.permute.xlu1 %5182  ;;  %7642 = vmatpush3.msra.mxu0 %v4933_v18  ;;  %v6712_v18 = vld [vmem:[%s11636_s9 + $0x168] sm:$0xff] }
 0x6ec   : > { %7703 = vmatpush3.msra.mxu1 %v5183_v50  ;;  %7643 = vmatprep.subr.mxu0 %v11714_v44 }
 0x6ed   : > { %7704 = vmatprep.subr.mxu1 %v11714_v44  ;;  %7644 = vmatpush3.msra.mxu0 %v4931_v20  ;;  %v6693_v20 = vld [vmem:[%s11636_s9 + $0x148] sm:$0xff] }
 0x6ee   : > { %7705 = vmatpush3.msra.mxu1 %v5181_v33  ;;  %7645 = vmatprep.subr.mxu0 %v11714_v44  ;;  %v4925_v10 = vpop.permute.xlu0 %4924  ;;  %v6665_v33 = vld [vmem:[%s11636_s9 + $0xe0] sm:$0xff] }
 0x6ef   : > { %v5175_v58 = vpop.permute.xlu1 %5174  ;;  %7706 = vmatprep.subr.mxu1 %v11714_v44  ;;  %7646 = vmatpush3.msra.mxu0 %v4929_v35  ;;  %v6694_v35 = vld [vmem:[%s11636_s9 + $0x150] sm:$0xff] }
 0x6f0   : > { %7707 = vmatpush3.msra.mxu1 %v5179_v31  ;;  %7647 = vmatprep.subr.mxu0 %v11714_v44  ;;  %v6666_v31 = vld [vmem:[%s11636_s9 + $0xe8] sm:$0xff] }
 0x6f1   : > { %7708 = vmatprep.subr.mxu1 %v11714_v44  ;;  %7648 = vmatpush3.msra.mxu0 %v4927_v48  ;;  %v6714_v48 = vld [vmem:[%s11636_s9 + $0x178] sm:$0xff] }
 0x6f2   : > { %7709 = vmatpush3.msra.mxu1 %v5177_v53  ;;  %7649 = vmatprep.subr.mxu0 %v11714_v44  ;;  %v4923_v46 = vpop.permute.xlu0 %4922  ;;  %v6664_v53 = vld [vmem:[%s11636_s9 + $0xd8] sm:$0xff] }
 0x6f3   : > { %v5173_v1 = vpop.permute.xlu1 %5172  ;;  %7710 = vmatprep.subr.mxu1 %v11714_v44  ;;  %7650 = vmatpush3.msra.mxu0 %v4925_v10  ;;  %v6743_v10 = vld [vmem:[%s11636_s9 + $0x1e8] sm:$0xff] }
 0x6f4   : > { %7711 = vmatpush3.msra.mxu1 %v5175_v58  ;;  %7651 = vmatprep.subr.mxu0 %v11714_v44 }
 0x6f5   : > { %7712 = vmatprep.subr.mxu1 %v11714_v44  ;;  %7652 = vmatpush3.msra.mxu0 %v4923_v46  ;;  %v6715_v46 = vld [vmem:[%s11636_s9 + $0x180] sm:$0xff] }
 0x6f6   : > { %7713 = vmatpush3.msra.mxu1 %v5173_v1  ;;  %7653 = vmatprep.subr.mxu0 %v11714_v44  ;;  %v4921_v17 = vpop.permute.xlu0 %4920 }
 0x6f7   : > { %v5171_v62 = vpop.permute.xlu1 %5170  ;;  %7714 = vmatprep.subr.mxu1 %v11714_v44  ;;  %7654 = vmatpush3.msra.mxu0 %v4921_v17 }
 0x6f8   : > { %7715 = vmatpush3.msra.mxu1 %v5171_v62  ;;  %7656 = vmatmul.mubr.msk.f32.vlgmr.msra.gmra.mxu0 %vm4693_vm6, %v6652_v19  ;;  %v6744_v19 = vld [vmem:[%s11636_s9 + $0x1f0] sm:$0xff]  ;;  %v6716_v62 = vld [vmem:[%s11636_s9 + $0x188] sm:$0xff] }
 0x6f9   : > { %7716 = vmatprep.subr.mxu1 %v11714_v44  ;;  %7658 = vmatprep.mubr.msk.f32.mxu0 %vm8063_vm5, %v11714_v44 }
 0x6fa   : > { %v5167_v49 = vpop.permute.xlu0 %5166  ;;  %7765 = vmatprep.subr.mxu0 %v11714_v44 }
 0x6fb   : > { %v5169_v51 = vpop.permute.xlu1 %5168 }
 0x6fc   : > { %7717 = vmatpush3.msra.mxu1 %v5169_v51  ;;  %7659 = vmatmul.mubr.msk.f32.gmra.mxu0 %vm4693_vm6, %v6653_v15 }
 0x6fd   : > { %7718 = vmatprep.subr.mxu1 %v11714_v44  ;;  %7661 = vmatprep.mubr.msk.f32.mxu0 %vm8063_vm5, %v11714_v44 }
 0x6fe   : > { %7719 = vmatpush3.msra.mxu1 %v5167_v49  ;;  %v5427_v39 = vpop.permute.xlu0 %5426  ;;  %v6745_v49 = vld [vmem:[%s11636_s9 + $0x1f8] sm:$0xff] }
 0x6ff   : > { %v5431_v55 = vpop.permute.xlu1 %5430  ;;  %7721 = vmatmul.mubr.msk.f32.vlgmr.msra.gmra.mxu1 %vm4693_vm6, %v6682_v29  ;;  %7830 = vmatprep.subr.mxu1 %v11714_v44  ;;  %v6717_v29 = vld [vmem:[%s11636_s9 + $0x190] sm:$0xff] }
 0x700   : > { %7766 = vmatpush3.msra.mxu0 %v5431_v55  ;;  %7723 = vmatprep.mubr.msk.f32.mxu1 %vm8063_vm5, %v11714_v44 }
 0x701   : > { %7662 = vmatmul.mubr.msk.f32.gmra.mxu0 %vm4693_vm6, %v6654_v28  ;;  %7767 = vmatprep.subr.mxu0 %v11714_v44  ;;  %v6746_v28 = vld [vmem:[%s11636_s9 + $0x200] sm:$0xff] }
 0x702   : > { %v5425_v30 = vpop.permute.xlu0 %5424  ;;  %7664 = vmatprep.mubr.msk.f32.mxu0 %vm8063_vm5, %v11714_v44 }
 0x703   : > { %v5677_v16 = vpop.permute.xlu1 %5676  ;;  %7724 = vmatmul.mubr.msk.f32.gmra.mxu1 %vm4693_vm6, %v6683_v40  ;;  %v6718_v40 = vld [vmem:[%s11636_s9 + $0x198] sm:$0xff] }
 0x704   : > { %7831 = vmatpush3.msra.mxu1 %v5677_v16  ;;  %7726 = vmatprep.mubr.msk.f32.mxu1 %vm8063_vm5, %v11714_v44 }
 0x705   : > { %7665 = vmatmul.mubr.msk.f32.gmra.mxu0 %vm4693_vm6, %v6655_v57  ;;  %7832 = vmatprep.subr.mxu1 %v11714_v44  ;;  %v6747_v57 = vld [vmem:[%s11636_s9 + $0x208] sm:$0xff] }
 0x706   : > { %v5423_v60 = vpop.permute.xlu0 %5422  ;;  %7667 = vmatprep.mubr.msk.f32.mxu0 %vm8063_vm5, %v11714_v44 }
 0x707   : > { %v5673_v4 = vpop.permute.xlu1 %5672  ;;  %7727 = vmatmul.mubr.msk.f32.gmra.mxu1 %vm4693_vm6, %v6684_v45  ;;  %v6719_v45 = vld [vmem:[%s11636_s9 + $0x1a0] sm:$0xff] }
 0x708   : > { %7729 = vmatprep.mubr.msk.f32.mxu1 %vm8063_vm5, %v11714_v44 }
 0x709   : > { %7668 = vmatmul.mubr.msk.f32.gmra.mxu0 %vm4693_vm6, %v6656_v25  ;;  %v6748_v25 = vld [vmem:[%s11636_s9 + $0x210] sm:$0xff] }
 0x70a   : > { %v5421_v26 = vpop.permute.xlu0 %5420  ;;  %7670 = vmatprep.mubr.msk.f32.mxu0 %vm8063_vm5, %v11714_v44 }
 0x70b   : > { %v5671_v12 = vpop.permute.xlu1 %5670  ;;  %7730 = vmatmul.mubr.msk.f32.gmra.mxu1 %vm4693_vm6, %v6685_v36  ;;  %v6720_v36 = vld [vmem:[%s11636_s9 + $0x1a8] sm:$0xff] }
 0x70c   : > { %7732 = vmatprep.mubr.msk.f32.mxu1 %vm8063_vm5, %v11714_v44 }
 0x70d   : > { %7671 = vmatmul.mubr.msk.f32.gmra.mxu0 %vm4693_vm6, %v6657_v3  ;;  %v6749_v3 = vld [vmem:[%s11636_s9 + $0x218] sm:$0xff] }
 0x70e   : > { %v5429_v27 = vpop.permute.xlu0 %5428  ;;  %7673 = vmatprep.mubr.msk.f32.mxu0 %vm8063_vm5, %v11714_v44 }
 0x70f   : > { %v5669_v11 = vpop.permute.xlu1 %5668  ;;  %7733 = vmatmul.mubr.msk.f32.gmra.mxu1 %vm4693_vm6, %v6686_v32  ;;  %7768 = vmatpush3.msra.mxu0 %v5429_v27  ;;  %v6721_v32 = vld [vmem:[%s11636_s9 + $0x1b0] sm:$0xff] }
 0x710   : > { %7769 = vmatprep.subr.mxu0 %v11714_v44  ;;  %7735 = vmatprep.mubr.msk.f32.mxu1 %vm8063_vm5, %v11714_v44 }
 0x711   : > { %7674 = vmatmul.mubr.msk.f32.gmra.mxu0 %vm4693_vm6, %v6658_v43  ;;  %v6750_v43 = vld [vmem:[%s11636_s9 + $0x220] sm:$0xff] }
 0x712   : > { %7770 = vmatpush3.msra.mxu0 %v5427_v39  ;;  %v5419_v13 = vpop.permute.xlu0 %5418  ;;  %7676 = vmatprep.mubr.msk.f32.mxu0 %vm8063_vm5, %v11714_v44 }
 0x713   : > { %v5675_v59 = vpop.permute.xlu1 %5674  ;;  %7736 = vmatmul.mubr.msk.f32.gmra.mxu1 %vm4693_vm6, %v6687_v14  ;;  %7771 = vmatprep.subr.mxu0 %v11714_v44  ;;  %v6722_v14 = vld [vmem:[%s11636_s9 + $0x1b8] sm:$0xff] }
 0x714   : > { %7772 = vmatpush3.msra.mxu0 %v5425_v30  ;;  %7833 = vmatpush3.msra.mxu1 %v5675_v59 }
 0x715   : > { %7677 = vmatmul.mubr.msk.f32.gmra.mxu0 %vm4693_vm6, %v6659_v52  ;;  %7773 = vmatprep.subr.mxu0 %v11714_v44  ;;  %v6751_v52 = vld [vmem:[%s11636_s9 + $0x228] sm:$0xff] }
 0x716   : > { %7834 = vmatprep.subr.mxu1 %v11714_v44  ;;  %7738 = vmatprep.mubr.msk.f32.mxu1 %vm8063_vm5, %v11714_v44  ;;  %v5417_v37 = vpop.permute.xlu0 %5416 }
 0x717   : > { %7774 = vmatpush3.msra.mxu0 %v5423_v60  ;;  %7835 = vmatpush3.msra.mxu1 %v5673_v4  ;;  %v5667_v63 = vpop.permute.xlu1 %5666 }
 0x718   : > { %7739 = vmatmul.mubr.msk.f32.gmra.mxu1 %vm4693_vm6, %v6688_v42  ;;  %7775 = vmatprep.subr.mxu0 %v11714_v44  ;;  %v6723_v42 = vld [vmem:[%s11636_s9 + $0x1c0] sm:$0xff] }
 0x719   : > { %7836 = vmatprep.subr.mxu1 %v11714_v44  ;;  %7679 = vmatprep.mubr.msk.f32.mxu0 %vm8063_vm5, %v11714_v44 }
 0x71a   : > { %7776 = vmatpush3.msra.mxu0 %v5421_v26  ;;  %7837 = vmatpush3.msra.mxu1 %v5671_v12  ;;  %v5415_v23 = vpop.permute.xlu0 %5414 }
 0x71b   : > { %7680 = vmatmul.mubr.msk.f32.gmra.mxu0 %vm4693_vm6, %v6660_v6  ;;  %7777 = vmatprep.subr.mxu0 %v11714_v44  ;;  %v5665_v8 = vpop.permute.xlu1 %5664 }
 0x71c   : > { %7838 = vmatprep.subr.mxu1 %v11714_v44  ;;  %7741 = vmatprep.mubr.msk.f32.mxu1 %vm8063_vm5, %v11714_v44 }
 0x71d   : > { %7778 = vmatpush3.msra.mxu0 %v5419_v13  ;;  %7839 = vmatpush3.msra.mxu1 %v5669_v11 }
 0x71e   : > { %7742 = vmatmul.mubr.msk.f32.gmra.mxu1 %vm4693_vm6, %v6689_v47  ;;  %7779 = vmatprep.subr.mxu0 %v11714_v44  ;;  %v5413_v21 = vpop.permute.xlu0 %5412 }
 0x71f   : > { %7840 = vmatprep.subr.mxu1 %v11714_v44  ;;  %7682 = vmatprep.mubr.msk.f32.mxu0 %vm8063_vm5, %v11714_v44  ;;  %v5663_v9 = vpop.permute.xlu1 %5662 }
 0x720   : > { %7780 = vmatpush3.msra.mxu0 %v5417_v37  ;;  %7841 = vmatpush3.msra.mxu1 %v5667_v63  ;;  %v6752_v37 = vld [vmem:[%s11636_s9 + $0x230] sm:$0xff] }
 0x721   : > { %7683 = vmatmul.mubr.msk.f32.gmra.mxu0 %vm4693_vm6, %v6661_v34  ;;  %7781 = vmatprep.subr.mxu0 %v11714_v44 }
 0x722   : > { %7842 = vmatprep.subr.mxu1 %v11714_v44  ;;  %7744 = vmatprep.mubr.msk.f32.mxu1 %vm8063_vm5, %v11714_v44  ;;  %v5659_v0 = vpop.permute.xlu0 %5658 }
 0x723   : > { %7782 = vmatpush3.msra.mxu0 %v5415_v23  ;;  %7843 = vmatpush3.msra.mxu1 %v5665_v8  ;;  %v5661_v41 = vpop.permute.xlu1 %5660  ;;  %v6724_v8 = vld [vmem:[%s11636_s9 + $0x1c8] sm:$0xff]  ;;  %v6753_v23 = vld [vmem:[%s11636_s9 + $0x238] sm:$0xff] }
 0x724   : > { %7745 = vmatmul.mubr.msk.f32.gmra.mxu1 %vm4693_vm6, %v6690_v5  ;;  %7783 = vmatprep.subr.mxu0 %v11714_v44 }
 0x725   : > { %7844 = vmatprep.subr.mxu1 %v11714_v44  ;;  %7685 = vmatprep.mubr.msk.f32.mxu0 %vm8063_vm5, %v11714_v44 }
 0x726   : > { %7784 = vmatpush3.msra.mxu0 %v5413_v21  ;;  %7845 = vmatpush3.msra.mxu1 %v5663_v9  ;;  %v6725_v9 = vld [vmem:[%s11636_s9 + $0x1d0] sm:$0xff]  ;;  %v6754_v21 = vld [vmem:[%s11636_s9 + $0x240] sm:$0xff] }
 0x727   : > { %7686 = vmatmul.mubr.msk.f32.gmra.mxu0 %vm4693_vm6, %v6662_v38  ;;  %7747 = vmatprep.mubr.msk.f32.mxu1 %vm8063_vm5, %v11714_v44 }
 0x728   : > { %7748 = vmatmul.mubr.msk.f32.gmra.mxu1 %vm4693_vm6, %v6691_v22  ;;  %7846 = vmatprep.subr.mxu1 %v11714_v44  ;;  %v6726_v22 = vld [vmem:[%s11636_s9 + $0x1d8] sm:$0xff] }
 0x729   : > { %7688 = vmatprep.mubr.msk.f32.mxu0 %vm8063_vm5, %v11714_v44  ;;  %7847 = vmatpush3.msra.mxu1 %v5661_v41 }
 0x72a   : > { %7848 = vmatprep.subr.mxu1 %v11714_v44  ;;  %7750 = vmatprep.mubr.msk.f32.mxu1 %vm8063_vm5, %v11714_v44 }
 0x72b   : > { %7689 = vmatmul.mubr.msk.f32.gmra.mxu0 %vm4693_vm6, %v6663_v56  ;;  %7849 = vmatpush3.msra.mxu1 %v5659_v0  ;;  %v6755_v56 = vld [vmem:[%s11636_s9 + $0x248] sm:$0xff] }
 0x72c   : > { %7751 = vmatmul.mubr.msk.f32.gmra.mxu1 %vm4693_vm6, %v6692_v61  ;;  %7691 = vmatprep.mubr.msk.f32.mxu0 %vm8063_vm5, %v11714_v44 }
 0x72d   : > { %7753 = vmatprep.mubr.msk.f32.mxu1 %vm8063_vm5, %v11714_v44  ;;  %7895 = vmatprep.subr.mxu0 %v11714_v44 }
 0x72f   : > { %7692 = vmatmul.mubr.msk.f32.gmra.mxu0 %vm4693_vm6, %v6664_v53  ;;  %v6756_v53 = vld [vmem:[%s11636_s9 + $0x250] sm:$0xff] }
 0x730   : > { %7754 = vmatmul.mubr.msk.f32.gmra.mxu1 %vm4693_vm6, %v6693_v20  ;;  %7694 = vmatprep.mubr.msk.f32.mxu0 %vm8063_vm5, %v11714_v44 }
 0x731   : > { %7756 = vmatprep.mubr.msk.f32.mxu1 %vm8063_vm5, %v11714_v44 }
 0x733   : > { %7695 = vmatmul.mubr.msk.f32.gmra.mxu0 %vm4693_vm6, %v6665_v33 }
 0x734   : > { %7757 = vmatmul.mubr.msk.f32.gmra.mxu1 %vm4693_vm6, %v6694_v35  ;;  %7697 = vmatprep.mubr.msk.f32.mxu0 %vm8063_vm5, %v11714_v44 }
 0x735   : > { %7759 = vmatprep.mubr.msk.f32.mxu1 %vm8063_vm5, %v11714_v44 }
 0x737   : > { %7698 = vmatmul.mubr.msk.f32.gmra.mxu0 %vm4693_vm6, %v6666_v31  ;;  %v4663_v31 = vld [vmem:[%s11637_s10] sm:$0xff] }
 0x738   : > { %7760 = vmatmul.mubr.msk.f32.gmra.mxu1 %vm4693_vm6, %v6695_v7  ;;  %7785 = vmatprep.mubr.msk.f32.mxu0 %vm8063_vm5, %v11714_v44 }
 0x739   : > { %7762 = vmatprep.mubr.msk.f32.mxu1 %vm8063_vm5, %v11714_v44 }
 0x73b   : > { %7786 = vmatmul.mubr.msk.f32.vlgmr.msra.gmra.mxu0 %vm4693_vm6, %v6712_v18  ;;  %v4664_v18 = vld [vmem:[%s11637_s10 + $0x8] sm:$0xff] }
 0x73c   : > { %7763 = vmatmul.mubr.msk.f32.gmra.mxu1 %vm4693_vm6, %v6696_v24  ;;  %7788 = vmatprep.mubr.msk.f32.mxu0 %vm8063_vm5, %v11714_v44 }
 0x73d   : > { %7850 = vmatprep.mubr.msk.f32.mxu1 %vm8063_vm5, %v11714_v44 }
 0x73f   : > { %7789 = vmatmul.mubr.msk.f32.gmra.mxu0 %vm4693_vm6, %v6713_v2 }
 0x740   : > { %7851 = vmatmul.mubr.msk.f32.vlgmr.msra.gmra.mxu1 %vm4693_vm6, %v6742_v54  ;;  %7791 = vmatprep.mubr.msk.f32.mxu0 %vm8063_vm5, %v11714_v44  ;;  %v11157_v50 = vpop.f32.mrf.mxu1 }
 0x741   : > { %7853 = vmatprep.mubr.msk.f32.mxu1 %vm8063_vm5, %v11714_v44  ;;  %v4879_v7 = vadd.f32 %v11157_v50, %v4663_v31 }
 0x742   : > { %v7592_v58 = vpop.f32.mrf.mxu1 }
 0x743   : > { %7792 = vmatmul.mubr.msk.f32.gmra.mxu0 %vm4693_vm6, %v6714_v48  ;;  %v4665_v58 = vld [vmem:[%s11637_s10 + $0x10] sm:$0xff] }
 0x744   : > { %7854 = vmatmul.mubr.msk.f32.gmra.mxu1 %vm4693_vm6, %v6743_v10  ;;  %7794 = vmatprep.mubr.msk.f32.mxu0 %vm8063_vm5, %v11714_v44  ;;  %v11171_v1 = vpop.f32.mrf.mxu1 }
 0x745   : > { %7856 = vmatprep.mubr.msk.f32.mxu1 %vm8063_vm5, %v11714_v44  ;;  %v4880_v48 = vadd.f32 %v11171_v1, %v4664_v18 }
 0x746   : > { %v7595_v17 = vpop.f32.mrf.mxu1 }
 0x747   : > { %7795 = vmatmul.mubr.msk.f32.gmra.mxu0 %vm4693_vm6, %v6715_v46 }
 0x748   : > { %7857 = vmatmul.mubr.msk.f32.gmra.mxu1 %vm4693_vm6, %v6744_v19  ;;  %7797 = vmatprep.mubr.msk.f32.mxu0 %vm8063_vm5, %v11714_v44  ;;  %v11185_v15 = vpop.f32.mrf.mxu1 }
 0x749   : > { %7859 = vmatprep.mubr.msk.f32.mxu1 %vm8063_vm5, %v11714_v44 }
 0x74a   : > { %v7598_v51 = vpop.f32.mrf.mxu1 }
 0x74b   : > { %7798 = vmatmul.mubr.msk.f32.gmra.mxu0 %vm4693_vm6, %v6716_v62  ;;  %v4881_v62 = vadd.f32 %v11185_v15, %v4665_v58 }
 0x74c   : > { %7860 = vmatmul.mubr.msk.f32.gmra.mxu1 %vm4693_vm6, %v6745_v49  ;;  %7800 = vmatprep.mubr.msk.f32.mxu0 %vm8063_vm5, %v11714_v44  ;;  %v11199_v39 = vpop.f32.mrf.mxu1  ;;  %v4666_v49 = vld [vmem:[%s11637_s10 + $0x18] sm:$0xff] }
 0x74d   : > { %7862 = vmatprep.mubr.msk.f32.mxu1 %vm8063_vm5, %v11714_v44 }
 0x74e   : > { %v7601_v55 = vpop.f32.mrf.mxu1 }
 0x74f   : > { %7801 = vmatmul.mubr.msk.f32.gmra.mxu0 %vm4693_vm6, %v6717_v29 }
 0x750   : > { %7863 = vmatmul.mubr.msk.f32.gmra.mxu1 %vm4693_vm6, %v6746_v28  ;;  %7803 = vmatprep.mubr.msk.f32.mxu0 %vm8063_vm5, %v11714_v44  ;;  %v11213_v30 = vpop.f32.mrf.mxu1 }
 0x751   : > { %7865 = vmatprep.mubr.msk.f32.mxu1 %vm8063_vm5, %v11714_v44 }
 0x752   : > { %v7604_v16 = vpop.f32.mrf.mxu1 }
 0x753   : > { %7804 = vmatmul.mubr.msk.f32.gmra.mxu0 %vm4693_vm6, %v6718_v40  ;;  %v4882_v40 = vadd.f32 %v11199_v39, %v4666_v49  ;;  %v4667_v16 = vld [vmem:[%s11637_s10 + $0x20] sm:$0xff] }
 0x754   : > { %7866 = vmatmul.mubr.msk.f32.gmra.mxu1 %vm4693_vm6, %v6747_v57  ;;  %7806 = vmatprep.mubr.msk.f32.mxu0 %vm8063_vm5, %v11714_v44  ;;  %v11227_v60 = vpop.f32.mrf.mxu1 }
 0x755   : > { %7868 = vmatprep.mubr.msk.f32.mxu1 %vm8063_vm5, %v11714_v44 }
 0x756   : > { %v7607_v4 = vpop.f32.mrf.mxu1 }
 0x757   : > { %7807 = vmatmul.mubr.msk.f32.gmra.mxu0 %vm4693_vm6, %v6719_v45 }
 0x758   : > { %7869 = vmatmul.mubr.msk.f32.gmra.mxu1 %vm4693_vm6, %v6748_v25  ;;  %7809 = vmatprep.mubr.msk.f32.mxu0 %vm8063_vm5, %v11714_v44  ;;  %v11241_v26 = vpop.f32.mrf.mxu1 }
 0x759   : > { %7871 = vmatprep.mubr.msk.f32.mxu1 %vm8063_vm5, %v11714_v44 }
 0x75a   : > { %v7610_v12 = vpop.f32.mrf.mxu1 }
 0x75b   : > { %7810 = vmatmul.mubr.msk.f32.gmra.mxu0 %vm4693_vm6, %v6720_v36 }
 0x75c   : > { %7872 = vmatmul.mubr.msk.f32.gmra.mxu1 %vm4693_vm6, %v6749_v3  ;;  %7812 = vmatprep.mubr.msk.f32.mxu0 %vm8063_vm5, %v11714_v44  ;;  %v11255_v27 = vpop.f32.mrf.mxu1  ;;  %v4883_v3 = vadd.f32 %v11213_v30, %v4667_v16 }
 0x75d   : > { %7874 = vmatprep.mubr.msk.f32.mxu1 %vm8063_vm5, %v11714_v44 }
 0x75e   : > { %v7613_v11 = vpop.f32.mrf.mxu1 }
 0x75f   : > { %7813 = vmatmul.mubr.msk.f32.gmra.mxu0 %vm4693_vm6, %v6721_v32  ;;  %v4668_v32 = vld [vmem:[%s11637_s10 + $0x28] sm:$0xff] }
 0x760   : > { %7875 = vmatmul.mubr.msk.f32.gmra.mxu1 %vm4693_vm6, %v6750_v43  ;;  %7815 = vmatprep.mubr.msk.f32.mxu0 %vm8063_vm5, %v11714_v44  ;;  %v11269_v13 = vpop.f32.mrf.mxu1 }
 0x761   : > { %7877 = vmatprep.mubr.msk.f32.mxu1 %vm8063_vm5, %v11714_v44 }
 0x762   : > { %v7616_v59 = vpop.f32.mrf.mxu1 }
 0x763   : > { %7816 = vmatmul.mubr.msk.f32.gmra.mxu0 %vm4693_vm6, %v6722_v14  ;;  %v4884_v59 = vadd.f32 %v11227_v60, %v4668_v32 }
 0x764   : > { %7878 = vmatmul.mubr.msk.f32.gmra.mxu1 %vm4693_vm6, %v6751_v52  ;;  %7818 = vmatprep.mubr.msk.f32.mxu0 %vm8063_vm5, %v11714_v44  ;;  %v11283_v63 = vpop.f32.mrf.mxu1 }
 0x765   : > { %7880 = vmatprep.mubr.msk.f32.mxu1 %vm8063_vm5, %v11714_v44 }
 0x766   : > { %v7619_v6 = vpop.f32.mrf.mxu1 }
 0x767   : > { %7819 = vmatmul.mubr.msk.f32.gmra.mxu0 %vm4693_vm6, %v6723_v42 }
 0x768   : > { %7881 = vmatmul.mubr.msk.f32.gmra.mxu1 %vm4693_vm6, %v6752_v37  ;;  %7821 = vmatprep.mubr.msk.f32.mxu0 %vm8063_vm5, %v11714_v44  ;;  %v11297_v47 = vpop.f32.mrf.mxu1  ;;  %v4669_v37 = vld [vmem:[%s11637_s10 + $0x30] sm:$0xff] }
 0x769   : > { %7883 = vmatprep.mubr.msk.f32.mxu1 %vm8063_vm5, %v11714_v44 }
 0x76a   : > { %v7622_v34 = vpop.f32.mrf.mxu1 }
 0x76b   : > { %7822 = vmatmul.mubr.msk.f32.gmra.mxu0 %vm4693_vm6, %v6724_v8 }
 0x76c   : > { %7884 = vmatmul.mubr.msk.f32.gmra.mxu1 %vm4693_vm6, %v6753_v23  ;;  %7824 = vmatprep.mubr.msk.f32.mxu0 %vm8063_vm5, %v11714_v44  ;;  %v11311_v5 = vpop.f32.mrf.mxu1 }
 0x76d   : > { %7886 = vmatprep.mubr.msk.f32.mxu1 %vm8063_vm5, %v11714_v44 }
 0x76e   : > { %v7625_v38 = vpop.f32.mrf.mxu1 }
 0x76f   : > { %7825 = vmatmul.mubr.msk.f32.gmra.mxu0 %vm4693_vm6, %v6725_v9  ;;  %v4885_v9 = vadd.f32 %v11241_v26, %v4669_v37  ;;  %v4670_v38 = vld [vmem:[%s11637_s10 + $0x38] sm:$0xff]  ;;  %v4671_v26 = vld [vmem:[%s11637_s10 + $0x40] sm:$0xff] }
 0x770   : > { %7887 = vmatmul.mubr.msk.f32.gmra.mxu1 %vm4693_vm6, %v6754_v21  ;;  %7827 = vmatprep.mubr.msk.f32.mxu0 %vm8063_vm5, %v11714_v44  ;;  %v11325_v41 = vpop.f32.mrf.mxu1 }
 0x771   : > { %7889 = vmatprep.mubr.msk.f32.mxu1 %vm8063_vm5, %v11714_v44 }
 0x772   : > { %v7628_v61 = vpop.f32.mrf.mxu1 }
 0x773   : > { %7828 = vmatmul.mubr.msk.f32.gmra.mxu0 %vm4693_vm6, %v6726_v22 }
 0x774   : > { %7890 = vmatmul.mubr.msk.f32.gmra.mxu1 %vm4693_vm6, %v6755_v56  ;;  %v11334_v0 = vpop.f32.mrf.mxu1  ;;  %7925 = vmatprep.mubr.msk.f32.mxu0 %vm8063_vm5, %v11714_v44 }
 0x775   : > { %7892 = vmatprep.mubr.msk.f32.mxu1 %vm8063_vm5, %v11714_v44 }
 0x776   : > { %v7631_v20 = vpop.f32.mrf.mxu1 }
 0x777   : > { %v4886_v20 = vadd.f32 %v11255_v27, %v4670_v38  ;;  %v4672_v27 = vld [vmem:[%s11637_s10 + $0x48] sm:$0xff] }
 0x778   : > { %7893 = vmatmul.mubr.msk.f32.gmra.mxu1 %vm4693_vm6, %v6756_v53  ;;  %v11344_v33 = vpop.f32.mrf.mxu1  ;;  %v4888_v49 = vadd.f32 %v11283_v63, %v4672_v27 }
 0x77a   : > { %v7634_v35 = vpop.f32.mrf.mxu1 }
 0x7b8   : > { %v5061_v24 = vpop.f32.mrf.mxu0 }
 0x7b9   : > { %v5135_v2 = vadd.f32 %v5061_v24, %v4879_v7 }
 0x7ba   : > { %v7657_v54 = vpop.f32.mrf.mxu0 }
 0x7bc   : > { %v5066_v10 = vpop.f32.mrf.mxu0 }
 0x7bd   : > { %v5136_v46 = vadd.f32 %v5066_v10, %v4880_v48  ;;  %v4887_v48 = vadd.f32 %v11269_v13, %v4671_v26  ;;  %v4673_v13 = vld [vmem:[%s11637_s10 + $0x50] sm:$0xff] }
 0x7be   : > { %v7660_v19 = vpop.f32.mrf.mxu0  ;;  %v4889_v16 = vadd.f32 %v11297_v47, %v4673_v13 }
 0x7bf   : > { %v5307_v17 = vpop.f32.mrf.mxu1 }
 0x7c0   : > { %v11358_v50 = vadd.f32 %v5307_v17, %v5135_v2 }
 0x7c1   : > { %v5071_v51 = vpop.f32.mrf.mxu0  ;;  %v7722_v29 = vpop.f32.mrf.mxu1 }
 0x7c2   : > { %v5137_v28 = vadd.f32 %v5071_v51, %v4881_v62 }
 0x7c3   : > { %v7663_v1 = vpop.f32.mrf.mxu0  ;;  %v5312_v55 = vpop.f32.mrf.mxu1 }
 0x7c4   : > { %v11364_v57 = vadd.f32 %v5312_v55, %v5136_v46 }
 0x7c5   : > { %v5076_v15 = vpop.f32.mrf.mxu0  ;;  %v7725_v45 = vpop.f32.mrf.mxu1 }
 0x7c6   : > { %v5138_v25 = vadd.f32 %v5076_v15, %v4882_v40  ;;  %v4674_v45 = vld [vmem:[%s11637_s10 + $0x58] sm:$0xff] }
 0x7c7   : > { %v7666_v4 = vpop.f32.mrf.mxu0  ;;  %v5317_v36 = vpop.f32.mrf.mxu1  ;;  %v4890_v32 = vadd.f32 %v11311_v5, %v4674_v45 }
 0x7c8   : > { %v11370_v12 = vadd.f32 %v5317_v36, %v5137_v28 }
 0x7c9   : > { %v5081_v39 = vpop.f32.mrf.mxu0  ;;  %v7728_v43 = vpop.f32.mrf.mxu1 }
 0x7ca   : > { %v5139_v11 = vadd.f32 %v5081_v39, %v4883_v3  ;;  %v4675_v43 = vld [vmem:[%s11637_s10 + $0x60] sm:$0xff] }
 0x7cb   : > { %v7669_v14 = vpop.f32.mrf.mxu0  ;;  %v5322_v52 = vpop.f32.mrf.mxu1  ;;  %v4891_v37 = vadd.f32 %v11325_v41, %v4675_v43 }
 0x7cc   : > { %v11376_v42 = vadd.f32 %v5322_v52, %v5138_v25 }
 0x7cd   : > { %v5086_v30 = vpop.f32.mrf.mxu0  ;;  %v7731_v6 = vpop.f32.mrf.mxu1 }
 0x7ce   : > { %v5140_v8 = vadd.f32 %v5086_v30, %v4884_v59  ;;  %v4676_v6 = vld [vmem:[%s11637_s10 + $0x68] sm:$0xff] }
 0x7cf   : > { %v7672_v23 = vpop.f32.mrf.mxu0  ;;  %v5327_v34 = vpop.f32.mrf.mxu1  ;;  %v4892_v38 = vadd.f32 %v11334_v0, %v4676_v6 }
 0x7d0   : > { %v11382_v21 = vadd.f32 %v5327_v34, %v5139_v11 }
 0x7d1   : > { %v5091_v60 = vpop.f32.mrf.mxu0  ;;  %v7734_v22 = vpop.f32.mrf.mxu1 }
 0x7d2   : > { %v5141_v56 = vadd.f32 %v5091_v60, %v4885_v9 }
 0x7d3   : > { %v7675_v61 = vpop.f32.mrf.mxu0  ;;  %v5332_v53 = vpop.f32.mrf.mxu1 }
 0x7d4   : > { %v11388_v35 = vadd.f32 %v5332_v53, %v5140_v8 }
 0x7d5   : > { %v5096_v31 = vpop.f32.mrf.mxu0  ;;  %v7737_v7 = vpop.f32.mrf.mxu1 }
 0x7d6   : > { %v5142_v18 = vadd.f32 %v5096_v31, %v4886_v20 }
 0x7d7   : > { %v7678_v24 = vpop.f32.mrf.mxu0 }
 0x7d8   : > { %v5337_v2 = vpop.f32.mrf.mxu1 }
 0x7d9   : > { %v11393_v54 = vadd.f32 %v5337_v2, %v5141_v56 }
 0x7da   : > { %v7740_v10 = vpop.f32.mrf.mxu1 }
 0x7db   : > { %v5101_v58 = vpop.f32.mrf.mxu0 }
 0x7dc   : > { %v5143_v46 = vadd.f32 %v5101_v58, %v4887_v48 }
 0x7dd   : > { %v7681_v19 = vpop.f32.mrf.mxu0 }
 0x7de   : > { %v5342_v17 = vpop.f32.mrf.mxu1 }
 0x7df   : > { %v11399_v62 = vadd.f32 %v5342_v17, %v5142_v18 }
 0x7e0   : > { %v7743_v51 = vpop.f32.mrf.mxu1 }
 0x7e1   : > { %v5106_v29 = vpop.f32.mrf.mxu0 }
 0x7e2   : > { %v5144_v28 = vadd.f32 %v5106_v29, %v4888_v49 }
 0x7e3   : > { %v7684_v1 = vpop.f32.mrf.mxu0 }
 0x7e4   : > { %v5347_v55 = vpop.f32.mrf.mxu1 }
 0x7e5   : > { %v11405_v40 = vadd.f32 %v5347_v55, %v5143_v46 }
 0x7e6   : > { %v7746_v15 = vpop.f32.mrf.mxu1 }
 0x7e7   : > { %v5111_v25 = vpop.f32.mrf.mxu0 }
 0x7e8   : > { %v5145_v63 = vadd.f32 %v5111_v25, %v4889_v16  ;;  %v5352_v4 = vpop.f32.mrf.mxu1 }
 0x7e9   : > { %v7687_v36 = vpop.f32.mrf.mxu0  ;;  %v11411_v3 = vadd.f32 %v5352_v4, %v5144_v28 }
 0x7ea   : > { %v7749_v39 = vpop.f32.mrf.mxu1 }
 0x7eb   : > { %v5116_v11 = vpop.f32.mrf.mxu0 }
 0x7ec   : > { %v5146_v47 = vadd.f32 %v5116_v11, %v4890_v32  ;;  %v5357_v14 = vpop.f32.mrf.mxu1 }
 0x7ed   : > { %v7690_v52 = vpop.f32.mrf.mxu0  ;;  %v11417_v59 = vadd.f32 %v5357_v14, %v5145_v63 }
 0x7ee   : > { %v7752_v30 = vpop.f32.mrf.mxu1 }
 0x7ef   : > { %v5121_v8 = vpop.f32.mrf.mxu0 }
 0x7f0   : > { %v5147_v5 = vadd.f32 %v5121_v8, %v4891_v37  ;;  %v5362_v23 = vpop.f32.mrf.mxu1 }
 0x7f1   : > { %v7693_v34 = vpop.f32.mrf.mxu0  ;;  %v11423_v9 = vadd.f32 %v5362_v23, %v5146_v47 }
 0x7f2   : > { %v7755_v60 = vpop.f32.mrf.mxu1 }
 0x7f3   : > { %v5126_v22 = vpop.f32.mrf.mxu0 }
 0x7f4   : > { %v11426_v56 = vadd.f32 %v5126_v22, %v4892_v38  ;;  %v5367_v61 = vpop.f32.mrf.mxu1 }
 0x7f5   : > { %v7696_v53 = vpop.f32.mrf.mxu0  ;;  %v11428_v41 = vadd.f32 %v5367_v61, %v5147_v5 }
 0x7f6   : > { %v7758_v20 = vpop.f32.mrf.mxu1 }
 0x7f7   : > { %v11430_v31 = vpop.f32.mrf.mxu0 }
 0x7f8   : > { %v11432_v7 = vpop.f32.mrf.mxu1 }
 0x7f9   : > { %v7699_v18 = vpop.f32.mrf.mxu0 }
 0x7fa   : > { %v7761_v26 = vpop.f32.mrf.mxu1 }
 0x7fb   : > { %v5553_v24 = vpop.f32.mrf.mxu0 }
 0x7fc   : > { %v5627_v2 = vadd.f32 %v5553_v24, %v11358_v50  ;;  %v11435_v48 = vpop.f32.mrf.mxu1 }
 0x7fd   : > { %v7787_v0 = vpop.f32.mrf.mxu0 }
 0x7fe   : > { %v7764_v10 = vpop.f32.mrf.mxu1 }
 0x7ff   : > { %v5558_v58 = vpop.f32.mrf.mxu0 }
 0x800   : > { %v5628_v46 = vadd.f32 %v5558_v58, %v11364_v57  ;;  %v5799_v27 = vpop.f32.mrf.mxu1 }
 0x801   : > { %v7790_v19 = vpop.f32.mrf.mxu0  ;;  %v11438_v17 = vadd.f32 %v5799_v27, %v5627_v2 }
 0x802   : > { %v7852_v49 = vpop.f32.mrf.mxu1 }
 0x803   : > { %v5563_v51 = vpop.f32.mrf.mxu0 }
 0x804   : > { %v5629_v29 = vadd.f32 %v5563_v51, %v11370_v12  ;;  %v5804_v28 = vpop.f32.mrf.mxu1  ;;  %v4677_v51 = vld [vmem:[%s11637_s10 + $0x70] sm:$0xff] }
 0x805   : > { %v7793_v13 = vpop.f32.mrf.mxu0  ;;  %v11441_v1 = vadd.f32 %v5804_v28, %v5628_v46 }
 0x806   : > { %v7855_v50 = vpop.f32.mrf.mxu1 }
 0x807   : > { %v5568_v55 = vpop.f32.mrf.mxu0  ;;  %v4893_v50 = vadd.f32 %v11344_v33, %v4677_v51  ;;  %v5913_v51 = vld [vmem:[%s11638_s11 + $0x50] sm:$0xf] }
 0x808   : > { %v5630_v16 = vadd.f32 %v5568_v55, %v11376_v42  ;;  %v5809_v15 = vpop.f32.mrf.mxu1 }
 0x809   : > { %v7796_v45 = vpop.f32.mrf.mxu0  ;;  %v11444_v25 = vadd.f32 %v5809_v15, %v5629_v29  ;;  %v5149_v15 = vadd.f32 %v11430_v31, %v4893_v50 }
 0x80a   : > { %v7858_v57 = vpop.f32.mrf.mxu1 }
 0x80b   : > { %v11446_v63 = vpop.f32.mrf.mxu0 }
 0x80c   : > { %v5814_v4 = vpop.f32.mrf.mxu1 }
 0x80d   : > { %v7799_v36 = vpop.f32.mrf.mxu0  ;;  %v11448_v32 = vadd.f32 %v5814_v4, %v5630_v16  ;;  %v5394_v4 = vadd.f32 %v11432_v7, %v11426_v56 }
 0x80e   : > { %v7861_v12 = vpop.f32.mrf.mxu1  ;;  %v5395_v36 = vadd.f32 %v11435_v48, %v5149_v15 }
 0x80f   : > { %v11450_v39 = vpop.f32.mrf.mxu0 }
 0x810   : > { %v11452_v43 = vpop.f32.mrf.mxu1 }
 0x811   : > { %v7802_v11 = vpop.f32.mrf.mxu0 }
 0x812   : > { %v7864_v47 = vpop.f32.mrf.mxu1 }
 0x813   : > { %v11454_v14 = vpop.f32.mrf.mxu0 }
 0x814   : > { %v11456_v42 = vpop.f32.mrf.mxu1 }
 0x815   : > { %v7805_v52 = vpop.f32.mrf.mxu0 }
 0x816   : > { %v7867_v37 = vpop.f32.mrf.mxu1 }
 0x817   : > { %v5588_v30 = vpop.f32.mrf.mxu0 }
 0x818   : > { %v11458_v6 = vpop.f32.mrf.mxu1 }
 0x819   : > { %v7808_v8 = vpop.f32.mrf.mxu0 }
 0x81a   : > { %v7870_v5 = vpop.f32.mrf.mxu1 }
 0x81b   : > { %v5593_v23 = vpop.f32.mrf.mxu0 }
 0x81c   : > { %v11460_v34 = vpop.f32.mrf.mxu1 }
 0x81d   : > { %v7811_v38 = vpop.f32.mrf.mxu0 }
 0x81e   : > { %v7873_v60 = vpop.f32.mrf.mxu1 }
 0x81f   : > { %v5598_v22 = vpop.f32.mrf.mxu0 }
 0x820   : > { %v5839_v61 = vpop.f32.mrf.mxu1  ;;  %v5636_v7 = vadd.f32 %v5598_v22, %v11411_v3  ;;  %v5633_v3 = vadd.f32 %v11454_v14, %v11393_v54 }
 0x821   : > { %v7814_v53 = vpop.f32.mrf.mxu0 }
 0x822   : > { %v7876_v20 = vpop.f32.mrf.mxu1 }
 0x823   : > { %v5603_v18 = vpop.f32.mrf.mxu0 }
 0x824   : > { %v5844_v26 = vpop.f32.mrf.mxu1  ;;  %v5637_v20 = vadd.f32 %v5603_v18, %v11417_v59  ;;  %v5634_v59 = vadd.f32 %v5588_v30, %v11399_v62  ;;  %v5631_v30 = vadd.f32 %v11446_v63, %v11382_v21  ;;  %v5891_v21 = vmax.f32 %v11448_v32, 0.0  ;;  %v5903_v32 = vld [vmem:[%s11638_s11] sm:$0xff] }
 0x825   : > { %v7817_v24 = vpop.f32.mrf.mxu0  ;;  %v5890_v63 = vmax.f32 %v11444_v25, 0.0  ;;  %v5906_v25 = vld [vmem:[%s11638_s11 + $0x18] sm:$0xff] }
 0x826   : > { %v7879_v2 = vpop.f32.mrf.mxu1  ;;  %v5880_v22 = vadd.f32 %v11460_v34, %v5634_v59  ;;  %v5877_v34 = vadd.f32 %v11452_v43, %v5631_v30  ;;  %v5889_v43 = vmax.f32 %v11441_v1, 0.0  ;;  %v5904_v1 = vld [vmem:[%s11638_s11 + $0x8] sm:$0xff] }
 0x827   : > { %v5608_v0 = vpop.f32.mrf.mxu0 }
 0x828   : > { %v5849_v10 = vpop.f32.mrf.mxu1  ;;  %v5638_v60 = vadd.f32 %v5608_v0, %v11423_v9  ;;  %v5895_v14 = vmax.f32 %v5880_v22, 0.0  ;;  %v5918_v22 = vld [vmem:[%s11639_s12 + $0x20] sm:$0xff] }
 0x829   : > { %v7820_v58 = vpop.f32.mrf.mxu0  ;;  %v5883_v48 = vadd.f32 %v5849_v10, %v5637_v20 }
 0x82a   : > { %v7882_v46 = vpop.f32.mrf.mxu1  ;;  %v5882_v58 = vadd.f32 %v5844_v26, %v5636_v7  ;;  %v5908_v26 = vld [vmem:[%s11638_s11 + $0x28] sm:$0xff]  ;;  %v5921_v7 = vld [vmem:[%s11639_s12 + $0x38] sm:$0xff] }
 0x82b   : > { %v5613_v27 = vpop.f32.mrf.mxu0  ;;  %v5898_v0 = vmax.f32 %v5883_v48, 0.0  ;;  %v5909_v46 = vld [vmem:[%s11638_s11 + $0x30] sm:$0xff] }
 0x82c   : > { %v5854_v19 = vpop.f32.mrf.mxu1  ;;  %v5639_v8 = vadd.f32 %v5613_v27, %v11428_v41  ;;  %v5635_v41 = vadd.f32 %v5593_v23, %v11405_v40  ;;  %v5897_v10 = vmax.f32 %v5882_v58, 0.0  ;;  %v5632_v40 = vadd.f32 %v11450_v39, %v11388_v35  ;;  %v5910_v27 = vld [vmem:[%s11638_s11 + $0x38] sm:$0xff]  ;;  %v5920_v58 = vld [vmem:[%s11639_s12 + $0x30] sm:$0xff] }
 0x82d   : > { %v7823_v49 = vpop.f32.mrf.mxu0  ;;  %v5884_v24 = vadd.f32 %v5854_v19, %v5638_v60  ;;  %v5879_v23 = vadd.f32 %v11458_v6, %v5633_v3  ;;  %v5892_v39 = vmax.f32 %v5877_v34, 0.0  ;;  %v5907_v6 = vld [vmem:[%s11638_s11 + $0x20] sm:$0xff] }
 0x82e   : > { %v7885_v29 = vpop.f32.mrf.mxu1  ;;  %v5881_v18 = vadd.f32 %v5839_v61, %v5635_v41  ;;  %v5878_v54 = vadd.f32 %v11456_v42, %v5632_v40  ;;  %v5888_v42 = vmax.f32 %v11438_v17, 0.0  ;;  %v5905_v17 = vld [vmem:[%s11638_s11 + $0x10] sm:$0xff]  ;;  %v5911_v19 = vld [vmem:[%s11638_s11 + $0x40] sm:$0xff]  ;;  %v5912_v49 = vld [vmem:[%s11638_s11 + $0x48] sm:$0xff] }
 0x82f   : > { %v5618_v28 = vpop.f32.mrf.mxu0  ;;  %v5899_v9 = vmax.f32 %v5884_v24, 0.0  ;;  %v5894_v61 = vmax.f32 %v5879_v23, 0.0  ;;  %v6090_v29 = vld [vmem:[%s11640_s13] sm:$0xff]  ;;  %v5917_v23 = vld [vmem:[%s11639_s12 + $0x18] sm:$0xff] }
 0x830   : > { %v5859_v13 = vpop.f32.mrf.mxu1  ;;  %v5640_v47 = vadd.f32 %v5618_v28, %v5394_v4  ;;  %v5896_v62 = vmax.f32 %v5881_v18, 0.0  ;;  %v5893_v35 = vmax.f32 %v5878_v54, 0.0  ;;  %v5919_v18 = vld [vmem:[%s11639_s12 + $0x28] sm:$0xff]  ;;  %v5916_v54 = vld [vmem:[%s11639_s12 + $0x10] sm:$0xff] }
 0x831   : > { %v7826_v55 = vpop.f32.mrf.mxu0  ;;  %v5885_v31 = vadd.f32 %v5859_v13, %v5639_v8 }
 0x832   : > { %v7888_v16 = vpop.f32.mrf.mxu1 }
 0x833   : > { %v5623_v45 = vpop.f32.mrf.mxu0  ;;  %v5900_v2 = vmax.f32 %v5885_v31, 0.0  ;;  %v5924_v31 = vld [vmem:[%s11639_s12 + $0x50] sm:$0xf] }
 0x834   : > { %v5864_v57 = vpop.f32.mrf.mxu1  ;;  %v5641_v52 = vadd.f32 %v5623_v45, %v5395_v36 }
 0x835   : > { %v7829_v12 = vpop.f32.mrf.mxu0  ;;  %v5886_v5 = vadd.f32 %v5864_v57, %v5640_v47 }
 0x836   : > { %v7891_v11 = vpop.f32.mrf.mxu1 }
 0x837   : > { %v5901_v56 = vmax.f32 %v5886_v5, 0.0 }
 0x838   : > { %v5869_v37 = vpop.f32.mrf.mxu1 }
 0x839   : > { %v5887_v33 = vadd.f32 %v5869_v37, %v5641_v52 }
 0x83a   : > { %v7894_v38 = vpop.f32.mrf.mxu1 }
 0x83b   : > { %v5902_v53 = vmax.f32 %v5887_v33, 0.0  ;;  %v5923_v38 = vld [vmem:[%s11639_s12 + $0x48] sm:$0xff] }
 0x83d   : > { %7896 = vmatpush3.msra.mxu0 %v5902_v53  ;;  %v5922_v53 = vld [vmem:[%s11639_s12 + $0x40] sm:$0xff] }
 0x83e   : > { %7897 = vmatprep.subr.mxu0 %v11714_v44 }
 0x83f   : > { %7898 = vmatpush3.msra.mxu0 %v5901_v56 }
 0x840   : > { %7899 = vmatprep.subr.mxu0 %v11714_v44 }
 0x841   : > { %7900 = vmatpush3.msra.mxu0 %v5900_v2 }
 0x842   : > { %7901 = vmatprep.subr.mxu0 %v11714_v44 }
 0x843   : > { %7902 = vmatpush3.msra.mxu0 %v5899_v9 }
 0x844   : > { %7903 = vmatprep.subr.mxu0 %v11714_v44 }
 0x845   : > { %7904 = vmatpush3.msra.mxu0 %v5898_v0 }
 0x846   : > { %7905 = vmatprep.subr.mxu0 %v11714_v44 }
 0x847   : > { %7906 = vmatpush3.msra.mxu0 %v5897_v10 }
 0x848   : > { %7907 = vmatprep.subr.mxu0 %v11714_v44 }
 0x849   : > { %7908 = vmatpush3.msra.mxu0 %v5896_v62 }
 0x84a   : > { %7909 = vmatprep.subr.mxu0 %v11714_v44 }
 0x84b   : > { %7910 = vmatpush3.msra.mxu0 %v5895_v14 }
 0x84c   : > { %7911 = vmatprep.subr.mxu0 %v11714_v44 }
 0x84d   : > { %7912 = vmatpush3.msra.mxu0 %v5894_v61  ;;  %v5915_v61 = vld [vmem:[%s11639_s12 + $0x8] sm:$0xff] }
 0x84e   : > { %7913 = vmatprep.subr.mxu0 %v11714_v44 }
 0x84f   : > { %7914 = vmatpush3.msra.mxu0 %v5893_v35 }
 0x850   : > { %7915 = vmatprep.subr.mxu0 %v11714_v44 }
 0x851   : > { %7916 = vmatpush3.msra.mxu0 %v5892_v39 }
 0x852   : > { %7917 = vmatprep.subr.mxu0 %v11714_v44 }
 0x853   : > { %7918 = vmatpush3.msra.mxu0 %v5891_v21  ;;  %v5914_v21 = vld [vmem:[%s11639_s12] sm:$0xff] }
 0x854   : > { %7919 = vmatprep.subr.mxu0 %v11714_v44 }
 0x855   : > { %7920 = vmatpush3.msra.mxu0 %v5890_v63 }
 0x856   : > { %7921 = vmatprep.subr.mxu0 %v11714_v44 }
 0x857   : > { %7922 = vmatpush3.msra.mxu0 %v5889_v43 }
 0x858   : > { %7923 = vmatprep.subr.mxu0 %v11714_v44 }
 0x859   : > { %7924 = vmatpush3.msra.mxu0 %v5888_v42 }
 0x85a   : > { %7926 = vmatmul.mubr.msk.f32.vlgmr.msra.gmra.mxu0 %vm5925_vm7, %v5903_v32 }
 0x85b   : > { %7928 = vmatprep.mubr.msk.f32.mxu0 %vm8063_vm5, %v11714_v44 }
 0x85e   : > { %7929 = vmatmul.mubr.msk.f32.gmra.mxu0 %vm5925_vm7, %v5904_v1 }
 0x85f   : > { %7931 = vmatprep.mubr.msk.f32.mxu0 %vm8063_vm5, %v11714_v44 }
 0x862   : > { %7932 = vmatmul.mubr.msk.f32.gmra.mxu0 %vm5925_vm7, %v5905_v17 }
 0x863   : > { %7934 = vmatprep.mubr.msk.f32.mxu0 %vm8063_vm5, %v11714_v44 }
 0x866   : > { %7935 = vmatmul.mubr.msk.f32.gmra.mxu0 %vm5925_vm7, %v5906_v25  ;;  %v6091_v25 = vld [vmem:[%s11640_s13 + $0x8] sm:$0x3] }
 0x867   : > { %7937 = vmatprep.mubr.msk.f32.mxu0 %vm8063_vm5, %v11714_v44 }
 0x86a   : > { %7938 = vmatmul.mubr.msk.f32.gmra.mxu0 %vm5925_vm7, %v5907_v6  ;;  %v6093_v6 = vld [vmem:[%s11641_s14 + $0x8] sm:$0x3] }
 0x86b   : > { %7940 = vmatprep.mubr.msk.f32.mxu0 %vm8063_vm5, %v11714_v44 }
 0x86e   : > { %7941 = vmatmul.mubr.msk.f32.gmra.mxu0 %vm5925_vm7, %v5908_v26 }
 0x86f   : > { %7943 = vmatprep.mubr.msk.f32.mxu0 %vm8063_vm5, %v11714_v44 }
 0x872   : > { %7944 = vmatmul.mubr.msk.f32.gmra.mxu0 %vm5925_vm7, %v5909_v46  ;;  %v6092_v46 = vld [vmem:[%s11641_s14] sm:$0xff] }
 0x873   : > { %7946 = vmatprep.mubr.msk.f32.mxu0 %vm8063_vm5, %v11714_v44 }
 0x876   : > { %7947 = vmatmul.mubr.msk.f32.gmra.mxu0 %vm5925_vm7, %v5910_v27 }
 0x877   : > { %7949 = vmatprep.mubr.msk.f32.mxu0 %vm8063_vm5, %v11714_v44 }
 0x87a   : > { %7950 = vmatmul.mubr.msk.f32.gmra.mxu0 %vm5925_vm7, %v5911_v19 }
 0x87b   : > { %7952 = vmatprep.mubr.msk.f32.mxu0 %vm8063_vm5, %v11714_v44 }
 0x87e   : > { %7953 = vmatmul.mubr.msk.f32.gmra.mxu0 %vm5925_vm7, %v5912_v49 }
 0x87f   : > { %7955 = vmatprep.mubr.msk.f32.mxu0 %vm8063_vm5, %v11714_v44 }
 0x882   : > { %7956 = vmatmul.mubr.msk.f32.gmra.mxu0 %vm5925_vm7, %v5913_v51 }
 0x883   : > { %7980 = vmatprep.mubr.msk.f32.mxu0 %vm6094_vm8, %v6090_v29 }
 0x91a   : > { %v11572_v28 = vpop.f32.mrf.mxu0 }
 0x91b   : > { %v6026_v42 = vadd.f32 %v11572_v28, %v5914_v21 }
 0x91c   : > { %v7927_v13 = vpop.f32.mrf.mxu0 }
 0x91d   : > { %v6079_v17 = vmax.f32 %v6026_v42, 0.0 }
 0x91e   : > { %v6030_v50 = vpop.f32.mrf.mxu0 }
 0x91f   : > { %v6031_v63 = vadd.f32 %v6030_v50, %v5915_v61 }
 0x920   : > { %v7930_v55 = vpop.f32.mrf.mxu0 }
 0x921   : > { %v6080_v1 = vmax.f32 %v6031_v63, 0.0 }
 0x922   : > { %v6035_v16 = vpop.f32.mrf.mxu0 }
 0x923   : > { %v6036_v35 = vadd.f32 %v6035_v16, %v5916_v54 }
 0x924   : > { %v7933_v44 = vpop.f32.mrf.mxu0 }
 0x925   : > { %v6081_v32 = vmax.f32 %v6036_v35, 0.0 }
 0x926   : > { %v6040_v15 = vpop.f32.mrf.mxu0 }
 0x927   : > { %v6041_v14 = vadd.f32 %v6040_v15, %v5917_v23 }
 0x928   : > { %v7936_v45 = vpop.f32.mrf.mxu0 }
 0x929   : > { %v6082_v43 = vmax.f32 %v6041_v14, 0.0 }
 0x92a   : > { %v6045_v57 = vpop.f32.mrf.mxu0 }
 0x92b   : > { %v6046_v62 = vadd.f32 %v6045_v57, %v5918_v22 }
 0x92c   : > { %v7939_v4 = vpop.f32.mrf.mxu0 }
 0x92d   : > { %v6083_v39 = vmax.f32 %v6046_v62, 0.0 }
 0x92e   : > { %v6050_v36 = vpop.f32.mrf.mxu0 }
 0x92f   : > { %v6051_v10 = vadd.f32 %v6050_v36, %v5919_v18 }
 0x930   : > { %v7942_v12 = vpop.f32.mrf.mxu0 }
 0x931   : > { %v6084_v34 = vmax.f32 %v6051_v10, 0.0 }
 0x932   : > { %v6055_v11 = vpop.f32.mrf.mxu0 }
 0x933   : > { %v6056_v0 = vadd.f32 %v6055_v11, %v5920_v58 }
 0x934   : > { %v7945_v47 = vpop.f32.mrf.mxu0 }
 0x935   : > { %v6085_v30 = vmax.f32 %v6056_v0, 0.0 }
 0x936   : > { %v6060_v52 = vpop.f32.mrf.mxu0 }
 0x937   : > { %v6061_v9 = vadd.f32 %v6060_v52, %v5921_v7 }
 0x938   : > { %v7948_v37 = vpop.f32.mrf.mxu0 }
 0x939   : > { %v6086_v40 = vmax.f32 %v6061_v9, 0.0 }
 0x93a   : > { %v6065_v8 = vpop.f32.mrf.mxu0 }
 0x93b   : > { %v6066_v2 = vadd.f32 %v6065_v8, %v5922_v53 }
 0x93c   : > { %v7951_v5 = vpop.f32.mrf.mxu0 }
 0x93d   : > { %v6087_v3 = vmax.f32 %v6066_v2, 0.0 }
 0x93e   : > { %v6070_v33 = vpop.f32.mrf.mxu0 }
 0x93f   : > { %v6071_v24 = vadd.f32 %v6070_v33, %v5923_v38 }
 0x940   : > { %v7954_v60 = vpop.f32.mrf.mxu0 }
 0x941   : > { %v6088_v59 = vmax.f32 %v6071_v24, 0.0 }
 0x942   : > { %v6075_v20 = vpop.f32.mrf.mxu0 }
 0x943   : > { %v6076_v56 = vadd.f32 %v6075_v20, %v5924_v31 }
 0x944   : > { %v7957_v48 = vpop.f32.mrf.mxu0 }
 0x945   : > { %v6089_v41 = vmax.f32 %v6076_v56, 0.0 }
 0x947   : > { %7958 = vmatprep.subr.msk.mxu0 %vm2510_vm0, %v6089_v41 }
 0x948   : > { %7959 = vmatpush3.msk.msra.mxu0 %vm2510_vm0, %v6089_v41 }
 0x949   : > { %7960 = vmatprep.subr.mxu0 %v6088_v59 }
 0x94a   : > { %7961 = vmatpush3.msra.mxu0 %v6088_v59 }
 0x94b   : > { %7962 = vmatprep.subr.mxu0 %v6087_v3 }
 0x94c   : > { %7963 = vmatpush3.msra.mxu0 %v6087_v3 }
 0x94d   : > { %7964 = vmatprep.subr.mxu0 %v6086_v40 }
 0x94e   : > { %7965 = vmatpush3.msra.mxu0 %v6086_v40 }
 0x94f   : > { %7966 = vmatprep.subr.mxu0 %v6085_v30 }
 0x950   : > { %7967 = vmatpush3.msra.mxu0 %v6085_v30 }
 0x951   : > { %7968 = vmatprep.subr.mxu0 %v6084_v34 }
 0x952   : > { %7969 = vmatpush3.msra.mxu0 %v6084_v34 }
 0x953   : > { %7970 = vmatprep.subr.mxu0 %v6083_v39 }
 0x954   : > { %7971 = vmatpush3.msra.mxu0 %v6083_v39 }
 0x955   : > { %7972 = vmatprep.subr.mxu0 %v6082_v43 }
 0x956   : > { %7973 = vmatpush3.msra.mxu0 %v6082_v43 }
 0x957   : > { %7974 = vmatprep.subr.mxu0 %v6081_v32 }
 0x958   : > { %7975 = vmatpush3.msra.mxu0 %v6081_v32 }
 0x959   : > { %7976 = vmatprep.subr.mxu0 %v6080_v1 }
 0x95a   : > { %7977 = vmatpush3.msra.mxu0 %v6080_v1 }
 0x95b   : > { %7978 = vmatprep.subr.mxu0 %v6079_v17 }
 0x95c   : > { %7979 = vmatpush3.msra.mxu0 %v6079_v17 }
 0x95d   : > { %7981 = vmatmul.mubr.msk.f32.vlgmr.msra.gmra.mxu0 %vm6094_vm8, %v6091_v25 }
 0xa1d   : > { %v7982_v26 = vpop.f32.mrf.mxu0 }
 0xa1e   : > { %v6176_v27 = vadd.f32 %v7982_v26, %v6093_v6 }
 0xa1f   : > { %v6170_v19 = vpop.f32.mrf.mxu0 }
 0xa20   : > { %6182 = vst.msk [vmem:[%s509_s21 + $0x8] sm:$0x3] %vm6181_vm9, %v6176_v27  ;;  %v6171_v49 = vadd.f32 %v6170_v19, %v6092_v46 }
 0xa22   : > { %6180 = vst.msk [vmem:[%s509_s21] sm:$0xff] %vm6179_vm10, %v6171_v49 }
 0xa23 PF: > { %s26_s18 = sadd.s32 1, %s8052_s18  }
 0xa24   : > { %p23_p1 = scmp.ge.s32.totalorder %s26_s18, 4  }
 0xa26   :  { %25 = sbr.rel (!%p23_p1) target bundleno = 1 (0x1), region = 127 }
 0xa2b   :  { %6204 = vsyncpa [#allocation3], 1 }
 0xa2c   :  { %6206 = vsyncpa [#allocation3 + $0x1], 1 }

</bundles_post_ra>
